<compile_context>
chip_gen: v5e
topology: v5e:2x2
jax: 0.10.0
libtpu: 0.0.40
codegen_flags: <defaults>
</compile_context>

<pallas_src>
import numpy as np
import jax
import jax.numpy as jnp
from jax.experimental import pallas as pl
from jax.experimental.pallas import tpu as pltpu

NEG_SLOPE = 0.01       # F.leaky_relu default negative_slope (>= 0 required for
                       # the leaky_relu <-> max_pool commutation used below)
assert NEG_SLOPE >= 0.0
KX = KY = 4            # lattice & conv kernel size
PAD = 2                # nn.Conv2d padding
TK = 128               # K-chunk of the layer-1 matmul (grid axis)


# ----------------------------- Pallas kernel -------------------------------

def _leaky(t):
    return jnp.where(t >= 0.0, t, NEG_SLOPE * t)


def _offmax(a, n, base=0):
    """Max over the 4 pool-window offset blocks laid out along N."""
    r = a[:, base:base + n]
    for q in range(1, 4):
        r = jnp.maximum(r, a[:, base + q * n: base + (q + 1) * n])
    return r


def _hybrid_kernel(x_ref, w1_ref, cb1_ref,
                   lw2_ref, cw2_ref, cb2_ref,
                   lw3_ref, cw3_ref, cb3_ref,
                   fc1a_ref, fc1b_ref, fc1b_bias_ref,
                   fc2w_ref, fc2b_ref, fc3w_ref, fc3b_ref,
                   o_ref, acc_ref):
    k = pl.program_id(0)

    @pl.when(k == 0)
    def _():
        acc_ref[...] = jnp.zeros_like(acc_ref)

    # Layer 1 (lattice + conv branches, all 4 pool offsets) as ONE wide,
    # K-chunked matmul.  The (TK, 8*N1) weight chunk for step k+1 is DMA'd by
    # the BlockSpec pipeline while this dot runs.
    acc_ref[...] += jnp.dot(x_ref[...], w1_ref[...],
                            preferred_element_type=jnp.float32)

    @pl.when(k == pl.num_programs(0) - 1)
    def _():
        acc = acc_ref[...]                         # (M, 8*N1) f32
        n1 = cb1_ref.shape[1]
        lat = _leaky(_offmax(acc, n1, 0)).astype(jnp.bfloat16)
        cnv = _leaky(_offmax(acc, n1, 4 * n1) + cb1_ref[...]).astype(jnp.bfloat16)

        # ---- layer 2: one dot per branch, offsets merged along N ----
        n2 = cb2_ref.shape[1]
        a2l = jnp.dot(lat, lw2_ref[...], preferred_element_type=jnp.float32)
        a2c = jnp.dot(cnv, cw2_ref[...], preferred_element_type=jnp.float32)
        lat = _leaky(_offmax(a2l, n2)).astype(jnp.bfloat16)
        cnv = _leaky(_offmax(a2c, n2) + cb2_ref[...]).astype(jnp.bfloat16)

        # ---- layer 3 ----
        n3 = cb3_ref.shape[1]
        a3l = jnp.dot(lat, lw3_ref[...], preferred_element_type=jnp.float32)
        a3c = jnp.dot(cnv, cw3_ref[...], preferred_element_type=jnp.float32)
        x1 = _leaky(_offmax(a3l, n3)).astype(jnp.bfloat16)               # lattice
        x2 = _leaky(_offmax(a3c, n3) + cb3_ref[...]).astype(jnp.bfloat16)  # conv

        # ---- FC head; fc1 split across the two concatenated branches ----
        h = (jnp.dot(x1, fc1a_ref[...], preferred_element_type=jnp.float32)
             + jnp.dot(x2, fc1b_ref[...], preferred_element_type=jnp.float32)
             + fc1b_bias_ref[...])
        h = jnp.maximum(h, 0.0).astype(jnp.bfloat16)     # relu (drop1 = id)
        h = (jnp.dot(h, fc2w_ref[...], preferred_element_type=jnp.float32)
             + fc2b_ref[...])
        h = jnp.maximum(h, 0.0).astype(jnp.bfloat16)     # relu (drop2 = id)
        o_ref[...] = (jnp.dot(h, fc3w_ref[...], preferred_element_type=jnp.float32)
                      + fc3b_ref[...])


# ------------------------- parameter construction --------------------------

def build_join_convolve_tensor(signal_dim, kernel_dim, kernel_loc):
    M = np.zeros((signal_dim, signal_dim, kernel_dim), dtype=np.float32)
    for i in range(signal_dim):
        for j in range(i, signal_dim):
            for k in range(kernel_dim):
                if i == max(j, k + kernel_loc):
                    M[i, j, k] = 1.0
    return M


def build_meet_convolve_tensor(signal_dim, kernel_dim, kernel_loc):
    M = np.zeros((signal_dim, signal_dim, kernel_dim), dtype=np.float32)
    for i in range(signal_dim):
        for j in range(i, signal_dim):
            for k in range(kernel_dim):
                if i == min(j, k + kernel_loc):
                    M[i, j, k] = 1.0
    return M


def _to_pooled(W6):
    """(cin,Hi,Wi,cout,He,We) dense map -> (4, cin*Hi*Wi, cout*(He/2)*(We/2)).

    Column order is the NCHW flatten of the pooled output (g, X, Y); leading
    axis enumerates the 2x2 pool-window offsets (max is taken in-kernel).
    """
    cin, hi, wi, cout, he, we = W6.shape
    K = cin * hi * wi
    hp, wp = he // 2, we // 2
    Wm = W6.reshape(K, cout, hp, 2, wp, 2)
    Wm = Wm.transpose(3, 5, 0, 1, 2, 4)            # (u, v, K, g, X, Y)
    return np.ascontiguousarray(Wm.reshape(4, K, cout * hp * wp))


def _conv_axis_selector(H):
    """S[i, x, a] = 1 iff padded-conv output x reads input row i at tap a.

    Only the even-cropped output region kept by max_pool2d's floor is built.
    """
    He = 2 * ((H + 2 * PAD - KX + 1) // 2)
    S = np.zeros((H, He, KX), np.float32)
    for x in range(He):
        for a in range(KX):
            i = x - PAD + a
            if 0 <= i < H:
                S[i, x, a] = 1.0
    return S


def make_params(key, signal_dim, n_features, n_classes):
    keys = iter(jax.random.split(key, 16))

    # ---- lattice branch: LatticeCNNPool((4,4), [nf,8,8,8], pools (2,2)x3) ----
    feats = [n_features, 8, 8, 8]
    lat_p = []
    sx, sy = signal_dim
    for li in range(3):
        c_in = feats[li]
        ch = feats[li + 1] // 2
        cxm = build_meet_convolve_tensor(sx, KX, sx - KX)
        cym = build_meet_convolve_tensor(sy, KY, sy - KY)
        cxj = build_join_convolve_tensor(sx, KX, 0)
        cyj = build_join_convolve_tensor(sy, KY, 0)
        std = np.sqrt(2.0 / (KY * c_in * ch))     # kaiming_normal_, torch fan_in
        wm = np.asarray(jax.random.normal(next(keys), (KX, KY, c_in, ch)),
                        np.float32) * std
        wj = np.asarray(jax.random.normal(next(keys), (KX, KY, c_in, ch)),
                        np.float32) * std
        Wm6 = np.einsum('ixa,jyb,abfg->fijgxy', cxm, cym, wm, optimize=True)
        Wj6 = np.einsum('ixa,jyb,abfg->fijgxy', cxj, cyj, wj, optimize=True)
        W6 = np.concatenate([Wm6, Wj6], axis=3)   # torch.cat: meet channels first
        lat_p.append(_to_pooled(W6))              # (4, K, N) f32
        sx, sy = sx // 2, sy // 2                 # pool (2,2); bias zeros_ -> dropped

    # ---- standard conv branch: 3x Conv2d(4x4, pad=2) + lrelu + crop + pool ----
    conv_p, conv_b = [], []
    c_in = n_features
    hx, hy = signal_dim
    for li in range(3):
        c_out = 8
        fan_in = c_in * KX * KY
        bound = 1.0 / np.sqrt(fan_in)             # torch Conv2d default init
        Wc = np.asarray(jax.random.uniform(next(keys), (c_out, c_in, KX, KY),
                                           jnp.float32, -bound, bound))
        bc = np.asarray(jax.random.uniform(next(keys), (c_out,), jnp.float32,
                                           -bound, bound))
        Sx = _conv_axis_selector(hx)
        Sy = _conv_axis_selector(hy)
        W6 = np.einsum('ixa,jyb,gcab->cijgxy', Sx, Sy, Wc, optimize=True)
        hp, wp = Sx.shape[1] // 2, Sy.shape[1] // 2
        conv_p.append(_to_pooled(W6))
        conv_b.append(np.repeat(bc.astype(np.float32), hp * wp)[None, :])
        c_in, hx, hy = c_out, hp, wp

    def merge_offsets(p4):                        # (4, K, N) -> (K, 4N)
        return np.concatenate([p4[q] for q in range(4)], axis=1)

    # Layer 1: merge both branches + all 4 offsets into ONE matrix.
    # Column layout: [lat_q0 | lat_q1 | lat_q2 | lat_q3 | conv_q0 | ... | conv_q3]
    w1 = np.concatenate([merge_offsets(lat_p[0]), merge_offsets(conv_p[0])],
                        axis=1)

    # ---- FC head (torch Linear default init), weights stored (in, out) ----
    def linear(k, fin, fout):
        k1, k2 = jax.random.split(k)
        bound = 1.0 / np.sqrt(fin)
        W = jax.random.uniform(k1, (fin, fout), jnp.float32, -bound, bound)
        b = jax.random.uniform(k2, (1, fout), jnp.float32, -bound, bound)
        return W, b

    flat = 16 * (signal_dim[0] // 8) * (signal_dim[1] // 8)
    W1, b1 = linear(next(keys), flat, 32)
    half = flat // 2                    # x1 (lattice) rows | x2 (conv) rows
    W2, b2 = linear(next(keys), 32, 32)
    W3, b3 = linear(next(keys), 32, n_classes)

    bf = lambda a: jnp.asarray(a, jnp.bfloat16)
    f32 = lambda a: jnp.asarray(a, jnp.float32)

    return dict(
        w1=bf(w1),
        cb1=f32(conv_b[0]),
        lw2=bf(merge_offsets(lat_p[1])), cw2=bf(merge_offsets(conv_p[1])),
        cb2=f32(conv_b[1]),
        lw3=bf(merge_offsets(lat_p[2])), cw3=bf(merge_offsets(conv_p[2])),
        cb3=f32(conv_b[2]),
        fc1a=bf(W1[:half]), fc1b=bf(W1[half:]), fc1_b=f32(b1),
        fc2_w=bf(W2), fc2_b=f32(b2),
        fc3_w=bf(W3), fc3_b=f32(b3),
    )


# -------------------------------- forward ----------------------------------

@jax.jit
def hybrid_classifier_forward(params, x):
    B = x.shape[0]
    Mpad = max(16, ((B + 15) // 16) * 16)          # bf16 vreg tile is (16,128)
    xf = x.reshape(B, -1).astype(jnp.bfloat16)     # NCHW (c,i,j) flatten, bf16 DMA
    if Mpad != B:
        xf = jnp.pad(xf, ((0, Mpad - B), (0, 0)))

    K = xf.shape[1]
    tk = TK if (K % TK == 0) else K
    nsteps = K // tk

    w1 = params["w1"]
    n_classes = params["fc3_b"].shape[1]

    def const(arr):
        return pl.BlockSpec(arr.shape, lambda k: (0, 0))

    out = pl.pallas_call(
        _hybrid_kernel,
        out_shape=jax.ShapeDtypeStruct((Mpad, n_classes), jnp.float32),
        grid=(nsteps,),
        in_specs=[
            pl.BlockSpec((Mpad, tk), lambda k: (0, k)),           # x K-chunk
            pl.BlockSpec((tk, w1.shape[1]), lambda k: (k, 0)),    # layer-1 W chunk
            const(params["cb1"]),
            const(params["lw2"]), const(params["cw2"]), const(params["cb2"]),
            const(params["lw3"]), const(params["cw3"]), const(params["cb3"]),
            const(params["fc1a"]), const(params["fc1b"]), const(params["fc1_b"]),
            const(params["fc2_w"]), const(params["fc2_b"]),
            const(params["fc3_w"]), const(params["fc3_b"]),
        ],
        out_specs=pl.BlockSpec((Mpad, n_classes), lambda k: (0, 0)),
        scratch_shapes=[pltpu.VMEM((Mpad, w1.shape[1]), jnp.float32)],
        compiler_params=pltpu.CompilerParams(
            dimension_semantics=("arbitrary",),
            vmem_limit_bytes=32 * 1024 * 1024),
    )(xf, w1, params["cb1"],
      params["lw2"], params["cw2"], params["cb2"],
      params["lw3"], params["cw3"], params["cb3"],
      params["fc1a"], params["fc1b"], params["fc1_b"],
      params["fc2_w"], params["fc2_b"], params["fc3_w"], params["fc3_b"])
    return out[:B]


# --------------------------------- main -------------------------------------

if __name__ == "__main__":
    key = jax.random.PRNGKey(0)
    kp, kin = jax.random.split(key)

    signal_dim = (16, 16)
    n_features = 4
    n_classes = 8
    batch = 2

    params = make_params(kp, signal_dim, n_features, n_classes)
    x = jax.random.normal(
        kin, (batch, n_features, signal_dim[0], signal_dim[1]), jnp.float32)

    out = hybrid_classifier_forward(params, x)
    out = jax.block_until_ready(out)
    assert out.shape == (batch, n_classes), out.shape
    assert bool(jnp.all(jnp.isfinite(out)))
    print("KERNEL_OK")
</pallas_src>

<mosaic_0001>
module attributes {stable_mosaic.version = 11 : i64} {
  func.func @_hybrid_kernel(%arg0: i32, %arg1: memref<16x128xbf16, #tpu.memory_space<vmem>>, %arg2: memref<128x4096xbf16, #tpu.memory_space<vmem>>, %arg3: memref<1x512xf32, #tpu.memory_space<vmem>>, %arg4: memref<512x512xbf16, #tpu.memory_space<vmem>>, %arg5: memref<512x512xbf16, #tpu.memory_space<vmem>>, %arg6: memref<1x128xf32, #tpu.memory_space<vmem>>, %arg7: memref<128x128xbf16, #tpu.memory_space<vmem>>, %arg8: memref<128x128xbf16, #tpu.memory_space<vmem>>, %arg9: memref<1x32xf32, #tpu.memory_space<vmem>>, %arg10: memref<32x32xbf16, #tpu.memory_space<vmem>>, %arg11: memref<32x32xbf16, #tpu.memory_space<vmem>>, %arg12: memref<1x32xf32, #tpu.memory_space<vmem>>, %arg13: memref<32x32xbf16, #tpu.memory_space<vmem>>, %arg14: memref<1x32xf32, #tpu.memory_space<vmem>>, %arg15: memref<32x8xbf16, #tpu.memory_space<vmem>>, %arg16: memref<1x8xf32, #tpu.memory_space<vmem>>, %arg17: memref<16x8xf32, #tpu.memory_space<vmem>>, %arg18: memref<16x4096xf32, #tpu.memory_space<vmem>>) attributes {dimension_semantics = [#tpu.dimension_semantics<arbitrary>], iteration_bounds = array<i64: 8>, scalar_prefetch = 0 : i64, scratch_operands = 1 : i64, tpu.core_type = #tpu.core_type<tc>, window_params = [{transform_indices = @transform_0, window_bounds = array<i64: 16, 128>}, {transform_indices = @transform_1, window_bounds = array<i64: 128, 4096>}, {pipeline_mode = #tpu.pipeline_mode<synchronous>, transform_indices = @transform_2, window_bounds = array<i64: 1, 512>}, {pipeline_mode = #tpu.pipeline_mode<synchronous>, transform_indices = @transform_3, window_bounds = array<i64: 512, 512>}, {pipeline_mode = #tpu.pipeline_mode<synchronous>, transform_indices = @transform_4, window_bounds = array<i64: 512, 512>}, {pipeline_mode = #tpu.pipeline_mode<synchronous>, transform_indices = @transform_5, window_bounds = array<i64: 1, 128>}, {pipeline_mode = #tpu.pipeline_mode<synchronous>, transform_indices = @transform_6, window_bounds = array<i64: 128, 128>}, {pipeline_mode = #tpu.pipeline_mode<synchronous>, transform_indices = @transform_7, window_bounds = array<i64: 128, 128>}, {pipeline_mode = #tpu.pipeline_mode<synchronous>, transform_indices = @transform_8, window_bounds = array<i64: 1, 32>}, {pipeline_mode = #tpu.pipeline_mode<synchronous>, transform_indices = @transform_9, window_bounds = array<i64: 32, 32>}, {pipeline_mode = #tpu.pipeline_mode<synchronous>, transform_indices = @transform_10, window_bounds = array<i64: 32, 32>}, {pipeline_mode = #tpu.pipeline_mode<synchronous>, transform_indices = @transform_11, window_bounds = array<i64: 1, 32>}, {pipeline_mode = #tpu.pipeline_mode<synchronous>, transform_indices = @transform_12, window_bounds = array<i64: 32, 32>}, {pipeline_mode = #tpu.pipeline_mode<synchronous>, transform_indices = @transform_13, window_bounds = array<i64: 1, 32>}, {pipeline_mode = #tpu.pipeline_mode<synchronous>, transform_indices = @transform_14, window_bounds = array<i64: 32, 8>}, {pipeline_mode = #tpu.pipeline_mode<synchronous>, transform_indices = @transform_15, window_bounds = array<i64: 1, 8>}, {pipeline_mode = #tpu.pipeline_mode<synchronous>, transform_indices = @transform_16, window_bounds = array<i64: 16, 8>}]} {
    %c0_i32 = arith.constant 0 : i32
    %0 = arith.cmpi eq, %arg0, %c0_i32 : i32
    %1 = arith.extui %0 : i1 to i32
    %c0_i32_0 = arith.constant 0 : i32
    %2 = arith.cmpi ne, %1, %c0_i32_0 : i32
    scf.if %2 {
      %cst_9 = arith.constant 0.000000e+00 : f32
      %12 = vector.broadcast %cst_9 : f32 to vector<16x4096xf32>
      %c0_10 = arith.constant 0 : index
      %c0_11 = arith.constant 0 : index
      %13 = vector.load %arg18[%c0_10, %c0_11] : memref<16x4096xf32, #tpu.memory_space<vmem>>, vector<16x4096xf32>
      tpu.vector_store %arg18[%c0_10, %c0_11], %12 {strides = array<i32>} : memref<16x4096xf32, #tpu.memory_space<vmem>>, vector<16x4096xf32>,
    } else {
    }
    %c0 = arith.constant 0 : index
    %c0_1 = arith.constant 0 : index
    %3 = vector.load %arg18[%c0, %c0_1] : memref<16x4096xf32, #tpu.memory_space<vmem>>, vector<16x4096xf32>
    %c0_2 = arith.constant 0 : index
    %c0_3 = arith.constant 0 : index
    %4 = vector.load %arg1[%c0_2, %c0_3] : memref<16x128xbf16, #tpu.memory_space<vmem>>, vector<16x128xbf16>
    %c0_4 = arith.constant 0 : index
    %c0_5 = arith.constant 0 : index
    %5 = vector.load %arg2[%c0_4, %c0_5] : memref<128x4096xbf16, #tpu.memory_space<vmem>>, vector<128x4096xbf16>
    %cst = arith.constant dense<0.000000e+00> : vector<16x4096xf32>
    %6 = tpu.matmul %4, %5, %cst {dimension_numbers = #tpu.dot_dimension_numbers<[1], [0], [0], [1], [0, 0, 1, 1], [], []>} : vector<16x128xbf16>, vector<128x4096xbf16>, vector<16x4096xf32> -> vector<16x4096xf32>
    %7 = arith.addf %3, %6 : vector<16x4096xf32>
    %c0_6 = arith.constant 0 : index
    %c0_7 = arith.constant 0 : index
    %8 = vector.load %arg18[%c0_6, %c0_7] : memref<16x4096xf32, #tpu.memory_space<vmem>>, vector<16x4096xf32>
    tpu.vector_store %arg18[%c0_6, %c0_7], %7 {strides = array<i32>} : memref<16x4096xf32, #tpu.memory_space<vmem>>, vector<16x4096xf32>,
    %c7_i32 = arith.constant 7 : i32
    %9 = arith.cmpi eq, %arg0, %c7_i32 : i32
    %10 = arith.extui %9 : i1 to i32
    %c0_i32_8 = arith.constant 0 : i32
    %11 = arith.cmpi ne, %10, %c0_i32_8 : i32
    scf.if %11 {
      %c0_9 = arith.constant 0 : index
      %c0_10 = arith.constant 0 : index
      %12 = vector.load %arg18[%c0_9, %c0_10] : memref<16x4096xf32, #tpu.memory_space<vmem>>, vector<16x4096xf32>
      %13 = vector.extract_strided_slice %12 {offsets = [0, 0], sizes = [16, 512], strides = [1, 1]} : vector<16x4096xf32> to vector<16x512xf32>
      %14 = vector.extract_strided_slice %12 {offsets = [0, 512], sizes = [16, 512], strides = [1, 1]} : vector<16x4096xf32> to vector<16x512xf32>
      %15 = arith.maximumf %13, %14 : vector<16x512xf32>
      %16 = vector.extract_strided_slice %12 {offsets = [0, 1024], sizes = [16, 512], strides = [1, 1]} : vector<16x4096xf32> to vector<16x512xf32>
      %17 = arith.maximumf %15, %16 : vector<16x512xf32>
      %18 = vector.extract_strided_slice %12 {offsets = [0, 1536], sizes = [16, 512], strides = [1, 1]} : vector<16x4096xf32> to vector<16x512xf32>
      %19 = arith.maximumf %17, %18 : vector<16x512xf32>
      %cst_11 = arith.constant 0.000000e+00 : f32
      %20 = vector.broadcast %cst_11 : f32 to vector<16x512xf32>
      %21 = arith.cmpf oge, %19, %20 : vector<16x512xf32>
      %cst_12 = arith.constant 0.00999999977 : f32
      %22 = vector.broadcast %cst_12 : f32 to vector<16x512xf32>
      %23 = arith.mulf %22, %19 : vector<16x512xf32>
      %24 = arith.select %21, %19, %23 : vector<16x512xi1>, vector<16x512xf32>
      %25 = arith.truncf %24 : vector<16x512xf32> to vector<16x512xbf16>
      %26 = vector.extract_strided_slice %12 {offsets = [0, 2048], sizes = [16, 512], strides = [1, 1]} : vector<16x4096xf32> to vector<16x512xf32>
      %27 = vector.extract_strided_slice %12 {offsets = [0, 2560], sizes = [16, 512], strides = [1, 1]} : vector<16x4096xf32> to vector<16x512xf32>
      %28 = arith.maximumf %26, %27 : vector<16x512xf32>
      %29 = vector.extract_strided_slice %12 {offsets = [0, 3072], sizes = [16, 512], strides = [1, 1]} : vector<16x4096xf32> to vector<16x512xf32>
      %30 = arith.maximumf %28, %29 : vector<16x512xf32>
      %31 = vector.extract_strided_slice %12 {offsets = [0, 3584], sizes = [16, 512], strides = [1, 1]} : vector<16x4096xf32> to vector<16x512xf32>
      %32 = arith.maximumf %30, %31 : vector<16x512xf32>
      %c0_13 = arith.constant 0 : index
      %c0_14 = arith.constant 0 : index
      %33 = vector.load %arg3[%c0_13, %c0_14] : memref<1x512xf32, #tpu.memory_space<vmem>>, vector<1x512xf32>
      %34 = vector.broadcast %33 : vector<1x512xf32> to vector<16x512xf32>
      %35 = arith.addf %32, %34 : vector<16x512xf32>
      %cst_15 = arith.constant 0.000000e+00 : f32
      %36 = vector.broadcast %cst_15 : f32 to vector<16x512xf32>
      %37 = arith.cmpf oge, %35, %36 : vector<16x512xf32>
      %cst_16 = arith.constant 0.00999999977 : f32
      %38 = vector.broadcast %cst_16 : f32 to vector<16x512xf32>
      %39 = arith.mulf %38, %35 : vector<16x512xf32>
      %40 = arith.select %37, %35, %39 : vector<16x512xi1>, vector<16x512xf32>
      %41 = arith.truncf %40 : vector<16x512xf32> to vector<16x512xbf16>
      %c0_17 = arith.constant 0 : index
      %c0_18 = arith.constant 0 : index
      %42 = vector.load %arg4[%c0_17, %c0_18] : memref<512x512xbf16, #tpu.memory_space<vmem>>, vector<512x512xbf16>
      %cst_19 = arith.constant dense<0.000000e+00> : vector<16x512xf32>
      %43 = tpu.matmul %25, %42, %cst_19 {dimension_numbers = #tpu.dot_dimension_numbers<[1], [0], [0], [1], [0, 0, 1, 1], [], []>} : vector<16x512xbf16>, vector<512x512xbf16>, vector<16x512xf32> -> vector<16x512xf32>
      %c0_20 = arith.constant 0 : index
      %c0_21 = arith.constant 0 : index
      %44 = vector.load %arg5[%c0_20, %c0_21] : memref<512x512xbf16, #tpu.memory_space<vmem>>, vector<512x512xbf16>
      %cst_22 = arith.constant dense<0.000000e+00> : vector<16x512xf32>
      %45 = tpu.matmul %41, %44, %cst_22 {dimension_numbers = #tpu.dot_dimension_numbers<[1], [0], [0], [1], [0, 0, 1, 1], [], []>} : vector<16x512xbf16>, vector<512x512xbf16>, vector<16x512xf32> -> vector<16x512xf32>
      %46 = vector.extract_strided_slice %43 {offsets = [0, 0], sizes = [16, 128], strides = [1, 1]} : vector<16x512xf32> to vector<16x128xf32>
      %47 = vector.extract_strided_slice %43 {offsets = [0, 128], sizes = [16, 128], strides = [1, 1]} : vector<16x512xf32> to vector<16x128xf32>
      %48 = arith.maximumf %46, %47 : vector<16x128xf32>
      %49 = vector.extract_strided_slice %43 {offsets = [0, 256], sizes = [16, 128], strides = [1, 1]} : vector<16x512xf32> to vector<16x128xf32>
      %50 = arith.maximumf %48, %49 : vector<16x128xf32>
      %51 = vector.extract_strided_slice %43 {offsets = [0, 384], sizes = [16, 128], strides = [1, 1]} : vector<16x512xf32> to vector<16x128xf32>
      %52 = arith.maximumf %50, %51 : vector<16x128xf32>
      %cst_23 = arith.constant 0.000000e+00 : f32
      %53 = vector.broadcast %cst_23 : f32 to vector<16x128xf32>
      %54 = arith.cmpf oge, %52, %53 : vector<16x128xf32>
      %cst_24 = arith.constant 0.00999999977 : f32
      %55 = vector.broadcast %cst_24 : f32 to vector<16x128xf32>
      %56 = arith.mulf %55, %52 : vector<16x128xf32>
      %57 = arith.select %54, %52, %56 : vector<16x128xi1>, vector<16x128xf32>
      %58 = arith.truncf %57 : vector<16x128xf32> to vector<16x128xbf16>
      %59 = vector.extract_strided_slice %45 {offsets = [0, 0], sizes = [16, 128], strides = [1, 1]} : vector<16x512xf32> to vector<16x128xf32>
      %60 = vector.extract_strided_slice %45 {offsets = [0, 128], sizes = [16, 128], strides = [1, 1]} : vector<16x512xf32> to vector<16x128xf32>
      %61 = arith.maximumf %59, %60 : vector<16x128xf32>
      %62 = vector.extract_strided_slice %45 {offsets = [0, 256], sizes = [16, 128], strides = [1, 1]} : vector<16x512xf32> to vector<16x128xf32>
      %63 = arith.maximumf %61, %62 : vector<16x128xf32>
      %64 = vector.extract_strided_slice %45 {offsets = [0, 384], sizes = [16, 128], strides = [1, 1]} : vector<16x512xf32> to vector<16x128xf32>
      %65 = arith.maximumf %63, %64 : vector<16x128xf32>
      %c0_25 = arith.constant 0 : index
      %c0_26 = arith.constant 0 : index
      %66 = vector.load %arg6[%c0_25, %c0_26] : memref<1x128xf32, #tpu.memory_space<vmem>>, vector<1x128xf32>
      %67 = vector.broadcast %66 : vector<1x128xf32> to vector<16x128xf32>
      %68 = arith.addf %65, %67 : vector<16x128xf32>
      %cst_27 = arith.constant 0.000000e+00 : f32
      %69 = vector.broadcast %cst_27 : f32 to vector<16x128xf32>
      %70 = arith.cmpf oge, %68, %69 : vector<16x128xf32>
      %cst_28 = arith.constant 0.00999999977 : f32
      %71 = vector.broadcast %cst_28 : f32 to vector<16x128xf32>
      %72 = arith.mulf %71, %68 : vector<16x128xf32>
      %73 = arith.select %70, %68, %72 : vector<16x128xi1>, vector<16x128xf32>
      %74 = arith.truncf %73 : vector<16x128xf32> to vector<16x128xbf16>
      %c0_29 = arith.constant 0 : index
      %c0_30 = arith.constant 0 : index
      %75 = vector.load %arg7[%c0_29, %c0_30] : memref<128x128xbf16, #tpu.memory_space<vmem>>, vector<128x128xbf16>
      %cst_31 = arith.constant dense<0.000000e+00> : vector<16x128xf32>
      %76 = tpu.matmul %58, %75, %cst_31 {dimension_numbers = #tpu.dot_dimension_numbers<[1], [0], [0], [1], [0, 0, 1, 1], [], []>} : vector<16x128xbf16>, vector<128x128xbf16>, vector<16x128xf32> -> vector<16x128xf32>
      %c0_32 = arith.constant 0 : index
      %c0_33 = arith.constant 0 : index
      %77 = vector.load %arg8[%c0_32, %c0_33] : memref<128x128xbf16, #tpu.memory_space<vmem>>, vector<128x128xbf16>
      %cst_34 = arith.constant dense<0.000000e+00> : vector<16x128xf32>
      %78 = tpu.matmul %74, %77, %cst_34 {dimension_numbers = #tpu.dot_dimension_numbers<[1], [0], [0], [1], [0, 0, 1, 1], [], []>} : vector<16x128xbf16>, vector<128x128xbf16>, vector<16x128xf32> -> vector<16x128xf32>
      %79 = vector.extract_strided_slice %76 {offsets = [0, 0], sizes = [16, 32], strides = [1, 1]} : vector<16x128xf32> to vector<16x32xf32>
      %80 = vector.extract_strided_slice %76 {offsets = [0, 32], sizes = [16, 32], strides = [1, 1]} : vector<16x128xf32> to vector<16x32xf32>
      %81 = arith.maximumf %79, %80 : vector<16x32xf32>
      %82 = vector.extract_strided_slice %76 {offsets = [0, 64], sizes = [16, 32], strides = [1, 1]} : vector<16x128xf32> to vector<16x32xf32>
      %83 = arith.maximumf %81, %82 : vector<16x32xf32>
      %84 = vector.extract_strided_slice %76 {offsets = [0, 96], sizes = [16, 32], strides = [1, 1]} : vector<16x128xf32> to vector<16x32xf32>
      %85 = arith.maximumf %83, %84 : vector<16x32xf32>
      %cst_35 = arith.constant 0.000000e+00 : f32
      %86 = vector.broadcast %cst_35 : f32 to vector<16x32xf32>
      %87 = arith.cmpf oge, %85, %86 : vector<16x32xf32>
      %cst_36 = arith.constant 0.00999999977 : f32
      %88 = vector.broadcast %cst_36 : f32 to vector<16x32xf32>
      %89 = arith.mulf %88, %85 : vector<16x32xf32>
      %90 = arith.select %87, %85, %89 : vector<16x32xi1>, vector<16x32xf32>
      %91 = arith.truncf %90 : vector<16x32xf32> to vector<16x32xbf16>
      %92 = vector.extract_strided_slice %78 {offsets = [0, 0], sizes = [16, 32], strides = [1, 1]} : vector<16x128xf32> to vector<16x32xf32>
      %93 = vector.extract_strided_slice %78 {offsets = [0, 32], sizes = [16, 32], strides = [1, 1]} : vector<16x128xf32> to vector<16x32xf32>
      %94 = arith.maximumf %92, %93 : vector<16x32xf32>
      %95 = vector.extract_strided_slice %78 {offsets = [0, 64], sizes = [16, 32], strides = [1, 1]} : vector<16x128xf32> to vector<16x32xf32>
      %96 = arith.maximumf %94, %95 : vector<16x32xf32>
      %97 = vector.extract_strided_slice %78 {offsets = [0, 96], sizes = [16, 32], strides = [1, 1]} : vector<16x128xf32> to vector<16x32xf32>
      %98 = arith.maximumf %96, %97 : vector<16x32xf32>
      %c0_37 = arith.constant 0 : index
      %c0_38 = arith.constant 0 : index
      %99 = vector.load %arg9[%c0_37, %c0_38] : memref<1x32xf32, #tpu.memory_space<vmem>>, vector<1x32xf32>
      %100 = vector.broadcast %99 : vector<1x32xf32> to vector<16x32xf32>
      %101 = arith.addf %98, %100 : vector<16x32xf32>
      %cst_39 = arith.constant 0.000000e+00 : f32
      %102 = vector.broadcast %cst_39 : f32 to vector<16x32xf32>
      %103 = arith.cmpf oge, %101, %102 : vector<16x32xf32>
      %cst_40 = arith.constant 0.00999999977 : f32
      %104 = vector.broadcast %cst_40 : f32 to vector<16x32xf32>
      %105 = arith.mulf %104, %101 : vector<16x32xf32>
      %106 = arith.select %103, %101, %105 : vector<16x32xi1>, vector<16x32xf32>
      %107 = arith.truncf %106 : vector<16x32xf32> to vector<16x32xbf16>
      %c0_41 = arith.constant 0 : index
      %c0_42 = arith.constant 0 : index
      %108 = vector.load %arg10[%c0_41, %c0_42] : memref<32x32xbf16, #tpu.memory_space<vmem>>, vector<32x32xbf16>
      %cst_43 = arith.constant dense<0.000000e+00> : vector<16x32xf32>
      %109 = tpu.matmul %91, %108, %cst_43 {dimension_numbers = #tpu.dot_dimension_numbers<[1], [0], [0], [1], [0, 0, 1, 1], [], []>} : vector<16x32xbf16>, vector<32x32xbf16>, vector<16x32xf32> -> vector<16x32xf32>
      %c0_44 = arith.constant 0 : index
      %c0_45 = arith.constant 0 : index
      %110 = vector.load %arg11[%c0_44, %c0_45] : memref<32x32xbf16, #tpu.memory_space<vmem>>, vector<32x32xbf16>
      %cst_46 = arith.constant dense<0.000000e+00> : vector<16x32xf32>
      %111 = tpu.matmul %107, %110, %cst_46 {dimension_numbers = #tpu.dot_dimension_numbers<[1], [0], [0], [1], [0, 0, 1, 1], [], []>} : vector<16x32xbf16>, vector<32x32xbf16>, vector<16x32xf32> -> vector<16x32xf32>
      %112 = arith.addf %109, %111 : vector<16x32xf32>
      %c0_47 = arith.constant 0 : index
      %c0_48 = arith.constant 0 : index
      %113 = vector.load %arg12[%c0_47, %c0_48] : memref<1x32xf32, #tpu.memory_space<vmem>>, vector<1x32xf32>
      %114 = vector.broadcast %113 : vector<1x32xf32> to vector<16x32xf32>
      %115 = arith.addf %112, %114 : vector<16x32xf32>
      %cst_49 = arith.constant 0.000000e+00 : f32
      %116 = vector.broadcast %cst_49 : f32 to vector<16x32xf32>
      %117 = arith.maximumf %115, %116 : vector<16x32xf32>
      %118 = arith.truncf %117 : vector<16x32xf32> to vector<16x32xbf16>
      %c0_50 = arith.constant 0 : index
      %c0_51 = arith.constant 0 : index
      %119 = vector.load %arg13[%c0_50, %c0_51] : memref<32x32xbf16, #tpu.memory_space<vmem>>, vector<32x32xbf16>
      %cst_52 = arith.constant dense<0.000000e+00> : vector<16x32xf32>
      %120 = tpu.matmul %118, %119, %cst_52 {dimension_numbers = #tpu.dot_dimension_numbers<[1], [0], [0], [1], [0, 0, 1, 1], [], []>} : vector<16x32xbf16>, vector<32x32xbf16>, vector<16x32xf32> -> vector<16x32xf32>
      %c0_53 = arith.constant 0 : index
      %c0_54 = arith.constant 0 : index
      %121 = vector.load %arg14[%c0_53, %c0_54] : memref<1x32xf32, #tpu.memory_space<vmem>>, vector<1x32xf32>
      %122 = vector.broadcast %121 : vector<1x32xf32> to vector<16x32xf32>
      %123 = arith.addf %120, %122 : vector<16x32xf32>
      %cst_55 = arith.constant 0.000000e+00 : f32
      %124 = vector.broadcast %cst_55 : f32 to vector<16x32xf32>
      %125 = arith.maximumf %123, %124 : vector<16x32xf32>
      %126 = arith.truncf %125 : vector<16x32xf32> to vector<16x32xbf16>
      %c0_56 = arith.constant 0 : index
      %c0_57 = arith.constant 0 : index
      %127 = vector.load %arg15[%c0_56, %c0_57] : memref<32x8xbf16, #tpu.memory_space<vmem>>, vector<32x8xbf16>
      %cst_58 = arith.constant dense<0.000000e+00> : vector<16x8xf32>
      %128 = tpu.matmul %126, %127, %cst_58 {dimension_numbers = #tpu.dot_dimension_numbers<[1], [0], [0], [1], [0, 0, 1, 1], [], []>} : vector<16x32xbf16>, vector<32x8xbf16>, vector<16x8xf32> -> vector<16x8xf32>
      %c0_59 = arith.constant 0 : index
      %c0_60 = arith.constant 0 : index
      %129 = vector.load %arg16[%c0_59, %c0_60] : memref<1x8xf32, #tpu.memory_space<vmem>>, vector<1x8xf32>
      %130 = vector.broadcast %129 : vector<1x8xf32> to vector<16x8xf32>
      %131 = arith.addf %128, %130 : vector<16x8xf32>
      %c0_61 = arith.constant 0 : index
      %c0_62 = arith.constant 0 : index
      %132 = vector.load %arg17[%c0_61, %c0_62] : memref<16x8xf32, #tpu.memory_space<vmem>>, vector<16x8xf32>
      tpu.vector_store %arg17[%c0_61, %c0_62], %131 {strides = array<i32>} : memref<16x8xf32, #tpu.memory_space<vmem>>, vector<16x8xf32>,
    } else {
    }
    return
  }
  func.func @transform_0(%arg0: i32) -> (i32, i32) {
    %c0_i32 = arith.constant 0 : i32
    %c0_i32_0 = arith.constant 0 : i32
    return %c0_i32, %arg0 : i32, i32
  }
  func.func @transform_1(%arg0: i32) -> (i32, i32) {
    %c0_i32 = arith.constant 0 : i32
    %c0_i32_0 = arith.constant 0 : i32
    return %arg0, %c0_i32 : i32, i32
  }
  func.func @transform_2(%arg0: i32) -> (i32, i32) {
    %c0_i32 = arith.constant 0 : i32
    %c0_i32_0 = arith.constant 0 : i32
    %c0_i32_1 = arith.constant 0 : i32
    return %c0_i32, %c0_i32_0 : i32, i32
  }
  func.func @transform_3(%arg0: i32) -> (i32, i32) {
    %c0_i32 = arith.constant 0 : i32
    %c0_i32_0 = arith.constant 0 : i32
    %c0_i32_1 = arith.constant 0 : i32
    return %c0_i32, %c0_i32_0 : i32, i32
  }
  func.func @transform_4(%arg0: i32) -> (i32, i32) {
    %c0_i32 = arith.constant 0 : i32
    %c0_i32_0 = arith.constant 0 : i32
    %c0_i32_1 = arith.constant 0 : i32
    return %c0_i32, %c0_i32_0 : i32, i32
  }
  func.func @transform_5(%arg0: i32) -> (i32, i32) {
    %c0_i32 = arith.constant 0 : i32
    %c0_i32_0 = arith.constant 0 : i32
    %c0_i32_1 = arith.constant 0 : i32
    return %c0_i32, %c0_i32_0 : i32, i32
  }
  func.func @transform_6(%arg0: i32) -> (i32, i32) {
    %c0_i32 = arith.constant 0 : i32
    %c0_i32_0 = arith.constant 0 : i32
    %c0_i32_1 = arith.constant 0 : i32
    return %c0_i32, %c0_i32_0 : i32, i32
  }
  func.func @transform_7(%arg0: i32) -> (i32, i32) {
    %c0_i32 = arith.constant 0 : i32
    %c0_i32_0 = arith.constant 0 : i32
    %c0_i32_1 = arith.constant 0 : i32
    return %c0_i32, %c0_i32_0 : i32, i32
  }
  func.func @transform_8(%arg0: i32) -> (i32, i32) {
    %c0_i32 = arith.constant 0 : i32
    %c0_i32_0 = arith.constant 0 : i32
    %c0_i32_1 = arith.constant 0 : i32
    return %c0_i32, %c0_i32_0 : i32, i32
  }
  func.func @transform_9(%arg0: i32) -> (i32, i32) {
    %c0_i32 = arith.constant 0 : i32
    %c0_i32_0 = arith.constant 0 : i32
    %c0_i32_1 = arith.constant 0 : i32
    return %c0_i32, %c0_i32_0 : i32, i32
  }
  func.func @transform_10(%arg0: i32) -> (i32, i32) {
    %c0_i32 = arith.constant 0 : i32
    %c0_i32_0 = arith.constant 0 : i32
    %c0_i32_1 = arith.constant 0 : i32
    return %c0_i32, %c0_i32_0 : i32, i32
  }
  func.func @transform_11(%arg0: i32) -> (i32, i32) {
    %c0_i32 = arith.constant 0 : i32
    %c0_i32_0 = arith.constant 0 : i32
    %c0_i32_1 = arith.constant 0 : i32
    return %c0_i32, %c0_i32_0 : i32, i32
  }
  func.func @transform_12(%arg0: i32) -> (i32, i32) {
    %c0_i32 = arith.constant 0 : i32
    %c0_i32_0 = arith.constant 0 : i32
    %c0_i32_1 = arith.constant 0 : i32
    return %c0_i32, %c0_i32_0 : i32, i32
  }
  func.func @transform_13(%arg0: i32) -> (i32, i32) {
    %c0_i32 = arith.constant 0 : i32
    %c0_i32_0 = arith.constant 0 : i32
    %c0_i32_1 = arith.constant 0 : i32
    return %c0_i32, %c0_i32_0 : i32, i32
  }
  func.func @transform_14(%arg0: i32) -> (i32, i32) {
    %c0_i32 = arith.constant 0 : i32
    %c0_i32_0 = arith.constant 0 : i32
    %c0_i32_1 = arith.constant 0 : i32
    return %c0_i32, %c0_i32_0 : i32, i32
  }
  func.func @transform_15(%arg0: i32) -> (i32, i32) {
    %c0_i32 = arith.constant 0 : i32
    %c0_i32_0 = arith.constant 0 : i32
    %c0_i32_1 = arith.constant 0 : i32
    return %c0_i32, %c0_i32_0 : i32, i32
  }
  func.func @transform_16(%arg0: i32) -> (i32, i32) {
    %c0_i32 = arith.constant 0 : i32
    %c0_i32_0 = arith.constant 0 : i32
    %c0_i32_1 = arith.constant 0 : i32
    return %c0_i32, %c0_i32_0 : i32, i32
  }
}

</mosaic_0001>

<bundles_post_ra>
// kernel: hybrid_classifier_forward.1
= control target key start
LH: loop header
LB: loop body
LE: loop exit
PB: predicated region body
PF: predicated region fallthrough
CT: control target
= control target key end

     0   :  { %s10575_s0 = inlined_call_operand.vmem [shape: bf16[16,1024], index: 0, kind: input, shape index: {}]   ;;  %s10576_s1 = inlined_call_operand.hbm [shape: bf16[1024,4096], index: 1, kind: input, shape index: {}]   ;;  %s10577_s2 = inlined_call_operand.hbm [shape: f32[1,512], index: 2, kind: input, shape index: {}]   ;;  %s10578_s3 = inlined_call_operand.hbm [shape: bf16[512,512], index: 3, kind: input, shape index: {}]   ;;  %s10579_s4 = inlined_call_operand.hbm [shape: bf16[512,512], index: 4, kind: input, shape index: {}]   ;;  %s10580_s5 = inlined_call_operand.hbm [shape: f32[1,128], index: 5, kind: input, shape index: {}]   ;;  %s10581_s6 = inlined_call_operand.hbm [shape: bf16[128,128], index: 6, kind: input, shape index: {}]   ;;  %s10582_s7 = inlined_call_operand.hbm [shape: bf16[128,128], index: 7, kind: input, shape index: {}]   ;;  %s10583_s8 = inlined_call_operand.hbm [shape: f32[1,32], index: 8, kind: input, shape index: {}]   ;;  %s10584_s9 = inlined_call_operand.hbm [shape: bf16[32,32], index: 9, kind: input, shape index: {}]   ;;  %s10585_s10 = inlined_call_operand.hbm [shape: bf16[32,32], index: 10, kind: input, shape index: {}]   ;;  %s10586_s11 = inlined_call_operand.hbm [shape: f32[1,32], index: 11, kind: input, shape index: {}]   ;;  %s10587_s12 = inlined_call_operand.hbm [shape: bf16[32,32], index: 12, kind: input, shape index: {}]   ;;  %s10588_s13 = inlined_call_operand.hbm [shape: f32[1,32], index: 13, kind: input, shape index: {}]   ;;  %s10589_s14 = inlined_call_operand.vmem [shape: bf16[32,8], index: 14, kind: input, shape index: {}]   ;;  %s10590_s15 = inlined_call_operand.hbm [shape: f32[1,8], index: 15, kind: input, shape index: {}]   ;;  %s10591_s16 = inlined_call_operand.vmem [shape: f32[16,8], index: 16, kind: output, shape index: {}]  }
   0x1   :  { %10605 = sst [smem:[#allocation39_spill]] %s10575_s0 }
   0x2   :  { %10606 = sst [smem:[#allocation40_spill]] %s10577_s2 }
   0x3   :  { %10607 = sst [smem:[#allocation41_spill]] %s10578_s3 }
   0x4   :  { %10608 = sst [smem:[#allocation42_spill]] %s10579_s4 }
   0x5   :  { %10609 = sst [smem:[#allocation43_spill]] %s10581_s6 }
   0x6   :  { %10610 = sst [smem:[#allocation44_spill]] %s10589_s14 }
   0x7   :  { %10611 = sst [smem:[#allocation45_spill]] %s10591_s16 }
   0x8   :  { %21 = vsyncpa [#allocation5], 0 }
   0x9   :  { %23 = vsyncpa [#allocation5 + $0x1], 0 }
   0xa   :  { %24 = vsyncpa [#allocation7], 0 }
   0xb   :  { %25 = vsyncpa [#allocation10], 0 }
   0xc   :  { %26 = vsyncpa [#allocation13], 0 }
   0xd   :  { %27 = vsyncpa [#allocation16], 0 }
   0xe   :  { %28 = vsyncpa [#allocation19], 0 }
   0xf   :  { %29 = vsyncpa [#allocation22], 0 }
  0x10   :  { %30 = vsyncpa [#allocation25], 0  ;;  %s9329_s21 = smov 0   ;;  %s9331_s22 = smov 0  }
  0x11   :  { %s9333_s23 = smov 0   ;;  %s9335_s24 = smov 0  }
  0x12 LB: > { %10612 = sst [smem:[#allocation34_spill]] %s9211_s22  ;;  %s9348_s25 = sadd.s32 4294967295, %s9219_s24   ;;  %s9219_s24 = sphi %s9335_s24, %s10644_s24   ;;  %s9215_s23 = sphi %s9333_s23, %s10648_s23   ;;  %s9211_s22 = sphi %s9331_s22, %s10647_s22   ;;  %s9207_s21 = sphi %s9329_s21, %s10645_s21  }
  0x13   : > { %10613 = sst [smem:[#allocation35_spill]] %s9348_s25  ;;  %s9351_s26 = sadd.s32 1, %s9219_s24  }
  0x14   : > { %10614 = sst [smem:[#allocation36_spill]] %s9351_s26  ;;  %s40_s27 = ssub.s32 %s9219_s24, %s9351_s26 }
  0x15   : > { %s43_s28 = sadd.s32 1, %s9215_s23  ;;  %p41_p0 = scmp.eq.s32.totalorder %s40_s27, 0 }
  0x16   : > { %p50_p1 = scmp.ne.s32.totalorder %s9215_s23, %s9211_s22  ;;  %p51_p2 = scmp.eq.s32.totalorder %s9219_s24, 0 }
  0x17   : > { %p82_p3 = scmp.ne.s32.totalorder %s9211_s22, %s9207_s21  ;;  %p83_p5 = scmp.eq.s32.totalorder %s9348_s25, 0 }
  0x18   : > { %s9361_s29 = scalar_select %p41_p0, %s9215_s23, %s43_s28  }
  0x19   : > { %p9363_p4 = por %p51_p2, %p50_p1  ;;  %p5826_p6 = scmp.ge.s32.totalorder %s9219_s24, 1 }
  0x1a   : > { %10615 = sst [smem:[#allocation37_spill]] %s9361_s29  ;;  %p408_p7 = scmp.lt.s32.totalorder %s9219_s24, 9 }
  0x1b   : > { %p9372_p8 = por %p83_p5, %p82_p3  ;;  %p5827_p9 = scmp.ne.s32.totalorder %s9348_s25, 0 }
  0x1c   : > { %p9377_p10 = pnand %p5826_p6, %p408_p7  ;;  %s10620_s2 = sld [smem:[#allocation40_spill]] }
  0x1d   : > { %s10617_s0 = scalar_select %p9372_p8, 1, 0 }
  0x1e   : > { %p8612_p11 = pneg %p9377_p10  ;;  %s9221_s21 = smov [#allocation6]  }
  0x1f   : > { %10618 = sst [smem:[#allocation38_spill]] %s10617_s0  ;;  %s422_s27 = sshll.u32 %s9221_s21, 4  ;;  %s423_s27 = int_to_ptr.vmem [resolvable:$true] %s422_s27 }
  0x20   : > { %p9388_p12 = pnand %p8612_p11, %p83_p5  ;;  %s10622_s4 = sld [smem:[#allocation42_spill]] }
  0x21   : > { %s9222_s18 = smov [#allocation9]   ;;  %s10623_s6 = sld [smem:[#allocation43_spill]] }
  0x22   : > { %s420_s20 = sshll.u32 %s10620_s2, 4  ;;  %s447_s19 = sshll.u32 %s9222_s18, 4  ;;  %s421_s20 = int_to_ptr.hbm [resolvable:$true] %s420_s20  ;;  %s448_s19 = int_to_ptr.vmem [resolvable:$true] %s447_s19 }
  0x23   : > { %8615 = dma.hbm_to_vmem [thread:$0]  (!%p9388_p12), %s421_s20, 64, %s423_s27, [#allocation7]  }
  0x24   : > { %s10601_s25 = smov 256   ;;  %s10602_s0 = smov 16  }
  0x25   : > { %s9225_s26 = smov [#allocation12]   ;;  %s500_s18 = sshll.u32 %s10583_s8, 4  ;;  %s501_s18 = int_to_ptr.hbm [resolvable:$true] %s500_s18 }
  0x26   : > { %s445_s16 = sshll.u32 %s10622_s4, 4  ;;  %s473_s29 = sshll.u32 %s9225_s26, 4  ;;  %s446_s16 = int_to_ptr.hbm [resolvable:$true] %s445_s16  ;;  %s474_s29 = int_to_ptr.vmem [resolvable:$true] %s473_s29 }
  0x27   : > { %s471_s14 = sshll.u32 %s10623_s6, 4  ;;  %s10603_s2 = smov 64   ;;  %s472_s14 = int_to_ptr.hbm [resolvable:$true] %s471_s14 }
  0x28   : > { %8621 = dma.hbm_to_vmem [thread:$0]  (!%p9388_p12), %s446_s16, 16384, %s448_s19, [#allocation10], %s10601_s25, %s10601_s25, %s10602_s0  }
  0x29   : > { %s9227_s21 = smov 4   ;;  %s9228_s4 = smov [#allocation15]  }
  0x2a   : > { %8627 = dma.hbm_to_vmem [thread:$0]  (!%p9388_p12), %s472_s14, 1024, %s474_s29, [#allocation13], %s10603_s2, %s10603_s2, %s9227_s21  }
  0x2b   : > { %s502_s6 = sshll.u32 %s9228_s4, 4  ;;  %s525_s19 = sshll.u32 %s10585_s10, 4  ;;  %s503_s6 = int_to_ptr.vmem [resolvable:$true] %s502_s6  ;;  %s526_s19 = int_to_ptr.hbm [resolvable:$true] %s525_s19 }
  0x2c   : > { %8633 = dma.hbm_to_vmem [thread:$0]  (!%p9388_p12), %s501_s18, 16, %s503_s6, [#allocation16]  }
  0x2d   : > { %s551_s27 = sshll.u32 %s10587_s12, 4  ;;  %s9229_s25 = smov [#allocation18]   ;;  %s552_s27 = int_to_ptr.hbm [resolvable:$true] %s551_s27 }
  0x2e   : > { %s527_s0 = sshll.u32 %s9229_s25, 4  ;;  %s9230_s4 = smov [#allocation21]   ;;  %s528_s0 = int_to_ptr.vmem [resolvable:$true] %s527_s0 }
  0x2f   : > { %8639 = dma.hbm_to_vmem [thread:$0]  (!%p9388_p12), %s526_s19, 256, %s528_s0, [#allocation19], %s10603_s2, %s10603_s2, %s9227_s21  }
  0x30   : > { %s553_s14 = sshll.u32 %s9230_s4, 4  ;;  %s10624_s3 = sld [smem:[#allocation41_spill]]  ;;  %s554_s14 = int_to_ptr.vmem [resolvable:$true] %s553_s14 }
  0x31   : > { %8645 = dma.hbm_to_vmem [thread:$0]  (!%p9388_p12), %s552_s27, 256, %s554_s14, [#allocation22], %s10603_s2, %s10603_s2, %s9227_s21  }
  0x32   : > { %s460_s16 = sshll.u32 %s10580_s5, 4  ;;  %s9231_s26 = smov [#allocation8]   ;;  %s461_s16 = int_to_ptr.hbm [resolvable:$true] %s460_s16 }
  0x33   : > { %s433_s0 = sshll.u32 %s9231_s26, 4  ;;  %s10625_s19 = smov 16   ;;  %s434_s0 = int_to_ptr.vmem [resolvable:$true] %s433_s0 }
  0x34   : > { %s10626_s20 = smov 256   ;;  %s9232_s4 = smov [#allocation11]  }
  0x35   : > { %s462_s22 = sshll.u32 %s9232_s4, 4  ;;  %s485_s27 = sshll.u32 %s10582_s7, 4  ;;  %s463_s22 = int_to_ptr.vmem [resolvable:$true] %s462_s22  ;;  %s486_s27 = int_to_ptr.hbm [resolvable:$true] %s485_s27 }
  0x36   : > { %s431_s6 = sshll.u32 %s10624_s3, 4  ;;  %s511_s18 = sshll.u32 %s10584_s9, 4  ;;  %s432_s6 = int_to_ptr.hbm [resolvable:$true] %s431_s6  ;;  %s512_s18 = int_to_ptr.hbm [resolvable:$true] %s511_s18 }
  0x37   : > { %8618 = dma.hbm_to_vmem [thread:$0]  (!%p9388_p12), %s432_s6, 16384, %s434_s0, [#allocation7], %s10626_s20, %s10626_s20, %s10625_s19  }
  0x38   : > { %8624 = dma.hbm_to_vmem [thread:$0]  (!%p9388_p12), %s461_s16, 16, %s463_s22, [#allocation10]  }
  0x39   : > { %s9233_s26 = smov [#allocation14]   ;;  %s10627_s6 = smov 64  }
  0x3a   : > { %s487_s2 = sshll.u32 %s9233_s26, 4  ;;  %s9234_s3 = smov [#allocation17]   ;;  %s488_s2 = int_to_ptr.vmem [resolvable:$true] %s487_s2 }
  0x3b   : > { %8630 = dma.hbm_to_vmem [thread:$0]  (!%p9388_p12), %s486_s27, 1024, %s488_s2, [#allocation13], %s10627_s6, %s10627_s6, %s9227_s21  }
  0x3c   : > { %s513_s0 = sshll.u32 %s9234_s3, 4  ;;  %s540_s16 = sshll.u32 %s10586_s11, 4  ;;  %s514_s0 = int_to_ptr.vmem [resolvable:$true] %s513_s0  ;;  %s541_s16 = int_to_ptr.hbm [resolvable:$true] %s540_s16 }
  0x3d   : > { %8636 = dma.hbm_to_vmem [thread:$0]  (!%p9388_p12), %s512_s18, 256, %s514_s0, [#allocation16], %s10627_s6, %s10627_s6, %s9227_s21  }
  0x3e   : > { %s566_s29 = sshll.u32 %s10588_s13, 4  ;;  %s9235_s2 = smov [#allocation20]   ;;  %s567_s29 = int_to_ptr.hbm [resolvable:$true] %s566_s29 }
  0x3f   : > { %s542_s27 = sshll.u32 %s9235_s2, 4  ;;  %s9236_s14 = smov [#allocation23]   ;;  %s543_s27 = int_to_ptr.vmem [resolvable:$true] %s542_s27 }
  0x40   : > { %8642 = dma.hbm_to_vmem [thread:$0]  (!%p9388_p12), %s541_s16, 16, %s543_s27, [#allocation19]  }
  0x41   : > { %s568_s25 = sshll.u32 %s9236_s14, 4  ;;  %s581_s19 = sshll.u32 %s10590_s15, 4  ;;  %s569_s25 = int_to_ptr.vmem [resolvable:$true] %s568_s25  ;;  %s582_s19 = int_to_ptr.hbm [resolvable:$true] %s581_s19 }
  0x42   : > { %8648 = dma.hbm_to_vmem [thread:$0]  (!%p9388_p12), %s567_s29, 16, %s569_s25, [#allocation22]  }
  0x43   : > { %s9237_s21 = smov [#allocation24]   ;;  %p5840_p13 = scmp.ge.s32.totalorder %s9219_s24, 8 }
  0x44   : > { %s583_s18 = sshll.u32 %s9237_s21, 4  ;;  %s584_s18 = int_to_ptr.vmem [resolvable:$true] %s583_s18 }
  0x45   : > { %8651 = dma.hbm_to_vmem [thread:$0]  (!%p9388_p12), %s582_s19, 16, %s584_s18, [#allocation25]  }
  0x46   : > { %590 = sbr.rel (%p5840_p13) target bundleno = 104 (0x68), region = 72 }
  0x4b   : > { %593 = sbr.rel (!%p9363_p4) target bundleno = 87 (0x57), region = 76  ;;  %s595_s6 = sand.u32 (%p9363_p4), 1, %s9215_s23  }
  0x4c   : > { %s5842_s0 = sshll.u32 (%p9363_p4), %s9219_s24, 2  ;;  %s5841_s20 = sshll.u32 (%p9363_p4), %s595_s6, 3 }
  0x4d   : > { %s10628_s22 = sld [smem:[#allocation39_spill]] (%p9363_p4)  ;;  %s597_s2 = scalar_lea.vmem (%p9363_p4), [#allocation3], %s5841_s20 }
  0x53   : > { %s599_s29 = scalar_lea.vmem %s10628_s22, %s5842_s0 }
  0x54   : > { %v616_v0 = vld [vmem:[%s599_s29] sm:$0xf] }
  0x55   : > { %v618_v1 = vld [vmem:[%s599_s29 + $0x20] sm:$0xf]  ;;  %617 = vst [vmem:[%s597_s2] sm:$0xf] %v616_v0 }
  0x56   : > { %619 = vst [vmem:[%s597_s2 + $0x4] sm:$0xf] %v618_v1 }
  0x57 PF: > { %s648_s28 = sand.u32 1, %s9215_s23   ;;  %s8020_s27 = sshll.u32 %s9219_s24, 11 }
  0x58   : > { %s5843_s14 = sshll.u32 %s648_s28, 11  ;;  %s658_s3 = scalar_lea.hbm %s10576_s1, %s8020_s27 }
  0x59   : > { %s659_s19 = sshll.u32 %s658_s3, 4  ;;  %s652_s21 = scalar_lea.vmem [#allocation4], %s5843_s14  ;;  %s660_s19 = int_to_ptr.hbm [resolvable:$true] %s659_s19 }
  0x5a   : > { %s661_s18 = sshll.u32 %s652_s21, 4  ;;  %s649_s6 = scalar_lea.sflag [#allocation5], %s648_s28  ;;  %s662_s18 = int_to_ptr.vmem [resolvable:$true] %s661_s18 }
  0x5b   : > { %s9129_s0 = sshra.s32 %s660_s19, 4  ;;  %s9135_s4 = scalar_lea.hbm %s10576_s1, 16384  ;;  %s9130_s0 = int_to_ptr.hbm [resolvable:$true] %s9129_s0 }
  0x5c   : > { %s9131_s20 = scalar_lea.hbm %s9130_s0, 2048  ;;  %p9136_p3 = scmp.lt.s32.totalorder %s9130_s0, %s10576_s1 }
  0x5d   : > { %p9132_p0 = scmp.ne.s32.totalorder %s9130_s0, %s9131_s20  ;;  %p9137_p6 = scmp.lt.s32.totalorder %s9135_s4, %s9131_s20 }
  0x5f   : > { %p9133_p1 = pnand %p9132_p0, %p9363_p4  ;;  %p9138_p7 = por %p9137_p6, %p9136_p3 }
  0x61   : > { %p9134_p2 = pneg %p9133_p1 }
  0x63   : > { %p9139_p11 = pnand %p9138_p7, %p9134_p2 }
  0x65   : > { %9142 = shalt.err (!%p9139_p11)
}
  0x66   : > { %s9238_s2 = smov 2048   ;;  %s9239_s28 = smov 128  }
  0x67   : > { %8584 = dma.hbm_to_vmem [thread:$0]  (%p9363_p4), %s660_s19, 32768, %s662_s18, %s649_s6, %s9238_s2, %s9238_s2, %s9239_s28  }
  0x68 PF: > { %673 = sbr.rel (%p9377_p10) target bundleno = 1720 (0x6b8), region = 121  ;;  %s10629_s27 = sld [smem:[#allocation34_spill]] (!%p9377_p10) }
  0x6e   : > { %s676_s25 = sand.u32 1, %s10629_s27  }
  0x6f   : > { %s5848_s26 = sshll.u32 %s676_s25, 3  ;;  %s5849_s3 = sshll.u32 %s676_s25, 11 }
  0x70   : > { %s9501_s21 = scalar_lea.vmem [#allocation3], %s5848_s26  ;;  %s683_s0 = scalar_lea.sflag [#allocation5], %s676_s25 }
  0x71   : > { %s9503_s20 = scalar_lea.vmem [#allocation4], %s5849_s3 }
  0x72   : > { %9174 = dma.done.wait (%p9372_p8), %s683_s0, 32768  }
  0x73   : > { %9176 = vsyncadd (%p9372_p8), %s683_s0, 4294934528 }
  0x74   : > { %9178 = dma.done.wait (%p83_p5), [#allocation7], 16448  }
  0x75   : > { %9180 = vsyncadd (%p83_p5), [#allocation7], 4294950848 }
  0x76   : > { %9182 = dma.done.wait (%p83_p5), [#allocation10], 16400  }
  0x77   : > { %9184 = vsyncadd (%p83_p5), [#allocation10], 4294950896 }
  0x78   : > { %9186 = dma.done.wait (%p83_p5), [#allocation13], 2048  }
  0x79   : > { %9188 = vsyncadd (%p83_p5), [#allocation13], 4294965248 }
  0x7a   : > { %9190 = dma.done.wait (%p83_p5), [#allocation16], 272  }
  0x7b   : > { %9192 = vsyncadd (%p83_p5), [#allocation16], 4294967024 }
  0x7c   : > { %9194 = dma.done.wait (%p83_p5), [#allocation19], 272  }
  0x7d   : > { %9196 = vsyncadd (%p83_p5), [#allocation19], 4294967024 }
  0x7e   : > { %9198 = dma.done.wait (%p83_p5), [#allocation22], 272  }
  0x7f   : > { %9200 = vsyncadd (%p83_p5), [#allocation22], 4294967024 }
  0x80   : > { %9202 = dma.done.wait (%p83_p5), [#allocation25], 16  }
  0x81   : > { %9204 = vsyncadd (%p83_p5), [#allocation25], 4294967280  ;;  %805 = sbr.rel (%p5827_p9) target bundleno = 199 (0xc7), region = 185 }
  0x86   : > { %v9240_v2 = vmov 0.0  }
  0x87   : > { %806 = vst [vmem:[#allocation2 + $0xb0] sm:$0xff] %v9240_v2 }
  0x88   : > { %807 = vst [vmem:[#allocation2 + $0x1b0] sm:$0xff] %v9240_v2 }
  0x89   : > { %808 = vst [vmem:[#allocation2 + $0xd8] sm:$0xff] %v9240_v2 }
  0x8a   : > { %809 = vst [vmem:[#allocation2 + $0x18] sm:$0xff] %v9240_v2 }
  0x8b   : > { %810 = vst [vmem:[#allocation2 + $0x50] sm:$0xff] %v9240_v2 }
  0x8c   : > { %811 = vst [vmem:[#allocation2 + $0x168] sm:$0xff] %v9240_v2 }
  0x8d   : > { %812 = vst [vmem:[#allocation2 + $0x130] sm:$0xff] %v9240_v2 }
  0x8e   : > { %813 = vst [vmem:[#allocation2 + $0x48] sm:$0xff] %v9240_v2 }
  0x8f   : > { %814 = vst [vmem:[#allocation2 + $0x180] sm:$0xff] %v9240_v2 }
  0x90   : > { %815 = vst [vmem:[#allocation2 + $0x110] sm:$0xff] %v9240_v2 }
  0x91   : > { %816 = vst [vmem:[#allocation2 + $0x118] sm:$0xff] %v9240_v2 }
  0x92   : > { %817 = vst [vmem:[#allocation2 + $0x98] sm:$0xff] %v9240_v2 }
  0x93   : > { %818 = vst [vmem:[#allocation2 + $0x120] sm:$0xff] %v9240_v2 }
  0x94   : > { %819 = vst [vmem:[#allocation2 + $0x150] sm:$0xff] %v9240_v2 }
  0x95   : > { %820 = vst [vmem:[#allocation2 + $0x108] sm:$0xff] %v9240_v2 }
  0x96   : > { %821 = vst [vmem:[#allocation2 + $0x60] sm:$0xff] %v9240_v2 }
  0x97   : > { %822 = vst [vmem:[#allocation2 + $0xe0] sm:$0xff] %v9240_v2 }
  0x98   : > { %823 = vst [vmem:[#allocation2 + $0x188] sm:$0xff] %v9240_v2 }
  0x99   : > { %824 = vst [vmem:[#allocation2 + $0x138] sm:$0xff] %v9240_v2 }
  0x9a   : > { %825 = vst [vmem:[#allocation2 + $0x140] sm:$0xff] %v9240_v2 }
  0x9b   : > { %826 = vst [vmem:[#allocation2 + $0x80] sm:$0xff] %v9240_v2 }
  0x9c   : > { %827 = vst [vmem:[#allocation2 + $0x1a8] sm:$0xff] %v9240_v2 }
  0x9d   : > { %828 = vst [vmem:[#allocation2 + $0x1b8] sm:$0xff] %v9240_v2 }
  0x9e   : > { %829 = vst [vmem:[#allocation2 + $0x28] sm:$0xff] %v9240_v2 }
  0x9f   : > { %830 = vst [vmem:[#allocation2 + $0x1e8] sm:$0xff] %v9240_v2 }
  0xa0   : > { %831 = vst [vmem:[#allocation2 + $0xf8] sm:$0xff] %v9240_v2 }
  0xa1   : > { %832 = vst [vmem:[#allocation2 + $0x160] sm:$0xff] %v9240_v2 }
  0xa2   : > { %833 = vst [vmem:[#allocation2 + $0x30] sm:$0xff] %v9240_v2 }
  0xa3   : > { %834 = vst [vmem:[#allocation2 + $0x1e0] sm:$0xff] %v9240_v2 }
  0xa4   : > { %835 = vst [vmem:[#allocation2] sm:$0xff] %v9240_v2 }
  0xa5   : > { %836 = vst [vmem:[#allocation2 + $0xf0] sm:$0xff] %v9240_v2 }
  0xa6   : > { %837 = vst [vmem:[#allocation2 + $0x8] sm:$0xff] %v9240_v2 }
  0xa7   : > { %838 = vst [vmem:[#allocation2 + $0x148] sm:$0xff] %v9240_v2 }
  0xa8   : > { %839 = vst [vmem:[#allocation2 + $0x1d0] sm:$0xff] %v9240_v2 }
  0xa9   : > { %840 = vst [vmem:[#allocation2 + $0x100] sm:$0xff] %v9240_v2 }
  0xaa   : > { %841 = vst [vmem:[#allocation2 + $0xc8] sm:$0xff] %v9240_v2 }
  0xab   : > { %842 = vst [vmem:[#allocation2 + $0x40] sm:$0xff] %v9240_v2 }
  0xac   : > { %843 = vst [vmem:[#allocation2 + $0x1f8] sm:$0xff] %v9240_v2 }
  0xad   : > { %844 = vst [vmem:[#allocation2 + $0x20] sm:$0xff] %v9240_v2 }
  0xae   : > { %845 = vst [vmem:[#allocation2 + $0x128] sm:$0xff] %v9240_v2 }
  0xaf   : > { %846 = vst [vmem:[#allocation2 + $0x1a0] sm:$0xff] %v9240_v2 }
  0xb0   : > { %847 = vst [vmem:[#allocation2 + $0x1f0] sm:$0xff] %v9240_v2 }
  0xb1   : > { %848 = vst [vmem:[#allocation2 + $0xe8] sm:$0xff] %v9240_v2 }
  0xb2   : > { %849 = vst [vmem:[#allocation2 + $0x78] sm:$0xff] %v9240_v2 }
  0xb3   : > { %850 = vst [vmem:[#allocation2 + $0x70] sm:$0xff] %v9240_v2 }
  0xb4   : > { %851 = vst [vmem:[#allocation2 + $0x90] sm:$0xff] %v9240_v2 }
  0xb5   : > { %852 = vst [vmem:[#allocation2 + $0x1d8] sm:$0xff] %v9240_v2 }
  0xb6   : > { %853 = vst [vmem:[#allocation2 + $0xd0] sm:$0xff] %v9240_v2 }
  0xb7   : > { %854 = vst [vmem:[#allocation2 + $0xb8] sm:$0xff] %v9240_v2 }
  0xb8   : > { %855 = vst [vmem:[#allocation2 + $0x88] sm:$0xff] %v9240_v2 }
  0xb9   : > { %856 = vst [vmem:[#allocation2 + $0xa8] sm:$0xff] %v9240_v2 }
  0xba   : > { %857 = vst [vmem:[#allocation2 + $0x1c8] sm:$0xff] %v9240_v2 }
  0xbb   : > { %858 = vst [vmem:[#allocation2 + $0x170] sm:$0xff] %v9240_v2 }
  0xbc   : > { %859 = vst [vmem:[#allocation2 + $0x178] sm:$0xff] %v9240_v2 }
  0xbd   : > { %860 = vst [vmem:[#allocation2 + $0x68] sm:$0xff] %v9240_v2 }
  0xbe   : > { %861 = vst [vmem:[#allocation2 + $0x190] sm:$0xff] %v9240_v2 }
  0xbf   : > { %862 = vst [vmem:[#allocation2 + $0x198] sm:$0xff] %v9240_v2 }
  0xc0   : > { %863 = vst [vmem:[#allocation2 + $0x38] sm:$0xff] %v9240_v2 }
  0xc1   : > { %864 = vst [vmem:[#allocation2 + $0xc0] sm:$0xff] %v9240_v2 }
  0xc2   : > { %865 = vst [vmem:[#allocation2 + $0x1c0] sm:$0xff] %v9240_v2 }
  0xc3   : > { %866 = vst [vmem:[#allocation2 + $0x158] sm:$0xff] %v9240_v2 }
  0xc4   : > { %867 = vst [vmem:[#allocation2 + $0x10] sm:$0xff] %v9240_v2 }
  0xc5   : > { %868 = vst [vmem:[#allocation2 + $0x58] sm:$0xff] %v9240_v2 }
  0xc6   : > { %869 = vst [vmem:[#allocation2 + $0xa0] sm:$0xff] %v9240_v2 }
  0xc7 PF: > { %v6766_v3 = vld [vmem:[%s9503_s20 + $0x700] sm:$0xf]  ;;  %v8246_v5 = vld [vmem:[%s9503_s20 + $0x704] sm:$0xf]  ;;  %v6774_v8 = vld [vmem:[%s9503_s20 + $0x708] sm:$0xf] }
  0xc8   : > { %v8262_v4 = vld [vmem:[%s9503_s20 + $0x77c] sm:$0xf0]  ;;  %v6768_v7 = vld [vmem:[%s9503_s20 + $0x780] sm:$0xf0]  ;;  %v8263_v9 = vld [vmem:[%s9503_s20 + $0x784] sm:$0xf0] }
  0xc9   : > { %v6767_v6 = vor.u32 %v8262_v4, %v6766_v3  ;;  %v6771_v10 = vor.u32 %v8246_v5, %v6768_v7  ;;  %v6775_v11 = vor.u32 %v8263_v9, %v6774_v8  ;;  %v8247_v12 = vld [vmem:[%s9503_s20 + $0x70c] sm:$0xf]  ;;  %v6638_v14 = vld [vmem:[%s9503_s20 + $0x600] sm:$0xf]  ;;  %v8214_v17 = vld [vmem:[%s9503_s20 + $0x604] sm:$0xf] }
  0xca   : > { %v6776_v13 = vld [vmem:[%s9503_s20 + $0x788] sm:$0xf0]  ;;  %v8230_v16 = vld [vmem:[%s9503_s20 + $0x67c] sm:$0xf0]  ;;  %v6640_v18 = vld [vmem:[%s9503_s20 + $0x680] sm:$0xf0] }
  0xcb   : > { %2478 = vmatpush.bf16.msra.mxu0 %v6767_v6  ;;  %v6779_v15 = vor.u32 %v8247_v12, %v6776_v13  ;;  %2492 = vmatpush.bf16.msra.mxu1 %v6771_v10  ;;  %v6639_v19 = vor.u32 %v8230_v16, %v6638_v14  ;;  %v6643_v20 = vor.u32 %v8214_v17, %v6640_v18  ;;  %v6646_v21 = vld [vmem:[%s9503_s20 + $0x608] sm:$0xf]  ;;  %v8215_v23 = vld [vmem:[%s9503_s20 + $0x60c] sm:$0xf]  ;;  %v6510_v26 = vld [vmem:[%s9503_s20 + $0x500] sm:$0xf] }
  0xcc   : > { %2506 = vmatpush.bf16.msra.mxu2 %v6775_v11  ;;  %v8231_v22 = vld [vmem:[%s9503_s20 + $0x684] sm:$0xf0]  ;;  %v6648_v25 = vld [vmem:[%s9503_s20 + $0x688] sm:$0xf0]  ;;  %v8198_v27 = vld [vmem:[%s9503_s20 + $0x57c] sm:$0xf0] }
  0xcd   : > { %2520 = vmatpush.bf16.msra.mxu3 %v6779_v15  ;;  %v6647_v24 = vor.u32 %v8231_v22, %v6646_v21  ;;  %v6651_v28 = vor.u32 %v8215_v23, %v6648_v25  ;;  %v8182_v29 = vld [vmem:[%s9503_s20 + $0x504] sm:$0xf]  ;;  %v6518_v31 = vld [vmem:[%s9503_s20 + $0x508] sm:$0xf]  ;;  %v6511_v32 = vor.u32 %v8198_v27, %v6510_v26  ;;  %v8183_v34 = vld [vmem:[%s9503_s20 + $0x50c] sm:$0xf] }
  0xce   : > { %v6512_v30 = vld [vmem:[%s9503_s20 + $0x580] sm:$0xf0]  ;;  %v8199_v33 = vld [vmem:[%s9503_s20 + $0x584] sm:$0xf0]  ;;  %v6520_v35 = vld [vmem:[%s9503_s20 + $0x588] sm:$0xf0] }
  0xcf   : > { %2479 = vmatpush.bf16.msra.mxu0 %v6639_v19  ;;  %2493 = vmatpush.bf16.msra.mxu1 %v6643_v20  ;;  %v6515_v36 = vor.u32 %v8182_v29, %v6512_v30  ;;  %v6519_v37 = vor.u32 %v8199_v33, %v6518_v31  ;;  %v6382_v38 = vld [vmem:[%s9503_s20 + $0x400] sm:$0xf]  ;;  %v8150_v40 = vld [vmem:[%s9503_s20 + $0x404] sm:$0xf]  ;;  %v6523_v41 = vor.u32 %v8183_v34, %v6520_v35  ;;  %v6390_v43 = vld [vmem:[%s9503_s20 + $0x408] sm:$0xf] }
  0xd0   : > { %2507 = vmatpush.bf16.msra.mxu2 %v6647_v24  ;;  %v8166_v39 = vld [vmem:[%s9503_s20 + $0x47c] sm:$0xf0]  ;;  %v6384_v42 = vld [vmem:[%s9503_s20 + $0x480] sm:$0xf0]  ;;  %v8167_v44 = vld [vmem:[%s9503_s20 + $0x484] sm:$0xf0] }
  0xd1   : > { %2521 = vmatpush.bf16.msra.mxu3 %v6651_v28  ;;  %v8151_v45 = vld [vmem:[%s9503_s20 + $0x40c] sm:$0xf]  ;;  %v6383_v47 = vor.u32 %v8166_v39, %v6382_v38  ;;  %v6387_v48 = vor.u32 %v8150_v40, %v6384_v42  ;;  %v6391_v49 = vor.u32 %v8167_v44, %v6390_v43  ;;  %v6254_v50 = vld [vmem:[%s9503_s20 + $0x300] sm:$0xf]  ;;  %v8118_v52 = vld [vmem:[%s9503_s20 + $0x304] sm:$0xf] }
  0xd2   : > { %v6392_v46 = vld [vmem:[%s9503_s20 + $0x488] sm:$0xf0]  ;;  %v8134_v51 = vld [vmem:[%s9503_s20 + $0x37c] sm:$0xf0]  ;;  %v6256_v54 = vld [vmem:[%s9503_s20 + $0x380] sm:$0xf0] }
  0xd3   : > { %2480 = vmatpush.bf16.msra.mxu0 %v6511_v32  ;;  %2494 = vmatpush.bf16.msra.mxu1 %v6515_v36  ;;  %v6395_v53 = vor.u32 %v8151_v45, %v6392_v46  ;;  %v6262_v55 = vld [vmem:[%s9503_s20 + $0x308] sm:$0xf]  ;;  %v8119_v57 = vld [vmem:[%s9503_s20 + $0x30c] sm:$0xf]  ;;  %v6255_v59 = vor.u32 %v8134_v51, %v6254_v50  ;;  %v6259_v60 = vor.u32 %v8118_v52, %v6256_v54  ;;  %v6126_v62 = vld [vmem:[%s9503_s20 + $0x200] sm:$0xf] }
  0xd4   : > { %2508 = vmatpush.bf16.msra.mxu2 %v6519_v37  ;;  %v8135_v56 = vld [vmem:[%s9503_s20 + $0x384] sm:$0xf0]  ;;  %v6264_v58 = vld [vmem:[%s9503_s20 + $0x388] sm:$0xf0]  ;;  %v8102_v63 = vld [vmem:[%s9503_s20 + $0x27c] sm:$0xf0] }
  0xd5   : > { %2522 = vmatpush.bf16.msra.mxu3 %v6523_v41  ;;  %v6263_v61 = vor.u32 %v8135_v56, %v6262_v55  ;;  %v8086_v0 = vld [vmem:[%s9503_s20 + $0x204] sm:$0xf]  ;;  %v6267_v1 = vor.u32 %v8119_v57, %v6264_v58  ;;  %v6134_v3 = vld [vmem:[%s9503_s20 + $0x208] sm:$0xf]  ;;  %v8087_v5 = vld [vmem:[%s9503_s20 + $0x20c] sm:$0xf]  ;;  %v6127_v7 = vor.u32 %v8102_v63, %v6126_v62 }
  0xd6   : > { %v6128_v2 = vld [vmem:[%s9503_s20 + $0x280] sm:$0xf0]  ;;  %v8103_v4 = vld [vmem:[%s9503_s20 + $0x284] sm:$0xf0]  ;;  %v6136_v6 = vld [vmem:[%s9503_s20 + $0x288] sm:$0xf0] }
  0xd7   : > { %2481 = vmatpush.bf16.msra.mxu0 %v6383_v47  ;;  %2495 = vmatpush.bf16.msra.mxu1 %v6387_v48  ;;  %v6131_v8 = vor.u32 %v8086_v0, %v6128_v2  ;;  %v6135_v9 = vor.u32 %v8103_v4, %v6134_v3  ;;  %v5998_v10 = vld [vmem:[%s9503_s20 + $0x100] sm:$0xf]  ;;  %v8054_v12 = vld [vmem:[%s9503_s20 + $0x104] sm:$0xf]  ;;  %v6139_v13 = vor.u32 %v8087_v5, %v6136_v6  ;;  %v6006_v15 = vld [vmem:[%s9503_s20 + $0x108] sm:$0xf] }
  0xd8   : > { %2509 = vmatpush.bf16.msra.mxu2 %v6391_v49  ;;  %v8070_v11 = vld [vmem:[%s9503_s20 + $0x17c] sm:$0xf0]  ;;  %v6000_v14 = vld [vmem:[%s9503_s20 + $0x180] sm:$0xf0]  ;;  %v8071_v16 = vld [vmem:[%s9503_s20 + $0x184] sm:$0xf0] }
  0xd9   : > { %2523 = vmatpush.bf16.msra.mxu3 %v6395_v53  ;;  %v8055_v17 = vld [vmem:[%s9503_s20 + $0x10c] sm:$0xf]  ;;  %v5999_v19 = vor.u32 %v8070_v11, %v5998_v10  ;;  %v5870_v20 = vld [vmem:[%s9503_s20] sm:$0xf]  ;;  %v6003_v22 = vor.u32 %v8054_v12, %v6000_v14  ;;  %v6007_v23 = vor.u32 %v8071_v16, %v6006_v15  ;;  %v8022_v24 = vld [vmem:[%s9503_s20 + $0x4] sm:$0xf] }
  0xda   : > { %v6008_v18 = vld [vmem:[%s9503_s20 + $0x188] sm:$0xf0]  ;;  %v8038_v21 = vld [vmem:[%s9503_s20 + $0x7c] sm:$0xf0]  ;;  %v5872_v25 = vld [vmem:[%s9503_s20 + $0x80] sm:$0xf0] }
  0xdb   : > { %2482 = vmatpush.bf16.msra.mxu0 %v6255_v59  ;;  %2496 = vmatpush.bf16.msra.mxu1 %v6259_v60  ;;  %v5878_v26 = vld [vmem:[%s9503_s20 + $0x8] sm:$0xf]  ;;  %v6011_v27 = vor.u32 %v8055_v17, %v6008_v18  ;;  %v8023_v29 = vld [vmem:[%s9503_s20 + $0xc] sm:$0xf]  ;;  %v6782_v31 = vld [vmem:[%s9503_s20 + $0x710] sm:$0xf]  ;;  %v5871_v34 = vor.u32 %v8038_v21, %v5870_v20  ;;  %v5875_v38 = vor.u32 %v8022_v24, %v5872_v25 }
  0xdc   : > { %2510 = vmatpush.bf16.msra.mxu2 %v6263_v61  ;;  %v8039_v28 = vld [vmem:[%s9503_s20 + $0x84] sm:$0xf0]  ;;  %v5880_v30 = vld [vmem:[%s9503_s20 + $0x88] sm:$0xf0]  ;;  %v8264_v32 = vld [vmem:[%s9503_s20 + $0x78c] sm:$0xf0] }
  0xdd   : > { %2524 = vmatpush.bf16.msra.mxu3 %v6267_v1  ;;  %v8248_v33 = vld [vmem:[%s9503_s20 + $0x714] sm:$0xf]  ;;  %v6790_v36 = vld [vmem:[%s9503_s20 + $0x718] sm:$0xf]  ;;  %v5879_v39 = vor.u32 %v8039_v28, %v5878_v26  ;;  %v8249_v40 = vld [vmem:[%s9503_s20 + $0x71c] sm:$0xf]  ;;  %v5883_v42 = vor.u32 %v8023_v29, %v5880_v30  ;;  %v6783_v43 = vor.u32 %v8264_v32, %v6782_v31 }
  0xde   : > { %v6784_v35 = vld [vmem:[%s9503_s20 + $0x790] sm:$0xf0]  ;;  %v8265_v37 = vld [vmem:[%s9503_s20 + $0x794] sm:$0xf0]  ;;  %v6792_v41 = vld [vmem:[%s9503_s20 + $0x798] sm:$0xf0] }
  0xdf   : > { %2483 = vmatpush.bf16.msra.mxu0 %v6127_v7  ;;  %2497 = vmatpush.bf16.msra.mxu1 %v6131_v8  ;;  %v6787_v44 = vor.u32 %v8248_v33, %v6784_v35  ;;  %v6791_v45 = vor.u32 %v8265_v37, %v6790_v36  ;;  %v6654_v46 = vld [vmem:[%s9503_s20 + $0x610] sm:$0xf]  ;;  %v8216_v48 = vld [vmem:[%s9503_s20 + $0x614] sm:$0xf]  ;;  %v6795_v49 = vor.u32 %v8249_v40, %v6792_v41  ;;  %v6662_v51 = vld [vmem:[%s9503_s20 + $0x618] sm:$0xf] }
  0xe0   : > { %2511 = vmatpush.bf16.msra.mxu2 %v6135_v9  ;;  %v8232_v47 = vld [vmem:[%s9503_s20 + $0x68c] sm:$0xf0]  ;;  %v6656_v50 = vld [vmem:[%s9503_s20 + $0x690] sm:$0xf0]  ;;  %v8233_v52 = vld [vmem:[%s9503_s20 + $0x694] sm:$0xf0] }
  0xe1   : > { %2525 = vmatpush.bf16.msra.mxu3 %v6139_v13  ;;  %v8217_v53 = vld [vmem:[%s9503_s20 + $0x61c] sm:$0xf]  ;;  %v6655_v55 = vor.u32 %v8232_v47, %v6654_v46  ;;  %v6659_v56 = vor.u32 %v8216_v48, %v6656_v50  ;;  %v6663_v57 = vor.u32 %v8233_v52, %v6662_v51  ;;  %v6526_v58 = vld [vmem:[%s9503_s20 + $0x510] sm:$0xf]  ;;  %v8184_v60 = vld [vmem:[%s9503_s20 + $0x514] sm:$0xf] }
  0xe2   : > { %v6664_v54 = vld [vmem:[%s9503_s20 + $0x698] sm:$0xf0]  ;;  %v8200_v59 = vld [vmem:[%s9503_s20 + $0x58c] sm:$0xf0]  ;;  %v6528_v62 = vld [vmem:[%s9503_s20 + $0x590] sm:$0xf0] }
  0xe3   : > { %2484 = vmatpush.bf16.msra.mxu0 %v5999_v19  ;;  %2498 = vmatpush.bf16.msra.mxu1 %v6003_v22  ;;  %v6667_v61 = vor.u32 %v8217_v53, %v6664_v54  ;;  %v6534_v63 = vld [vmem:[%s9503_s20 + $0x518] sm:$0xf]  ;;  %v8185_v1 = vld [vmem:[%s9503_s20 + $0x51c] sm:$0xf]  ;;  %v6527_v3 = vor.u32 %v8200_v59, %v6526_v58  ;;  %v6531_v5 = vor.u32 %v8184_v60, %v6528_v62  ;;  %v6398_v7 = vld [vmem:[%s9503_s20 + $0x410] sm:$0xf] }
  0xe4   : > { %2512 = vmatpush.bf16.msra.mxu2 %v6007_v23  ;;  %v8201_v0 = vld [vmem:[%s9503_s20 + $0x594] sm:$0xf0]  ;;  %v6536_v2 = vld [vmem:[%s9503_s20 + $0x598] sm:$0xf0]  ;;  %v8168_v8 = vld [vmem:[%s9503_s20 + $0x48c] sm:$0xf0] }
  0xe5   : > { %2526 = vmatpush.bf16.msra.mxu3 %v6011_v27  ;;  %v9692_v4 = vld [vmem:[%s9501_s21] sm:$0xff]  ;;  %v6535_v6 = vor.u32 %v8201_v0, %v6534_v63  ;;  %v6539_v10 = vor.u32 %v8185_v1, %v6536_v2  ;;  %v6399_v16 = vor.u32 %v8168_v8, %v6398_v7  ;;  %v6798_v0 = vld [vmem:[%s9503_s20 + $0x720] sm:$0xf]  ;;  %v8250_v2 = vld [vmem:[%s9503_s20 + $0x724] sm:$0xf]  ;;  %s10632_s17 = sld [smem:[#allocation35_spill]] }
  0xe6   : > { %v8152_v9 = vld [vmem:[%s9503_s20 + $0x414] sm:$0xf]  ;;  %v6406_v12 = vld [vmem:[%s9503_s20 + $0x418] sm:$0xf]  ;;  %v8153_v14 = vld [vmem:[%s9503_s20 + $0x41c] sm:$0xf] }
  0xe7   : > { %2485 = vmatpush.bf16.msra.mxu0 %v5871_v34  ;;  %2499 = vmatpush.bf16.msra.mxu1 %v5875_v38  ;;  %v6400_v11 = vld [vmem:[%s9503_s20 + $0x490] sm:$0xf0]  ;;  %v8169_v13 = vld [vmem:[%s9503_s20 + $0x494] sm:$0xf0]  ;;  %v6408_v15 = vld [vmem:[%s9503_s20 + $0x498] sm:$0xf0] }
  0xe8   : > { %2513 = vmatpush.bf16.msra.mxu2 %v5879_v39  ;;  %v6403_v17 = vor.u32 %v8152_v9, %v6400_v11  ;;  %v6407_v18 = vor.u32 %v8169_v13, %v6406_v12  ;;  %v6270_v19 = vld [vmem:[%s9503_s20 + $0x310] sm:$0xf]  ;;  %v8120_v21 = vld [vmem:[%s9503_s20 + $0x314] sm:$0xf]  ;;  %v6411_v22 = vor.u32 %v8153_v14, %v6408_v15  ;;  %v6278_v24 = vld [vmem:[%s9503_s20 + $0x318] sm:$0xf] }
  0xe9   : > { %2527 = vmatpush.bf16.msra.mxu3 %v5883_v42  ;;  %v8136_v20 = vld [vmem:[%s9503_s20 + $0x38c] sm:$0xf0]  ;;  %v6272_v23 = vld [vmem:[%s9503_s20 + $0x390] sm:$0xf0]  ;;  %v8137_v25 = vld [vmem:[%s9503_s20 + $0x394] sm:$0xf0] }
  0xea   : > { %2486 = vmatmul.bf16.vlgmr.msra.gmra.mxu0 %v9692_v4  ;;  %2500 = vmatmul.bf16.vlgmr.msra.gmra.mxu1 %v9692_v4  ;;  %v8121_v26 = vld [vmem:[%s9503_s20 + $0x31c] sm:$0xf]  ;;  %v6271_v28 = vor.u32 %v8136_v20, %v6270_v19  ;;  %v6275_v29 = vor.u32 %v8120_v21, %v6272_v23  ;;  %v6279_v30 = vor.u32 %v8137_v25, %v6278_v24  ;;  %v6142_v31 = vld [vmem:[%s9503_s20 + $0x210] sm:$0xf]  ;;  %v8088_v33 = vld [vmem:[%s9503_s20 + $0x214] sm:$0xf] }
  0xeb   : > { %2534 = vmatpush.bf16.msrb.mxu0 %v6783_v43  ;;  %2548 = vmatpush.bf16.msrb.mxu1 %v6787_v44  ;;  %v6280_v27 = vld [vmem:[%s9503_s20 + $0x398] sm:$0xf0]  ;;  %v8104_v32 = vld [vmem:[%s9503_s20 + $0x28c] sm:$0xf0]  ;;  %v6144_v35 = vld [vmem:[%s9503_s20 + $0x290] sm:$0xf0] }
  0xec   : > { %2562 = vmatpush.bf16.msrb.mxu2 %v6791_v45  ;;  %2528 = vmatmul.bf16.vlgmr.msra.gmra.mxu3 %v9692_v4  ;;  %v6283_v34 = vor.u32 %v8121_v26, %v6280_v27  ;;  %v6150_v36 = vld [vmem:[%s9503_s20 + $0x218] sm:$0xf]  ;;  %v8089_v38 = vld [vmem:[%s9503_s20 + $0x21c] sm:$0xf]  ;;  %v6143_v40 = vor.u32 %v8104_v32, %v6142_v31  ;;  %v6147_v41 = vor.u32 %v8088_v33, %v6144_v35  ;;  %v6014_v43 = vld [vmem:[%s9503_s20 + $0x110] sm:$0xf] }
  0xed   : > { %2576 = vmatpush.bf16.msrb.mxu3 %v6795_v49  ;;  %2514 = vmatmul.bf16.vlgmr.msra.gmra.mxu2 %v9692_v4  ;;  %v8105_v37 = vld [vmem:[%s9503_s20 + $0x294] sm:$0xf0]  ;;  %v6152_v39 = vld [vmem:[%s9503_s20 + $0x298] sm:$0xf0]  ;;  %v8072_v44 = vld [vmem:[%s9503_s20 + $0x18c] sm:$0xf0] }
  0xee   : > { %v6151_v42 = vor.u32 %v8105_v37, %v6150_v36  ;;  %v8056_v45 = vld [vmem:[%s9503_s20 + $0x114] sm:$0xf]  ;;  %v6155_v46 = vor.u32 %v8089_v38, %v6152_v39  ;;  %v6022_v48 = vld [vmem:[%s9503_s20 + $0x118] sm:$0xf]  ;;  %v8057_v50 = vld [vmem:[%s9503_s20 + $0x11c] sm:$0xf]  ;;  %v6015_v52 = vor.u32 %v8072_v44, %v6014_v43 }
  0xef   : > { %2535 = vmatpush.bf16.msrb.mxu0 %v6655_v55  ;;  %2549 = vmatpush.bf16.msrb.mxu1 %v6659_v56  ;;  %v6016_v47 = vld [vmem:[%s9503_s20 + $0x190] sm:$0xf0]  ;;  %v8073_v49 = vld [vmem:[%s9503_s20 + $0x194] sm:$0xf0]  ;;  %v6024_v51 = vld [vmem:[%s9503_s20 + $0x198] sm:$0xf0] }
  0xf0   : > { %2563 = vmatpush.bf16.msrb.mxu2 %v6663_v57  ;;  %v5886_v53 = vld [vmem:[%s9503_s20 + $0x10] sm:$0xf]  ;;  %v6019_v55 = vor.u32 %v8056_v45, %v6016_v47  ;;  %v6023_v56 = vor.u32 %v8073_v49, %v6022_v48  ;;  %v8024_v57 = vld [vmem:[%s9503_s20 + $0x14] sm:$0xf]  ;;  %v5894_v59 = vld [vmem:[%s9503_s20 + $0x18] sm:$0xf]  ;;  %v6027_v60 = vor.u32 %v8057_v50, %v6024_v51 }
  0xf1   : > { %2577 = vmatpush.bf16.msrb.mxu3 %v6667_v61  ;;  %v8040_v54 = vld [vmem:[%s9503_s20 + $0x8c] sm:$0xf0]  ;;  %v5888_v58 = vld [vmem:[%s9503_s20 + $0x90] sm:$0xf0]  ;;  %v8041_v61 = vld [vmem:[%s9503_s20 + $0x94] sm:$0xf0] }
  0xf2   : > { %v8025_v62 = vld [vmem:[%s9503_s20 + $0x1c] sm:$0xf]  ;;  %v8266_v1 = vld [vmem:[%s9503_s20 + $0x79c] sm:$0xf0]  ;;  %v8267_v7 = vld [vmem:[%s9503_s20 + $0x7a4] sm:$0xf0]  ;;  %v5891_v8 = vor.u32 %v8024_v57, %v5888_v58  ;;  %v5895_v9 = vor.u32 %v8041_v61, %v5894_v59 }
  0xf3   : > { %2536 = vmatpush.bf16.msrb.mxu0 %v6527_v3  ;;  %2550 = vmatpush.bf16.msrb.mxu1 %v6531_v5  ;;  %v5896_v63 = vld [vmem:[%s9503_s20 + $0x98] sm:$0xf0]  ;;  %v5887_v3 = vor.u32 %v8040_v54, %v5886_v53  ;;  %v6800_v5 = vld [vmem:[%s9503_s20 + $0x7a0] sm:$0xf0]  ;;  %v6808_v11 = vld [vmem:[%s9503_s20 + $0x7a8] sm:$0xf0]  ;;  %v6799_v13 = vor.u32 %v8266_v1, %v6798_v0 }
  0xf4   : > { %2564 = vmatpush.bf16.msrb.mxu2 %v6535_v6  ;;  %v6806_v6 = vld [vmem:[%s9503_s20 + $0x728] sm:$0xf]  ;;  %v5899_v12 = vor.u32 %v8025_v62, %v5896_v63  ;;  %v6803_v14 = vor.u32 %v8250_v2, %v6800_v5  ;;  %v6672_v20 = vld [vmem:[%s9503_s20 + $0x6a0] sm:$0xf0]  ;;  %v8219_v23 = vld [vmem:[%s9503_s20 + $0x62c] sm:$0xf] }
  0xf5   : > { %2578 = vmatpush.bf16.msrb.mxu3 %v6539_v10  ;;  %v8251_v10 = vld [vmem:[%s9503_s20 + $0x72c] sm:$0xf]  ;;  %v6807_v15 = vor.u32 %v8267_v7, %v6806_v6  ;;  %v6678_v21 = vld [vmem:[%s9503_s20 + $0x628] sm:$0xf]  ;;  %v6544_v32 = vld [vmem:[%s9503_s20 + $0x5a0] sm:$0xf0] }
  0xf6   : > { %v6811_v19 = vor.u32 %v8251_v10, %v6808_v11  ;;  %v6680_v24 = vld [vmem:[%s9503_s20 + $0x6a8] sm:$0xf0]  ;;  %v6550_v33 = vld [vmem:[%s9503_s20 + $0x528] sm:$0xf]  ;;  %v6416_v44 = vld [vmem:[%s9503_s20 + $0x4a0] sm:$0xf0] }
  0xf7   : > { %2537 = vmatpush.bf16.msrb.mxu0 %v6399_v16  ;;  %2551 = vmatpush.bf16.msrb.mxu1 %v6403_v17  ;;  %v6670_v16 = vld [vmem:[%s9503_s20 + $0x620] sm:$0xf]  ;;  %v6683_v31 = vor.u32 %v8219_v23, %v6680_v24  ;;  %v8187_v35 = vld [vmem:[%s9503_s20 + $0x52c] sm:$0xf]  ;;  %v6422_v45 = vld [vmem:[%s9503_s20 + $0x428] sm:$0xf] }
  0xf8   : > { %2565 = vmatpush.bf16.msrb.mxu2 %v6407_v18  ;;  %v8234_v17 = vld [vmem:[%s9503_s20 + $0x69c] sm:$0xf0]  ;;  %v8218_v18 = vld [vmem:[%s9503_s20 + $0x624] sm:$0xf]  ;;  %v6552_v36 = vld [vmem:[%s9503_s20 + $0x5a8] sm:$0xf0] }
  0xf9   : > { %2579 = vmatpush.bf16.msrb.mxu3 %v6411_v22  ;;  %v8235_v22 = vld [vmem:[%s9503_s20 + $0x6a4] sm:$0xf0]  ;;  %v6671_v25 = vor.u32 %v8234_v17, %v6670_v16  ;;  %v6675_v26 = vor.u32 %v8218_v18, %v6672_v20  ;;  %v6555_v43 = vor.u32 %v8187_v35, %v6552_v36  ;;  %v8155_v47 = vld [vmem:[%s9503_s20 + $0x42c] sm:$0xf]  ;;  %v8138_v53 = vld [vmem:[%s9503_s20 + $0x39c] sm:$0xf0] }
  0xfa   : > { %v6679_v27 = vor.u32 %v8235_v22, %v6678_v21  ;;  %v6424_v48 = vld [vmem:[%s9503_s20 + $0x4a8] sm:$0xf0]  ;;  %v8122_v54 = vld [vmem:[%s9503_s20 + $0x324] sm:$0xf]  ;;  %v6294_v57 = vld [vmem:[%s9503_s20 + $0x328] sm:$0xf] }
  0xfb   : > { %2538 = vmatpush.bf16.msrb.mxu0 %v6271_v28  ;;  %2552 = vmatpush.bf16.msrb.mxu1 %v6275_v29  ;;  %v6542_v28 = vld [vmem:[%s9503_s20 + $0x520] sm:$0xf]  ;;  %v8139_v58 = vld [vmem:[%s9503_s20 + $0x3a4] sm:$0xf0]  ;;  %v8123_v59 = vld [vmem:[%s9503_s20 + $0x32c] sm:$0xf] }
  0xfc   : > { %2566 = vmatpush.bf16.msrb.mxu2 %v6279_v30  ;;  %v8202_v29 = vld [vmem:[%s9503_s20 + $0x59c] sm:$0xf0]  ;;  %v8186_v30 = vld [vmem:[%s9503_s20 + $0x524] sm:$0xf]  ;;  %v6295_v63 = vor.u32 %v8139_v58, %v6294_v57  ;;  %v6166_v6 = vld [vmem:[%s9503_s20 + $0x228] sm:$0xf] }
  0xfd   : > { %2580 = vmatpush.bf16.msrb.mxu3 %v6283_v34  ;;  %v8203_v34 = vld [vmem:[%s9503_s20 + $0x5a4] sm:$0xf0]  ;;  %v6543_v37 = vor.u32 %v8202_v29, %v6542_v28  ;;  %v6547_v38 = vor.u32 %v8186_v30, %v6544_v32  ;;  %v6158_v0 = vld [vmem:[%s9503_s20 + $0x220] sm:$0xf]  ;;  %v8090_v2 = vld [vmem:[%s9503_s20 + $0x224] sm:$0xf] }
  0xfe   : > { %v6551_v39 = vor.u32 %v8203_v34, %v6550_v33  ;;  %v8106_v1 = vld [vmem:[%s9503_s20 + $0x29c] sm:$0xf0]  ;;  %v6160_v5 = vld [vmem:[%s9503_s20 + $0x2a0] sm:$0xf0]  ;;  %v8107_v7 = vld [vmem:[%s9503_s20 + $0x2a4] sm:$0xf0] }
  0xff   : > { %2539 = vmatpush.bf16.msrb.mxu0 %v6143_v40  ;;  %2553 = vmatpush.bf16.msrb.mxu1 %v6147_v41  ;;  %v6414_v40 = vld [vmem:[%s9503_s20 + $0x420] sm:$0xf]  ;;  %v6159_v10 = vor.u32 %v8106_v1, %v6158_v0  ;;  %v6163_v11 = vor.u32 %v8090_v2, %v6160_v5  ;;  %v6032_v17 = vld [vmem:[%s9503_s20 + $0x1a0] sm:$0xf0]  ;;  %v6038_v18 = vld [vmem:[%s9503_s20 + $0x128] sm:$0xf] }
 0x100   : > { %2567 = vmatpush.bf16.msrb.mxu2 %v6151_v42  ;;  %v8170_v41 = vld [vmem:[%s9503_s20 + $0x49c] sm:$0xf0]  ;;  %v8154_v42 = vld [vmem:[%s9503_s20 + $0x424] sm:$0xf]  ;;  %v8059_v20 = vld [vmem:[%s9503_s20 + $0x12c] sm:$0xf] }
 0x101   : > { %2581 = vmatpush.bf16.msrb.mxu3 %v6155_v46  ;;  %v8171_v46 = vld [vmem:[%s9503_s20 + $0x4a4] sm:$0xf0]  ;;  %v6415_v49 = vor.u32 %v8170_v41, %v6414_v40  ;;  %v6419_v50 = vor.u32 %v8154_v42, %v6416_v44  ;;  %v6040_v21 = vld [vmem:[%s9503_s20 + $0x1a8] sm:$0xf0]  ;;  %v5902_v23 = vld [vmem:[%s9503_s20 + $0x20] sm:$0xf] }
 0x102   : > { %v6423_v51 = vor.u32 %v8171_v46, %v6422_v45  ;;  %v8042_v24 = vld [vmem:[%s9503_s20 + $0x9c] sm:$0xf0]  ;;  %v5904_v28 = vld [vmem:[%s9503_s20 + $0xa0] sm:$0xf0]  ;;  %v5910_v29 = vld [vmem:[%s9503_s20 + $0x28] sm:$0xf]  ;;  %v6043_v30 = vor.u32 %v8059_v20, %v6040_v21 }
 0x103   : > { %2540 = vmatpush.bf16.msrb.mxu0 %v6015_v52  ;;  %2554 = vmatpush.bf16.msrb.mxu1 %v6019_v55  ;;  %v6286_v52 = vld [vmem:[%s9503_s20 + $0x320] sm:$0xf]  ;;  %v6427_v55 = vor.u32 %v8155_v47, %v6424_v48  ;;  %v8027_v32 = vld [vmem:[%s9503_s20 + $0x2c] sm:$0xf]  ;;  %v6814_v34 = vld [vmem:[%s9503_s20 + $0x730] sm:$0xf] }
 0x104   : > { %2568 = vmatpush.bf16.msrb.mxu2 %v6023_v56  ;;  %v6288_v56 = vld [vmem:[%s9503_s20 + $0x3a0] sm:$0xf0]  ;;  %v6287_v61 = vor.u32 %v8138_v53, %v6286_v52  ;;  %v5912_v33 = vld [vmem:[%s9503_s20 + $0xa8] sm:$0xf0]  ;;  %v8268_v35 = vld [vmem:[%s9503_s20 + $0x7ac] sm:$0xf0] }
 0x105   : > { %2582 = vmatpush.bf16.msrb.mxu3 %v6027_v60  ;;  %v6296_v60 = vld [vmem:[%s9503_s20 + $0x3a8] sm:$0xf0]  ;;  %v6291_v62 = vor.u32 %v8122_v54, %v6288_v56  ;;  %v8252_v36 = vld [vmem:[%s9503_s20 + $0x734] sm:$0xf]  ;;  %v8269_v40 = vld [vmem:[%s9503_s20 + $0x7b4] sm:$0xf0]  ;;  %v5915_v45 = vor.u32 %v8027_v32, %v5912_v33  ;;  %v6815_v46 = vor.u32 %v8268_v35, %v6814_v34 }
 0x106   : > { %v6824_v44 = vld [vmem:[%s9503_s20 + $0x7b8] sm:$0xf0]  ;;  %v6688_v53 = vld [vmem:[%s9503_s20 + $0x6b0] sm:$0xf0]  ;;  %v6694_v54 = vld [vmem:[%s9503_s20 + $0x638] sm:$0xf] }
 0x107   : > { %2541 = vmatpush.bf16.msrb.mxu0 %v5887_v3  ;;  %2555 = vmatpush.bf16.msrb.mxu1 %v5891_v8  ;;  %v6299_v3 = vor.u32 %v8123_v59, %v6296_v60  ;;  %v8091_v8 = vld [vmem:[%s9503_s20 + $0x22c] sm:$0xf]  ;;  %v8221_v56 = vld [vmem:[%s9503_s20 + $0x63c] sm:$0xf]  ;;  %v6560_v1 = vld [vmem:[%s9503_s20 + $0x5b0] sm:$0xf0] }
 0x108   : > { %2569 = vmatpush.bf16.msrb.mxu2 %v5895_v9  ;;  %v6168_v9 = vld [vmem:[%s9503_s20 + $0x2a8] sm:$0xf0]  ;;  %v6696_v57 = vld [vmem:[%s9503_s20 + $0x6b8] sm:$0xf0]  ;;  %v6566_v2 = vld [vmem:[%s9503_s20 + $0x538] sm:$0xf] }
 0x109   : > { %2583 = vmatpush.bf16.msrb.mxu3 %v5899_v12  ;;  %v6167_v12 = vor.u32 %v8107_v7, %v6166_v6  ;;  %v6171_v16 = vor.u32 %v8091_v8, %v6168_v9  ;;  %v6699_v0 = vor.u32 %v8221_v56, %v6696_v57  ;;  %v8189_v5 = vld [vmem:[%s9503_s20 + $0x53c] sm:$0xf]  ;;  %v6174_v34 = vld [vmem:[%s9503_s20 + $0x230] sm:$0xf]  ;;  %p6892_p4 = scmp.ne.s32.totalorder %s10632_s17, 7 }
 0x10a   : > { %2542 = vmatmul.bf16.vlgmr.msrb.gmra.mxu0 %v9692_v4  ;;  %2556 = vmatmul.bf16.vlgmr.msrb.gmra.mxu1 %v9692_v4  ;;  %v6568_v6 = vld [vmem:[%s9503_s20 + $0x5b8] sm:$0xf0]  ;;  %v8108_v35 = vld [vmem:[%s9503_s20 + $0x2ac] sm:$0xf0]  ;;  %s9241_s19 = smov (!%p6892_p4), 64   ;;  %s9242_s18 = smov (!%p6892_p4), 96  }
 0x10b   : > { %2590 = vmatpush.bf16.msra.mxu0 %v6799_v13  ;;  %2604 = vmatpush.bf16.msra.mxu1 %v6803_v14  ;;  %v6030_v13 = vld [vmem:[%s9503_s20 + $0x120] sm:$0xf]  ;;  %v5918_v56 = vld [vmem:[%s9503_s20 + $0x30] sm:$0xf]  ;;  %s9243_s6 = smov (!%p6892_p4), 32   ;;  %s10642_s4 = sld [smem:[#allocation44_spill]] (!%p6892_p4) }
 0x10c   : > { %2618 = vmatpush.bf16.msra.mxu2 %v6807_v15  ;;  %2584 = vmatmul.bf16.vlgmr.msrb.gmra.mxu3 %v9692_v4  ;;  %v8074_v14 = vld [vmem:[%s9503_s20 + $0x19c] sm:$0xf0]  ;;  %v8058_v15 = vld [vmem:[%s9503_s20 + $0x124] sm:$0xf]  ;;  %v8044_v57 = vld [vmem:[%s9503_s20 + $0xac] sm:$0xf0] }
 0x10d   : > { %2632 = vmatpush.bf16.msra.mxu3 %v6811_v19  ;;  %2570 = vmatmul.bf16.vlgmr.msrb.gmra.mxu2 %v9692_v4  ;;  %v8075_v19 = vld [vmem:[%s9503_s20 + $0x1a4] sm:$0xf0]  ;;  %v6031_v22 = vor.u32 %v8074_v14, %v6030_v13  ;;  %v6571_v13 = vor.u32 %v8189_v5, %v6568_v6  ;;  %v6432_v14 = vld [vmem:[%s9503_s20 + $0x4b0] sm:$0xf0]  ;;  %v8270_v5 = vld [vmem:[%s9503_s20 + $0x7bc] sm:$0xf0] }
 0x10e   : > { %v8254_v6 = vld [vmem:[%s9503_s20 + $0x744] sm:$0xf]  ;;  %s10643_s27 = sld [smem:[#allocation45_spill]] (!%p6892_p4) }
 0x10f   : > { %2591 = vmatpush.bf16.msra.mxu0 %v6671_v25  ;;  %2605 = vmatpush.bf16.msra.mxu1 %v6675_v26  ;;  %v6035_v25 = vor.u32 %v8058_v15, %v6032_v17  ;;  %v6039_v26 = vor.u32 %v8075_v19, %v6038_v18  ;;  %v6438_v15 = vld [vmem:[%s9503_s20 + $0x438] sm:$0xf]  ;;  %v8157_v17 = vld [vmem:[%s9503_s20 + $0x43c] sm:$0xf] }
 0x110   : > { %2619 = vmatpush.bf16.msra.mxu2 %v6679_v27  ;;  %v8026_v27 = vld [vmem:[%s9503_s20 + $0x24] sm:$0xf]  ;;  %v6440_v18 = vld [vmem:[%s9503_s20 + $0x4b8] sm:$0xf0] }
 0x111   : > { %2633 = vmatpush.bf16.msra.mxu3 %v6683_v31  ;;  %v8043_v31 = vld [vmem:[%s9503_s20 + $0xa4] sm:$0xf0]  ;;  %v5907_v41 = vor.u32 %v8026_v27, %v5904_v28  ;;  %v6310_v27 = vld [vmem:[%s9503_s20 + $0x338] sm:$0xf] }
 0x112   : > { %v5911_v42 = vor.u32 %v8043_v31, %v5910_v29  ;;  %v8141_v28 = vld [vmem:[%s9503_s20 + $0x3b4] sm:$0xf0]  ;;  %v8125_v29 = vld [vmem:[%s9503_s20 + $0x33c] sm:$0xf] }
 0x113   : > { %2592 = vmatpush.bf16.msra.mxu0 %v6543_v37  ;;  %2606 = vmatpush.bf16.msra.mxu1 %v6547_v38  ;;  %v5903_v37 = vor.u32 %v8042_v24, %v5902_v23  ;;  %v6816_v38 = vld [vmem:[%s9503_s20 + $0x7b0] sm:$0xf0]  ;;  %v8140_v23 = vld [vmem:[%s9503_s20 + $0x3ac] sm:$0xf0]  ;;  %v6311_v33 = vor.u32 %v8141_v28, %v6310_v27  ;;  %v6712_v27 = vld [vmem:[%s9503_s20 + $0x6c8] sm:$0xf0] }
 0x114   : > { %2620 = vmatpush.bf16.msra.mxu2 %v6551_v39  ;;  %v6822_v39 = vld [vmem:[%s9503_s20 + $0x738] sm:$0xf]  ;;  %v6819_v47 = vor.u32 %v8252_v36, %v6816_v38  ;;  %v8124_v24 = vld [vmem:[%s9503_s20 + $0x334] sm:$0xf] }
 0x115   : > { %2634 = vmatpush.bf16.msra.mxu3 %v6555_v43  ;;  %v8253_v43 = vld [vmem:[%s9503_s20 + $0x73c] sm:$0xf]  ;;  %v6823_v48 = vor.u32 %v8269_v40, %v6822_v39  ;;  %v8092_v36 = vld [vmem:[%s9503_s20 + $0x234] sm:$0xf]  ;;  %v6182_v39 = vld [vmem:[%s9503_s20 + $0x238] sm:$0xf] }
 0x116   : > { %v6827_v52 = vor.u32 %v8253_v43, %v6824_v44  ;;  %v6176_v38 = vld [vmem:[%s9503_s20 + $0x2b0] sm:$0xf0]  ;;  %v8109_v40 = vld [vmem:[%s9503_s20 + $0x2b4] sm:$0xf0]  ;;  %v6175_v43 = vor.u32 %v8108_v35, %v6174_v34  ;;  %v6576_v35 = vld [vmem:[%s9503_s20 + $0x5c0] sm:$0xf0] }
 0x117   : > { %2593 = vmatpush.bf16.msra.mxu0 %v6415_v49  ;;  %2607 = vmatpush.bf16.msra.mxu1 %v6419_v50  ;;  %v6686_v49 = vld [vmem:[%s9503_s20 + $0x630] sm:$0xf]  ;;  %v6179_v44 = vor.u32 %v8092_v36, %v6176_v38  ;;  %v6582_v36 = vld [vmem:[%s9503_s20 + $0x548] sm:$0xf]  ;;  %v8191_v38 = vld [vmem:[%s9503_s20 + $0x54c] sm:$0xf] }
 0x118   : > { %2621 = vmatpush.bf16.msra.mxu2 %v6423_v51  ;;  %v8236_v50 = vld [vmem:[%s9503_s20 + $0x6ac] sm:$0xf0]  ;;  %v8220_v51 = vld [vmem:[%s9503_s20 + $0x634] sm:$0xf] }
 0x119   : > { %2635 = vmatpush.bf16.msra.mxu3 %v6427_v55  ;;  %v8237_v55 = vld [vmem:[%s9503_s20 + $0x6b4] sm:$0xf0]  ;;  %v6687_v58 = vor.u32 %v8236_v50, %v6686_v49  ;;  %v6691_v59 = vor.u32 %v8220_v51, %v6688_v53  ;;  %v6048_v50 = vld [vmem:[%s9503_s20 + $0x1b0] sm:$0xf0]  ;;  %v8061_v53 = vld [vmem:[%s9503_s20 + $0x13c] sm:$0xf] }
 0x11a   : > { %v6695_v60 = vor.u32 %v8237_v55, %v6694_v54  ;;  %v6054_v51 = vld [vmem:[%s9503_s20 + $0x138] sm:$0xf]  ;;  %v6056_v54 = vld [vmem:[%s9503_s20 + $0x1b8] sm:$0xf0] }
 0x11b   : > { %2594 = vmatpush.bf16.msra.mxu0 %v6287_v61  ;;  %2608 = vmatpush.bf16.msra.mxu1 %v6291_v62  ;;  %v6558_v61 = vld [vmem:[%s9503_s20 + $0x530] sm:$0xf] }
 0x11c   : > { %2622 = vmatpush.bf16.msra.mxu2 %v6295_v63  ;;  %v8204_v62 = vld [vmem:[%s9503_s20 + $0x5ac] sm:$0xf0]  ;;  %v8188_v63 = vld [vmem:[%s9503_s20 + $0x534] sm:$0xf] }
 0x11d   : > { %2636 = vmatpush.bf16.msra.mxu3 %v6299_v3  ;;  %v8205_v3 = vld [vmem:[%s9503_s20 + $0x5b4] sm:$0xf0]  ;;  %v6559_v7 = vor.u32 %v8204_v62, %v6558_v61  ;;  %v6563_v8 = vor.u32 %v8188_v63, %v6560_v1  ;;  %v5920_v61 = vld [vmem:[%s9503_s20 + $0xb0] sm:$0xf0]  ;;  %v6059_v63 = vor.u32 %v8061_v53, %v6056_v54  ;;  %v8029_v1 = vld [vmem:[%s9503_s20 + $0x3c] sm:$0xf] }
 0x11e   : > { %v6567_v9 = vor.u32 %v8205_v3, %v6566_v2  ;;  %v5926_v62 = vld [vmem:[%s9503_s20 + $0x38] sm:$0xf]  ;;  %v5928_v2 = vld [vmem:[%s9503_s20 + $0xb8] sm:$0xf0]  ;;  %v6830_v3 = vld [vmem:[%s9503_s20 + $0x740] sm:$0xf] }
 0x11f   : > { %2595 = vmatpush.bf16.msra.mxu0 %v6159_v10  ;;  %2609 = vmatpush.bf16.msra.mxu1 %v6163_v11  ;;  %v6430_v10 = vld [vmem:[%s9503_s20 + $0x430] sm:$0xf]  ;;  %v6318_v54 = vld [vmem:[%s9503_s20 + $0x340] sm:$0xf] }
 0x120   : > { %2623 = vmatpush.bf16.msra.mxu2 %v6167_v12  ;;  %v8172_v11 = vld [vmem:[%s9503_s20 + $0x4ac] sm:$0xf0]  ;;  %v8156_v12 = vld [vmem:[%s9503_s20 + $0x434] sm:$0xf] }
 0x121   : > { %2637 = vmatpush.bf16.msra.mxu3 %v6171_v16  ;;  %v8173_v16 = vld [vmem:[%s9503_s20 + $0x4b4] sm:$0xf0]  ;;  %v6431_v19 = vor.u32 %v8172_v11, %v6430_v10  ;;  %v6435_v20 = vor.u32 %v8156_v12, %v6432_v14  ;;  %v8271_v10 = vld [vmem:[%s9503_s20 + $0x7c4] sm:$0xf0]  ;;  %v6840_v14 = vld [vmem:[%s9503_s20 + $0x7c8] sm:$0xf0] }
 0x122   : > { %v6439_v21 = vor.u32 %v8173_v16, %v6438_v15  ;;  %v5931_v15 = vor.u32 %v8029_v1, %v5928_v2  ;;  %v6831_v16 = vor.u32 %v8270_v5, %v6830_v3  ;;  %v6190_v2 = vld [vmem:[%s9503_s20 + $0x240] sm:$0xf]  ;;  %v8094_v5 = vld [vmem:[%s9503_s20 + $0x244] sm:$0xf] }
 0x123   : > { %2596 = vmatpush.bf16.msra.mxu0 %v6031_v22  ;;  %2610 = vmatpush.bf16.msra.mxu1 %v6035_v25  ;;  %v6302_v22 = vld [vmem:[%s9503_s20 + $0x330] sm:$0xf]  ;;  %v6443_v25 = vor.u32 %v8157_v17, %v6440_v18  ;;  %v8110_v3 = vld [vmem:[%s9503_s20 + $0x2bc] sm:$0xf0] }
 0x124   : > { %2624 = vmatpush.bf16.msra.mxu2 %v6039_v26  ;;  %v6304_v26 = vld [vmem:[%s9503_s20 + $0x3b0] sm:$0xf0]  ;;  %v6303_v31 = vor.u32 %v8140_v23, %v6302_v22  ;;  %v6704_v23 = vld [vmem:[%s9503_s20 + $0x6c0] sm:$0xf0] }
 0x125   : > { %2638 = vmatpush.bf16.msra.mxu3 %v6043_v30  ;;  %v6312_v30 = vld [vmem:[%s9503_s20 + $0x3b8] sm:$0xf0]  ;;  %v6307_v32 = vor.u32 %v8124_v24, %v6304_v26  ;;  %v6710_v24 = vld [vmem:[%s9503_s20 + $0x648] sm:$0xf]  ;;  %v8223_v26 = vld [vmem:[%s9503_s20 + $0x64c] sm:$0xf] }
 0x126   : > { %v6715_v34 = vor.u32 %v8223_v26, %v6712_v27  ;;  %v8046_v26 = vld [vmem:[%s9503_s20 + $0xbc] sm:$0xf0] }
 0x127   : > { %2597 = vmatpush.bf16.msra.mxu0 %v5903_v37  ;;  %2611 = vmatpush.bf16.msra.mxu1 %v5907_v41  ;;  %v6315_v37 = vor.u32 %v8125_v29, %v6312_v30  ;;  %v8093_v41 = vld [vmem:[%s9503_s20 + $0x23c] sm:$0xf] }
 0x128   : > { %2625 = vmatpush.bf16.msra.mxu2 %v5911_v42  ;;  %v6184_v42 = vld [vmem:[%s9503_s20 + $0x2b8] sm:$0xf0] }
 0x129   : > { %2639 = vmatpush.bf16.msra.mxu3 %v5915_v45  ;;  %v6183_v45 = vor.u32 %v8109_v40, %v6182_v39  ;;  %v6187_v49 = vor.u32 %v8093_v41, %v6184_v42  ;;  %v6584_v39 = vld [vmem:[%s9503_s20 + $0x5c8] sm:$0xf0] }
 0x12a   : > { %2598 = vmatmul.bf16.vlgmr.msra.gmra.mxu0 %v9692_v4  ;;  %2612 = vmatmul.bf16.vlgmr.msra.gmra.mxu1 %v9692_v4 }
 0x12b   : > { %2646 = vmatpush.bf16.msrb.mxu0 %v6815_v46  ;;  %2660 = vmatpush.bf16.msrb.mxu1 %v6819_v47  ;;  %v6046_v46 = vld [vmem:[%s9503_s20 + $0x130] sm:$0xf] }
 0x12c   : > { %2674 = vmatpush.bf16.msrb.mxu2 %v6823_v48  ;;  %2640 = vmatmul.bf16.vlgmr.msra.gmra.mxu3 %v9692_v4  ;;  %v8076_v47 = vld [vmem:[%s9503_s20 + $0x1ac] sm:$0xf0]  ;;  %v8060_v48 = vld [vmem:[%s9503_s20 + $0x134] sm:$0xf] }
 0x12d   : > { %2688 = vmatpush.bf16.msrb.mxu3 %v6827_v52  ;;  %2626 = vmatmul.bf16.vlgmr.msra.gmra.mxu2 %v9692_v4  ;;  %v8077_v52 = vld [vmem:[%s9503_s20 + $0x1b4] sm:$0xf0]  ;;  %v6047_v55 = vor.u32 %v8076_v47, %v6046_v46  ;;  %v6587_v46 = vor.u32 %v8191_v38, %v6584_v39  ;;  %v6448_v47 = vld [vmem:[%s9503_s20 + $0x4c0] sm:$0xf0]  ;;  %v8256_v38 = vld [vmem:[%s9503_s20 + $0x754] sm:$0xf] }
 0x12f   : > { %2647 = vmatpush.bf16.msrb.mxu0 %v6687_v58  ;;  %2661 = vmatpush.bf16.msrb.mxu1 %v6691_v59  ;;  %v6051_v58 = vor.u32 %v8060_v48, %v6048_v50  ;;  %v6055_v59 = vor.u32 %v8077_v52, %v6054_v51  ;;  %v6454_v48 = vld [vmem:[%s9503_s20 + $0x448] sm:$0xf]  ;;  %v8159_v50 = vld [vmem:[%s9503_s20 + $0x44c] sm:$0xf] }
 0x130   : > { %2675 = vmatpush.bf16.msrb.mxu2 %v6695_v60  ;;  %v8028_v60 = vld [vmem:[%s9503_s20 + $0x34] sm:$0xf] }
 0x131   : > { %2689 = vmatpush.bf16.msrb.mxu3 %v6699_v0  ;;  %v8045_v0 = vld [vmem:[%s9503_s20 + $0xb4] sm:$0xf0]  ;;  %v5923_v11 = vor.u32 %v8028_v60, %v5920_v61  ;;  %v8143_v60 = vld [vmem:[%s9503_s20 + $0x3c4] sm:$0xf0]  ;;  %v8127_v61 = vld [vmem:[%s9503_s20 + $0x34c] sm:$0xf] }
 0x132   : > { %v5927_v12 = vor.u32 %v8045_v0, %v5926_v62  ;;  %v6328_v62 = vld [vmem:[%s9503_s20 + $0x3c8] sm:$0xf0] }
 0x133   : > { %2648 = vmatpush.bf16.msrb.mxu0 %v6559_v7  ;;  %2662 = vmatpush.bf16.msrb.mxu1 %v6563_v8  ;;  %v5919_v7 = vor.u32 %v8044_v57, %v5918_v56  ;;  %v6832_v8 = vld [vmem:[%s9503_s20 + $0x7c0] sm:$0xf0] }
 0x134   : > { %2676 = vmatpush.bf16.msrb.mxu2 %v6567_v9  ;;  %v6838_v9 = vld [vmem:[%s9503_s20 + $0x748] sm:$0xf]  ;;  %v6835_v17 = vor.u32 %v8254_v6, %v6832_v8  ;;  %v8126_v56 = vld [vmem:[%s9503_s20 + $0x344] sm:$0xf]  ;;  %v6331_v6 = vor.u32 %v8127_v61, %v6328_v62  ;;  %v6590_v62 = vld [vmem:[%s9503_s20 + $0x550] sm:$0xf] }
 0x135   : > { %2690 = vmatpush.bf16.msrb.mxu3 %v6571_v13  ;;  %v8255_v13 = vld [vmem:[%s9503_s20 + $0x74c] sm:$0xf]  ;;  %v6839_v18 = vor.u32 %v8271_v10, %v6838_v9  ;;  %v6198_v8 = vld [vmem:[%s9503_s20 + $0x248] sm:$0xf] }
 0x136   : > { %v6843_v22 = vor.u32 %v8255_v13, %v6840_v14  ;;  %v8111_v9 = vld [vmem:[%s9503_s20 + $0x2c4] sm:$0xf0]  ;;  %v8095_v10 = vld [vmem:[%s9503_s20 + $0x24c] sm:$0xf] }
 0x137   : > { %2649 = vmatpush.bf16.msrb.mxu0 %v6431_v19  ;;  %2663 = vmatpush.bf16.msrb.mxu1 %v6435_v20  ;;  %v6702_v19 = vld [vmem:[%s9503_s20 + $0x640] sm:$0xf]  ;;  %v6199_v14 = vor.u32 %v8111_v9, %v6198_v8  ;;  %v6600_v8 = vld [vmem:[%s9503_s20 + $0x5d8] sm:$0xf0] }
 0x138   : > { %2677 = vmatpush.bf16.msrb.mxu2 %v6439_v21  ;;  %v8238_v20 = vld [vmem:[%s9503_s20 + $0x6bc] sm:$0xf0]  ;;  %v8222_v21 = vld [vmem:[%s9503_s20 + $0x644] sm:$0xf] }
 0x139   : > { %2691 = vmatpush.bf16.msrb.mxu3 %v6443_v25  ;;  %v8239_v25 = vld [vmem:[%s9503_s20 + $0x6c4] sm:$0xf0]  ;;  %v6703_v28 = vor.u32 %v8238_v20, %v6702_v19  ;;  %v6707_v29 = vor.u32 %v8222_v21, %v6704_v23  ;;  %v6064_v19 = vld [vmem:[%s9503_s20 + $0x1c0] sm:$0xf0]  ;;  %v6072_v23 = vld [vmem:[%s9503_s20 + $0x1c8] sm:$0xf0] }
 0x13a   : > { %v6711_v30 = vor.u32 %v8239_v25, %v6710_v24  ;;  %v6070_v20 = vld [vmem:[%s9503_s20 + $0x148] sm:$0xf]  ;;  %v5934_v25 = vld [vmem:[%s9503_s20 + $0x40] sm:$0xf] }
 0x13b   : > { %2650 = vmatpush.bf16.msrb.mxu0 %v6303_v31  ;;  %2664 = vmatpush.bf16.msrb.mxu1 %v6307_v32  ;;  %v6574_v31 = vld [vmem:[%s9503_s20 + $0x540] sm:$0xf]  ;;  %v8079_v21 = vld [vmem:[%s9503_s20 + $0x1c4] sm:$0xf0]  ;;  %v5935_v39 = vor.u32 %v8046_v26, %v5934_v25  ;;  %v8144_v25 = vld [vmem:[%s9503_s20 + $0x3cc] sm:$0xf0] }
 0x13c   : > { %2678 = vmatpush.bf16.msrb.mxu2 %v6311_v33  ;;  %v8206_v32 = vld [vmem:[%s9503_s20 + $0x5bc] sm:$0xf0]  ;;  %v8190_v33 = vld [vmem:[%s9503_s20 + $0x544] sm:$0xf]  ;;  %v8128_v26 = vld [vmem:[%s9503_s20 + $0x354] sm:$0xf] }
 0x13d   : > { %2692 = vmatpush.bf16.msrb.mxu3 %v6315_v37  ;;  %v8207_v37 = vld [vmem:[%s9503_s20 + $0x5c4] sm:$0xf0]  ;;  %v6575_v40 = vor.u32 %v8206_v32, %v6574_v31  ;;  %v6579_v41 = vor.u32 %v8190_v33, %v6576_v35  ;;  %v5944_v35 = vld [vmem:[%s9503_s20 + $0xc8] sm:$0xf0] }
 0x13e   : > { %v6583_v42 = vor.u32 %v8207_v37, %v6582_v36  ;;  %v5942_v31 = vld [vmem:[%s9503_s20 + $0x48] sm:$0xf]  ;;  %v6846_v36 = vld [vmem:[%s9503_s20 + $0x750] sm:$0xf] }
 0x13f   : > { %2651 = vmatpush.bf16.msrb.mxu0 %v6175_v43  ;;  %2665 = vmatpush.bf16.msrb.mxu1 %v6179_v44  ;;  %v6446_v43 = vld [vmem:[%s9503_s20 + $0x440] sm:$0xf]  ;;  %v8047_v33 = vld [vmem:[%s9503_s20 + $0xc4] sm:$0xf0]  ;;  %v8272_v37 = vld [vmem:[%s9503_s20 + $0x7cc] sm:$0xf0] }
 0x140   : > { %2679 = vmatpush.bf16.msrb.mxu2 %v6183_v45  ;;  %v8174_v44 = vld [vmem:[%s9503_s20 + $0x4bc] sm:$0xf0]  ;;  %v8158_v45 = vld [vmem:[%s9503_s20 + $0x444] sm:$0xf] }
 0x141   : > { %2693 = vmatpush.bf16.msrb.mxu3 %v6187_v49  ;;  %v8175_v49 = vld [vmem:[%s9503_s20 + $0x4c4] sm:$0xf0]  ;;  %v6447_v51 = vor.u32 %v8174_v44, %v6446_v43  ;;  %v6451_v52 = vor.u32 %v8158_v45, %v6448_v47  ;;  %v5943_v44 = vor.u32 %v8047_v33, %v5942_v31  ;;  %v8257_v45 = vld [vmem:[%s9503_s20 + $0x75c] sm:$0xf]  ;;  %v870_v31 = vld [vmem:[#allocation2 + $0xb0] sm:$0xff] }
 0x142   : > { %v6455_v53 = vor.u32 %v8175_v49, %v6454_v48  ;;  %v6847_v48 = vor.u32 %v8272_v37, %v6846_v36  ;;  %v6344_v33 = vld [vmem:[%s9503_s20 + $0x3d8] sm:$0xf0]  ;;  %v6206_v36 = vld [vmem:[%s9503_s20 + $0x250] sm:$0xf] }
 0x143   : > { %2652 = vmatpush.bf16.msrb.mxu0 %v6047_v55  ;;  %2666 = vmatpush.bf16.msrb.mxu1 %v6051_v58  ;;  %v8142_v55 = vld [vmem:[%s9503_s20 + $0x3bc] sm:$0xf0]  ;;  %v6320_v58 = vld [vmem:[%s9503_s20 + $0x3c0] sm:$0xf0] }
 0x144   : > { %2680 = vmatpush.bf16.msrb.mxu2 %v6055_v59  ;;  %v6326_v59 = vld [vmem:[%s9503_s20 + $0x348] sm:$0xf]  ;;  %v6323_v0 = vor.u32 %v8126_v56, %v6320_v58  ;;  %v8241_v56 = vld [vmem:[%s9503_s20 + $0x6d4] sm:$0xf0]  ;;  %v6728_v58 = vld [vmem:[%s9503_s20 + $0x6d8] sm:$0xf0] }
 0x145   : > { %2694 = vmatpush.bf16.msrb.mxu3 %v6059_v63  ;;  %v6319_v63 = vor.u32 %v8142_v55, %v6318_v54  ;;  %v6327_v1 = vor.u32 %v8143_v60, %v6326_v59  ;;  %v6720_v54 = vld [vmem:[%s9503_s20 + $0x6d0] sm:$0xf0]  ;;  %v6726_v55 = vld [vmem:[%s9503_s20 + $0x658] sm:$0xf] }
 0x146   : > { %v6727_v61 = vor.u32 %v8241_v56, %v6726_v55  ;;  %v873_v55 = vld [vmem:[#allocation2 + $0x18] sm:$0xff] }
 0x147   : > { %2653 = vmatpush.bf16.msrb.mxu0 %v5919_v7  ;;  %2667 = vmatpush.bf16.msrb.mxu1 %v5923_v11  ;;  %v6192_v7 = vld [vmem:[%s9503_s20 + $0x2c0] sm:$0xf0]  ;;  %v6200_v11 = vld [vmem:[%s9503_s20 + $0x2c8] sm:$0xf0] }
 0x148   : > { %2681 = vmatpush.bf16.msrb.mxu2 %v5927_v12  ;;  %v6191_v12 = vor.u32 %v8110_v3, %v6190_v2  ;;  %v6195_v13 = vor.u32 %v8094_v5, %v6192_v7  ;;  %v6592_v2 = vld [vmem:[%s9503_s20 + $0x5d0] sm:$0xf0]  ;;  %v6598_v3 = vld [vmem:[%s9503_s20 + $0x558] sm:$0xf]  ;;  %v8193_v7 = vld [vmem:[%s9503_s20 + $0x55c] sm:$0xf] }
 0x149   : > { %2695 = vmatpush.bf16.msrb.mxu3 %v5931_v15  ;;  %v6062_v15 = vld [vmem:[%s9503_s20 + $0x140] sm:$0xf]  ;;  %v8209_v5 = vld [vmem:[%s9503_s20 + $0x5d4] sm:$0xf0] }
 0x14a   : > { %2654 = vmatmul.bf16.vlgmr.msrb.gmra.mxu0 %v9692_v4  ;;  %2668 = vmatmul.bf16.vlgmr.msrb.gmra.mxu1 %v9692_v4 }
 0x14b   : > { %2702 = vmatpush.bf16.msra.mxu0 %v6831_v16  ;;  %2716 = vmatpush.bf16.msra.mxu1 %v6835_v17  ;;  %v8078_v16 = vld [vmem:[%s9503_s20 + $0x1bc] sm:$0xf0]  ;;  %v8062_v17 = vld [vmem:[%s9503_s20 + $0x144] sm:$0xf] }
 0x14c   : > { %2730 = vmatpush.bf16.msra.mxu2 %v6839_v18  ;;  %2696 = vmatmul.bf16.vlgmr.msrb.gmra.mxu3 %v9692_v4  ;;  %v6203_v18 = vor.u32 %v8095_v10, %v6200_v11  ;;  %v6063_v24 = vor.u32 %v8078_v16, %v6062_v15  ;;  %v6067_v27 = vor.u32 %v8062_v17, %v6064_v19  ;;  %v6464_v16 = vld [vmem:[%s9503_s20 + $0x4d0] sm:$0xf0]  ;;  %v6470_v17 = vld [vmem:[%s9503_s20 + $0x458] sm:$0xf]  ;;  %v8161_v19 = vld [vmem:[%s9503_s20 + $0x45c] sm:$0xf] }
 0x14d   : > { %2744 = vmatpush.bf16.msra.mxu3 %v6843_v22  ;;  %2682 = vmatmul.bf16.vlgmr.msrb.gmra.mxu2 %v9692_v4  ;;  %v6456_v4 = vld [vmem:[%s9503_s20 + $0x4c8] sm:$0xf0]  ;;  %v6599_v11 = vor.u32 %v8209_v5, %v6598_v3  ;;  %v6603_v15 = vor.u32 %v8193_v7, %v6600_v8  ;;  %v902_v3 = vld [vmem:[#allocation2 + $0x148] sm:$0xff]  ;;  %v5950_v5 = vld [vmem:[%s9503_s20 + $0x50] sm:$0xf] }
 0x14e   : > { %v6459_v57 = vor.u32 %v8159_v50, %v6456_v4  ;;  %v8063_v22 = vld [vmem:[%s9503_s20 + $0x14c] sm:$0xf]  ;;  %v6718_v4 = vld [vmem:[%s9503_s20 + $0x650] sm:$0xf] }
 0x14f   : > { %2703 = vmatpush.bf16.msra.mxu0 %v6703_v28  ;;  %2717 = vmatpush.bf16.msra.mxu1 %v6707_v29  ;;  %v6071_v28 = vor.u32 %v8079_v21, %v6070_v20  ;;  %v8030_v29 = vld [vmem:[%s9503_s20 + $0x44] sm:$0xf]  ;;  %v6075_v32 = vor.u32 %v8063_v22, %v6072_v23  ;;  %v6472_v20 = vld [vmem:[%s9503_s20 + $0x4d8] sm:$0xf0]  ;;  %v6334_v22 = vld [vmem:[%s9503_s20 + $0x350] sm:$0xf] }
 0x150   : > { %2731 = vmatpush.bf16.msra.mxu2 %v6711_v30  ;;  %v5936_v30 = vld [vmem:[%s9503_s20 + $0xc0] sm:$0xf0]  ;;  %v8048_v7 = vld [vmem:[%s9503_s20 + $0xcc] sm:$0xf0] }
 0x151   : > { %2745 = vmatpush.bf16.msra.mxu3 %v6715_v34  ;;  %v8031_v34 = vld [vmem:[%s9503_s20 + $0x4c] sm:$0xf]  ;;  %v5939_v43 = vor.u32 %v8030_v29, %v5936_v30  ;;  %v6342_v29 = vld [vmem:[%s9503_s20 + $0x358] sm:$0xf] }
 0x152   : > { %v5947_v47 = vor.u32 %v8031_v34, %v5944_v35  ;;  %v8145_v30 = vld [vmem:[%s9503_s20 + $0x3d4] sm:$0xf0]  ;;  %v871_v34 = vld [vmem:[#allocation2 + $0x1b0] sm:$0xff]  ;;  %v6335_v35 = vor.u32 %v8144_v25, %v6334_v22  ;;  %v5960_v22 = vld [vmem:[%s9503_s20 + $0xd8] sm:$0xf0] }
 0x153   : > { %2704 = vmatpush.bf16.msra.mxu0 %v6575_v40  ;;  %2718 = vmatpush.bf16.msra.mxu1 %v6579_v41  ;;  %v6848_v40 = vld [vmem:[%s9503_s20 + $0x7d0] sm:$0xf0]  ;;  %v6854_v41 = vld [vmem:[%s9503_s20 + $0x758] sm:$0xf] }
 0x154   : > { %2732 = vmatpush.bf16.msra.mxu2 %v6583_v42  ;;  %v8273_v42 = vld [vmem:[%s9503_s20 + $0x7d4] sm:$0xf0]  ;;  %v6851_v49 = vor.u32 %v8256_v38, %v6848_v40  ;;  %v8112_v40 = vld [vmem:[%s9503_s20 + $0x2cc] sm:$0xf0] }
 0x155   : > { %2746 = vmatpush.bf16.msra.mxu3 %v6587_v46  ;;  %v6856_v46 = vld [vmem:[%s9503_s20 + $0x7d8] sm:$0xf0]  ;;  %v6855_v50 = vor.u32 %v8273_v42, %v6854_v41  ;;  %v8096_v41 = vld [vmem:[%s9503_s20 + $0x254] sm:$0xf] }
 0x156   : > { %v6208_v42 = vld [vmem:[%s9503_s20 + $0x2d0] sm:$0xf0] }
 0x157   : > { %2705 = vmatpush.bf16.msra.mxu0 %v6447_v51  ;;  %2719 = vmatpush.bf16.msra.mxu1 %v6451_v52  ;;  %v8240_v51 = vld [vmem:[%s9503_s20 + $0x6cc] sm:$0xf0]  ;;  %v8224_v52 = vld [vmem:[%s9503_s20 + $0x654] sm:$0xf]  ;;  %v6211_v56 = vor.u32 %v8096_v41, %v6208_v42 }
 0x158   : > { %2733 = vmatpush.bf16.msra.mxu2 %v6455_v53  ;;  %v6859_v53 = vor.u32 %v8257_v45, %v6856_v46  ;;  %v6719_v59 = vor.u32 %v8240_v51, %v6718_v4  ;;  %v6723_v60 = vor.u32 %v8224_v52, %v6720_v54  ;;  %v6214_v46 = vld [vmem:[%s9503_s20 + $0x258] sm:$0xf]  ;;  %v6078_v4 = vld [vmem:[%s9503_s20 + $0x150] sm:$0xf]  ;;  %v872_v51 = vld [vmem:[#allocation2 + $0xd8] sm:$0xff]  ;;  %v6207_v52 = vor.u32 %v8112_v40, %v6206_v36 }
 0x159   : > { %2747 = vmatpush.bf16.msra.mxu3 %v6459_v57  ;;  %v8225_v57 = vld [vmem:[%s9503_s20 + $0x65c] sm:$0xf]  ;;  %v8064_v54 = vld [vmem:[%s9503_s20 + $0x154] sm:$0xf]  ;;  %v6872_v36 = vld [vmem:[%s9503_s20 + $0x7e8] sm:$0xf0] }
 0x15a   : > { %v6734_v40 = vld [vmem:[%s9503_s20 + $0x660] sm:$0xf] }
 0x15b   : > { %2706 = vmatpush.bf16.msra.mxu0 %v6319_v63  ;;  %2720 = vmatpush.bf16.msra.mxu1 %v6323_v0  ;;  %v8208_v63 = vld [vmem:[%s9503_s20 + $0x5cc] sm:$0xf0]  ;;  %v8192_v0 = vld [vmem:[%s9503_s20 + $0x554] sm:$0xf] }
 0x15c   : > { %2734 = vmatpush.bf16.msra.mxu2 %v6327_v1  ;;  %v6731_v1 = vor.u32 %v8225_v57, %v6728_v58  ;;  %v6591_v9 = vor.u32 %v8208_v63, %v6590_v62  ;;  %v6595_v10 = vor.u32 %v8192_v0, %v6592_v2  ;;  %v6080_v58 = vld [vmem:[%s9503_s20 + $0x1d0] sm:$0xf0]  ;;  %v8065_v63 = vld [vmem:[%s9503_s20 + $0x15c] sm:$0xf] }
 0x15d   : > { %2748 = vmatpush.bf16.msra.mxu3 %v6331_v6  ;;  %v9965_v6 = vld [vmem:[%s9501_s21] sm:$0xff] }
 0x15e   : > { %v6088_v0 = vld [vmem:[%s9503_s20 + $0x1d8] sm:$0xf0] }
 0x15f   : > { %2707 = vmatpush.bf16.msra.mxu0 %v6191_v12  ;;  %2721 = vmatpush.bf16.msra.mxu1 %v6195_v13  ;;  %v6462_v12 = vld [vmem:[%s9503_s20 + $0x450] sm:$0xf] }
 0x160   : > { %2735 = vmatpush.bf16.msra.mxu2 %v6199_v14  ;;  %v8176_v13 = vld [vmem:[%s9503_s20 + $0x4cc] sm:$0xf0]  ;;  %v8160_v14 = vld [vmem:[%s9503_s20 + $0x454] sm:$0xf] }
 0x161   : > { %2749 = vmatpush.bf16.msra.mxu3 %v6203_v18  ;;  %v8177_v18 = vld [vmem:[%s9503_s20 + $0x4d4] sm:$0xf0]  ;;  %v6463_v21 = vor.u32 %v8176_v13, %v6462_v12  ;;  %v6467_v23 = vor.u32 %v8160_v14, %v6464_v16  ;;  %v5952_v12 = vld [vmem:[%s9503_s20 + $0xd0] sm:$0xf0] }
 0x162   : > { %v5958_v13 = vld [vmem:[%s9503_s20 + $0x58] sm:$0xf] }
 0x163   : > { %2708 = vmatpush.bf16.msra.mxu0 %v6063_v24  ;;  %2722 = vmatpush.bf16.msra.mxu1 %v6067_v27  ;;  %v6471_v24 = vor.u32 %v8177_v18, %v6470_v17  ;;  %v6336_v27 = vld [vmem:[%s9503_s20 + $0x3d0] sm:$0xf0]  ;;  %v8049_v17 = vld [vmem:[%s9503_s20 + $0xd4] sm:$0xf0]  ;;  %v8033_v18 = vld [vmem:[%s9503_s20 + $0x5c] sm:$0xf] }
 0x164   : > { %2736 = vmatpush.bf16.msra.mxu2 %v6071_v28  ;;  %v6475_v28 = vor.u32 %v8161_v19, %v6472_v20  ;;  %v6339_v38 = vor.u32 %v8128_v26, %v6336_v27  ;;  %v8258_v26 = vld [vmem:[%s9503_s20 + $0x764] sm:$0xf] }
 0x165   : > { %2750 = vmatpush.bf16.msra.mxu3 %v6075_v32  ;;  %v8129_v32 = vld [vmem:[%s9503_s20 + $0x35c] sm:$0xf]  ;;  %v6864_v27 = vld [vmem:[%s9503_s20 + $0x7e0] sm:$0xf0] }
 0x166   : > { %v6347_v45 = vor.u32 %v8129_v32, %v6344_v33  ;;  %v905_v32 = vld [vmem:[#allocation2 + $0xc8] sm:$0xff] }
 0x167   : > { %2709 = vmatpush.bf16.msra.mxu0 %v5935_v39  ;;  %2723 = vmatpush.bf16.msra.mxu1 %v5939_v43  ;;  %v2487_v37 = vpop.f32.mrf.mxu0  ;;  %v6343_v39 = vor.u32 %v8145_v30, %v6342_v29  ;;  %v5951_v29 = vor.u32 %v8048_v7, %v5950_v5  ;;  %v6870_v30 = vld [vmem:[%s9503_s20 + $0x768] sm:$0xf]  ;;  %v8178_v7 = vld [vmem:[%s9503_s20 + $0x4dc] sm:$0xf0] }
 0x168   : > { %2737 = vmatpush.bf16.msra.mxu2 %v5943_v44  ;;  %v2926_v43 = vadd.f32 %v2487_v37, %v870_v31  ;;  %v2501_v44 = vpop.f32.mrf.mxu1  ;;  %v8275_v31 = vld [vmem:[%s9503_s20 + $0x7e4] sm:$0xf0] }
 0x169   : > { %2751 = vmatpush.bf16.msra.mxu3 %v5947_v47  ;;  %v8113_v47 = vld [vmem:[%s9503_s20 + $0x2d4] sm:$0xf0] }
 0x16a   : > { %2710 = vmatmul.bf16.vlgmr.msra.gmra.mxu0 %v9965_v6  ;;  %2724 = vmatmul.bf16.vlgmr.msra.gmra.mxu1 %v9965_v6  ;;  %2990 = vst [vmem:[#allocation2 + $0xb0] sm:$0xff] %v2926_v43  ;;  %v6215_v57 = vor.u32 %v8113_v47, %v6214_v46  ;;  %v6867_v43 = vor.u32 %v8258_v26, %v6864_v27  ;;  %v8226_v46 = vld [vmem:[%s9503_s20 + $0x664] sm:$0xf] }
 0x16b   : > { %2758 = vmatpush.bf16.msrb.mxu0 %v6847_v48  ;;  %2772 = vmatpush.bf16.msrb.mxu1 %v6851_v49  ;;  %v8097_v48 = vld [vmem:[%s9503_s20 + $0x25c] sm:$0xf]  ;;  %v2927_v49 = vadd.f32 %v2501_v44, %v871_v34  ;;  %v5959_v34 = vor.u32 %v8049_v17, %v5958_v13  ;;  %v6871_v44 = vor.u32 %v8275_v31, %v6870_v30  ;;  %v6736_v47 = vld [vmem:[%s9503_s20 + $0x6e0] sm:$0xf0]  ;;  %v8131_v31 = vld [vmem:[%s9503_s20 + $0x36c] sm:$0xf] }
 0x16c   : > { %2786 = vmatpush.bf16.msrb.mxu2 %v6855_v50  ;;  %2752 = vmatmul.bf16.vlgmr.msra.gmra.mxu3 %v9965_v6  ;;  %v6216_v50 = vld [vmem:[%s9503_s20 + $0x2d8] sm:$0xf0]  ;;  %v874_v13 = vld [vmem:[#allocation2 + $0x50] sm:$0xff] }
 0x16d   : > { %2800 = vmatpush.bf16.msrb.mxu3 %v6859_v53  ;;  %2738 = vmatmul.bf16.vlgmr.msra.gmra.mxu2 %v9965_v6  ;;  %v8080_v53 = vld [vmem:[%s9503_s20 + $0x1cc] sm:$0xf0]  ;;  %2991 = vst [vmem:[#allocation2 + $0x1b0] sm:$0xff] %v2927_v49  ;;  %v6219_v62 = vor.u32 %v8097_v48, %v6216_v50  ;;  %v6742_v50 = vld [vmem:[%s9503_s20 + $0x668] sm:$0xf] }
 0x16e   : > { %v6352_v27 = vld [vmem:[%s9503_s20 + $0x3e0] sm:$0xf0] }
 0x16f   : > { %2759 = vmatpush.bf16.msrb.mxu0 %v6719_v59  ;;  %2773 = vmatpush.bf16.msrb.mxu1 %v6723_v60  ;;  %v6086_v59 = vld [vmem:[%s9503_s20 + $0x158] sm:$0xf]  ;;  %v2529_v2 = vpop.f32.mrf.mxu3  ;;  %v2489_v14 = vpop.f32.mrf.mxu0 }
 0x170   : > { %2787 = vmatpush.bf16.msrb.mxu2 %v6727_v61  ;;  %v8081_v60 = vld [vmem:[%s9503_s20 + $0x1d4] sm:$0xf0]  ;;  %v2515_v61 = vpop.f32.mrf.mxu2  ;;  %v2929_v8 = vadd.f32 %v2529_v2, %v873_v55  ;;  %v2958_v19 = vadd.f32 %v2489_v14, %v902_v3  ;;  %v2503_v20 = vpop.f32.mrf.mxu1  ;;  %v6478_v2 = vld [vmem:[%s9503_s20 + $0x460] sm:$0xf]  ;;  %v8163_v14 = vld [vmem:[%s9503_s20 + $0x46c] sm:$0xf] }
 0x171   : > { %2801 = vmatpush.bf16.msrb.mxu3 %v6731_v1  ;;  %v2928_v1 = vadd.f32 %v2515_v61, %v872_v51  ;;  %v6087_v16 = vor.u32 %v8081_v60, %v6086_v59  ;;  %v8227_v51 = vld [vmem:[%s9503_s20 + $0x66c] sm:$0xf]  ;;  %v6608_v60 = vld [vmem:[%s9503_s20 + $0x5e0] sm:$0xf0]  ;;  %v6614_v61 = vld [vmem:[%s9503_s20 + $0x568] sm:$0xf]  ;;  %v6479_v17 = vor.u32 %v8178_v7, %v6478_v2 }
 0x172   : > { %2993 = vst [vmem:[#allocation2 + $0x18] sm:$0xff] %v2929_v8  ;;  %v8162_v8 = vld [vmem:[%s9503_s20 + $0x464] sm:$0xf]  ;;  %v908_v7 = vld [vmem:[#allocation2 + $0x20] sm:$0xff] }
 0x173   : > { %2760 = vmatpush.bf16.msrb.mxu0 %v6591_v9  ;;  %2774 = vmatpush.bf16.msrb.mxu1 %v6595_v10  ;;  %v903_v9 = vld [vmem:[#allocation2 + $0x1d0] sm:$0xff]  ;;  %v6079_v10 = vor.u32 %v8080_v53, %v6078_v4  ;;  %2992 = vst [vmem:[#allocation2 + $0xd8] sm:$0xff] %v2928_v1  ;;  %v8243_v4 = vld [vmem:[%s9503_s20 + $0x6e4] sm:$0xf0] }
 0x174   : > { %2788 = vmatpush.bf16.msrb.mxu2 %v6599_v11  ;;  %v8032_v11 = vld [vmem:[%s9503_s20 + $0x54] sm:$0xf]  ;;  %v2959_v25 = vadd.f32 %v2503_v20, %v903_v9  ;;  %3022 = vst [vmem:[#allocation2 + $0x148] sm:$0xff] %v2958_v19  ;;  %v6743_v55 = vor.u32 %v8243_v4, %v6742_v50  ;;  %v6480_v9 = vld [vmem:[%s9503_s20 + $0x4e0] sm:$0xf0] }
 0x175   : > { %2802 = vmatpush.bf16.msrb.mxu3 %v6603_v15  ;;  %v6083_v15 = vor.u32 %v8064_v54, %v6080_v58  ;;  %v5955_v33 = vor.u32 %v8032_v11, %v5952_v12  ;;  %v6739_v54 = vor.u32 %v8226_v46, %v6736_v47  ;;  %v8194_v58 = vld [vmem:[%s9503_s20 + $0x564] sm:$0xf]  ;;  %v6486_v11 = vld [vmem:[%s9503_s20 + $0x468] sm:$0xf]  ;;  %v6483_v19 = vor.u32 %v8162_v8, %v6480_v9  ;;  %v6232_v50 = vld [vmem:[%s9503_s20 + $0x2e8] sm:$0xf0] }
 0x176   : > { %3023 = vst [vmem:[#allocation2 + $0x1d0] sm:$0xff] %v2959_v25  ;;  %v6611_v3 = vor.u32 %v8194_v58, %v6608_v60  ;;  %v8179_v12 = vld [vmem:[%s9503_s20 + $0x4e4] sm:$0xf0]  ;;  %v8066_v58 = vld [vmem:[%s9503_s20 + $0x164] sm:$0xf] }
 0x177   : > { %2761 = vmatpush.bf16.msrb.mxu0 %v6463_v21  ;;  %2775 = vmatpush.bf16.msrb.mxu1 %v6467_v23  ;;  %v6091_v21 = vor.u32 %v8065_v63, %v6088_v0  ;;  %v6862_v23 = vld [vmem:[%s9503_s20 + $0x760] sm:$0xf]  ;;  %v2531_v42 = vpop.f32.mrf.mxu3  ;;  %v8195_v63 = vld [vmem:[%s9503_s20 + $0x56c] sm:$0xf]  ;;  %v6487_v20 = vor.u32 %v8179_v12, %v6486_v11  ;;  %v909_v11 = vld [vmem:[#allocation2 + $0x128] sm:$0xff] }
 0x178   : > { %2789 = vmatpush.bf16.msrb.mxu2 %v6471_v24  ;;  %v8274_v24 = vld [vmem:[%s9503_s20 + $0x7dc] sm:$0xf0]  ;;  %v2517_v37 = vpop.f32.mrf.mxu2  ;;  %v2961_v48 = vadd.f32 %v2531_v42, %v905_v32  ;;  %v6616_v0 = vld [vmem:[%s9503_s20 + $0x5e8] sm:$0xf0] }
 0x179   : > { %2803 = vmatpush.bf16.msrb.mxu3 %v6475_v28  ;;  %v904_v28 = vld [vmem:[#allocation2 + $0x100] sm:$0xff]  ;;  %v6360_v32 = vld [vmem:[%s9503_s20 + $0x3e8] sm:$0xf0]  ;;  %v8050_v9 = vld [vmem:[%s9503_s20 + $0xdc] sm:$0xf0] }
 0x17a   : > { %v2960_v41 = vadd.f32 %v2517_v37, %v904_v28  ;;  %3025 = vst [vmem:[#allocation2 + $0xc8] sm:$0xff] %v2961_v48  ;;  %v6358_v28 = vld [vmem:[%s9503_s20 + $0x368] sm:$0xf]  ;;  %v906_v48 = vld [vmem:[#allocation2 + $0x40] sm:$0xff] }
 0x17b   : > { %2762 = vmatpush.bf16.msrb.mxu0 %v6335_v35  ;;  %2776 = vmatpush.bf16.msrb.mxu1 %v6339_v38  ;;  %v8259_v35 = vld [vmem:[%s9503_s20 + $0x76c] sm:$0xf]  ;;  %v5963_v38 = vor.u32 %v8033_v18, %v5960_v22  ;;  %v8146_v22 = vld [vmem:[%s9503_s20 + $0x3dc] sm:$0xf0] }
 0x17c   : > { %2790 = vmatpush.bf16.msrb.mxu2 %v6343_v39  ;;  %v6863_v39 = vor.u32 %v8274_v24, %v6862_v23  ;;  %v6875_v49 = vor.u32 %v8259_v35, %v6872_v36  ;;  %3024 = vst [vmem:[#allocation2 + $0x100] sm:$0xff] %v2960_v41  ;;  %v8130_v23 = vld [vmem:[%s9503_s20 + $0x364] sm:$0xf]  ;;  %v6222_v35 = vld [vmem:[%s9503_s20 + $0x260] sm:$0xf]  ;;  %v877_v36 = vld [vmem:[#allocation2 + $0x48] sm:$0xff] }
 0x17d   : > { %2804 = vmatpush.bf16.msrb.mxu3 %v6347_v45  ;;  %v8242_v45 = vld [vmem:[%s9503_s20 + $0x6dc] sm:$0xf0]  ;;  %v6355_v37 = vor.u32 %v8130_v23, %v6352_v27  ;;  %v6224_v41 = vld [vmem:[%s9503_s20 + $0x2e0] sm:$0xf0] }
 0x17e   : > { %v6735_v53 = vor.u32 %v8242_v45, %v6734_v40  ;;  %v8098_v40 = vld [vmem:[%s9503_s20 + $0x264] sm:$0xf]  ;;  %v8115_v45 = vld [vmem:[%s9503_s20 + $0x2e4] sm:$0xf0] }
 0x17f   : > { %2763 = vmatpush.bf16.msrb.mxu0 %v6207_v52  ;;  %2777 = vmatpush.bf16.msrb.mxu1 %v6211_v56  ;;  %v6744_v52 = vld [vmem:[%s9503_s20 + $0x6e8] sm:$0xf0]  ;;  %v6606_v56 = vld [vmem:[%s9503_s20 + $0x560] sm:$0xf] }
 0x180   : > { %2791 = vmatpush.bf16.msrb.mxu2 %v6215_v57  ;;  %v8210_v57 = vld [vmem:[%s9503_s20 + $0x5dc] sm:$0xf0]  ;;  %v6747_v59 = vor.u32 %v8227_v51, %v6744_v52  ;;  %v907_v51 = vld [vmem:[#allocation2 + $0x1f8] sm:$0xff] }
 0x181   : > { %2805 = vmatpush.bf16.msrb.mxu3 %v6219_v62  ;;  %v8211_v62 = vld [vmem:[%s9503_s20 + $0x5e4] sm:$0xf0]  ;;  %v6607_v1 = vor.u32 %v8210_v57, %v6606_v56  ;;  %v6227_v56 = vor.u32 %v8098_v40, %v6224_v41  ;;  %v8244_v40 = vld [vmem:[%s9503_s20 + $0x6ec] sm:$0xf0]  ;;  %v8228_v41 = vld [vmem:[%s9503_s20 + $0x674] sm:$0xf] }
 0x182   : > { %v6615_v5 = vor.u32 %v8211_v62, %v6614_v61 }
 0x183   : > { %2764 = vmatpush.bf16.msrb.mxu0 %v6079_v10  ;;  %2778 = vmatpush.bf16.msrb.mxu1 %v6083_v15  ;;  %v6619_v10 = vor.u32 %v8195_v63, %v6616_v0  ;;  %v6488_v15 = vld [vmem:[%s9503_s20 + $0x4e8] sm:$0xf0]  ;;  %v6102_v63 = vld [vmem:[%s9503_s20 + $0x168] sm:$0xf] }
 0x184   : > { %2792 = vmatpush.bf16.msrb.mxu2 %v6087_v16  ;;  %v875_v16 = vld [vmem:[#allocation2 + $0x168] sm:$0xff]  ;;  %v6491_v26 = vor.u32 %v8163_v14, %v6488_v15  ;;  %v8083_v0 = vld [vmem:[%s9503_s20 + $0x1e4] sm:$0xf0]  ;;  %v5968_v14 = vld [vmem:[%s9503_s20 + $0xe0] sm:$0xf0] }
 0x185   : > { %2806 = vmatpush.bf16.msrb.mxu3 %v6091_v21  ;;  %v6350_v21 = vld [vmem:[%s9503_s20 + $0x360] sm:$0xf]  ;;  %v5974_v15 = vld [vmem:[%s9503_s20 + $0x68] sm:$0xf] }
 0x187   : > { %2765 = vmatpush.bf16.msrb.mxu0 %v5951_v29  ;;  %2779 = vmatpush.bf16.msrb.mxu1 %v5955_v33  ;;  %v2543_v18 = vpop.f32.mrf.mxu0  ;;  %v2557_v25 = vpop.f32.mrf.mxu1  ;;  %v8147_v29 = vld [vmem:[%s9503_s20 + $0x3e4] sm:$0xf0]  ;;  %v876_v33 = vld [vmem:[#allocation2 + $0x130] sm:$0xff] }
 0x188   : > { %2793 = vmatpush.bf16.msrb.mxu2 %v5959_v34  ;;  %v2930_v24 = vadd.f32 %v2543_v18, %v874_v13  ;;  %v2931_v30 = vadd.f32 %v2557_v25, %v875_v16  ;;  %v6351_v34 = vor.u32 %v8146_v22, %v6350_v21  ;;  %v6103_v13 = vor.u32 %v8083_v0, %v6102_v63  ;;  %v8051_v16 = vld [vmem:[%s9503_s20 + $0xe4] sm:$0xf0]  ;;  %v6878_v21 = vld [vmem:[%s9503_s20 + $0x770] sm:$0xf]  ;;  %v8260_v25 = vld [vmem:[%s9503_s20 + $0x774] sm:$0xf] }
 0x189   : > { %2807 = vmatpush.bf16.msrb.mxu3 %v5963_v38  ;;  %v6359_v38 = vor.u32 %v8147_v29, %v6358_v28  ;;  %v6886_v29 = vld [vmem:[%s9503_s20 + $0x778] sm:$0xf]  ;;  %v8180_v63 = vld [vmem:[%s9503_s20 + $0x4ec] sm:$0xf0]  ;;  %v8164_v0 = vld [vmem:[%s9503_s20 + $0x474] sm:$0xf] }
 0x18a   : > { %2766 = vmatmul.bf16.vlgmr.msrb.gmra.mxu0 %v9965_v6  ;;  %2780 = vmatmul.bf16.vlgmr.msrb.gmra.mxu1 %v9965_v6  ;;  %2994 = vst [vmem:[#allocation2 + $0x50] sm:$0xff] %v2930_v24  ;;  %v8276_v24 = vld [vmem:[%s9503_s20 + $0x7ec] sm:$0xf0] }
 0x18b   : > { %2814 = vmatpush.bf16.msra.mxu0 %v6863_v39  ;;  %2828 = vmatpush.bf16.msra.mxu1 %v6867_v43  ;;  %2995 = vst [vmem:[#allocation2 + $0x168] sm:$0xff] %v2931_v30  ;;  %v8114_v39 = vld [vmem:[%s9503_s20 + $0x2dc] sm:$0xf0]  ;;  %v6363_v43 = vor.u32 %v8131_v31, %v6360_v32  ;;  %v8277_v30 = vld [vmem:[%s9503_s20 + $0x7f4] sm:$0xf0]  ;;  %v5975_v32 = vor.u32 %v8051_v16, %v5974_v15 }
 0x18c   : > { %2842 = vmatpush.bf16.msra.mxu2 %v6871_v44  ;;  %2808 = vmatmul.bf16.vlgmr.msrb.gmra.mxu3 %v9965_v6  ;;  %v6230_v44 = vld [vmem:[%s9503_s20 + $0x268] sm:$0xf]  ;;  %v6223_v52 = vor.u32 %v8114_v39, %v6222_v35  ;;  %v6750_v39 = vld [vmem:[%s9503_s20 + $0x670] sm:$0xf] }
 0x18d   : > { %2856 = vmatpush.bf16.msra.mxu3 %v6875_v49  ;;  %2794 = vmatmul.bf16.vlgmr.msrb.gmra.mxu2 %v9965_v6  ;;  %v8099_v49 = vld [vmem:[%s9503_s20 + $0x26c] sm:$0xf]  ;;  %v6231_v57 = vor.u32 %v8115_v45, %v6230_v44  ;;  %v6758_v44 = vld [vmem:[%s9503_s20 + $0x678] sm:$0xf]  ;;  %v6366_v15 = vld [vmem:[%s9503_s20 + $0x370] sm:$0xf] }
 0x18e   : > { %v6235_v62 = vor.u32 %v8099_v49, %v6232_v50  ;;  %v8245_v45 = vld [vmem:[%s9503_s20 + $0x6f4] sm:$0xf0]  ;;  %v8148_v16 = vld [vmem:[%s9503_s20 + $0x3ec] sm:$0xf0] }
 0x18f   : > { %2815 = vmatpush.bf16.msra.mxu0 %v6735_v53  ;;  %2829 = vmatpush.bf16.msra.mxu1 %v6739_v54  ;;  %v2585_v47 = vpop.f32.mrf.mxu3  ;;  %v6094_v53 = vld [vmem:[%s9503_s20 + $0x160] sm:$0xf]  ;;  %v2559_v61 = vpop.f32.mrf.mxu1  ;;  %v6759_v50 = vor.u32 %v8245_v45, %v6758_v44  ;;  %v6248_v44 = vld [vmem:[%s9503_s20 + $0x2f8] sm:$0xf0] }
 0x190   : > { %2843 = vmatpush.bf16.msra.mxu2 %v6743_v55  ;;  %v2571_v42 = vpop.f32.mrf.mxu2  ;;  %v2933_v4 = vadd.f32 %v2585_v47, %v877_v36  ;;  %v8082_v54 = vld [vmem:[%s9503_s20 + $0x1dc] sm:$0xf0]  ;;  %v2545_v55 = vpop.f32.mrf.mxu0  ;;  %v2963_v2 = vadd.f32 %v2559_v61, %v907_v51  ;;  %v6879_v36 = vor.u32 %v8276_v24, %v6878_v21  ;;  %v6760_v47 = vld [vmem:[%s9503_s20 + $0x6f8] sm:$0xf0]  ;;  %v8212_v51 = vld [vmem:[%s9503_s20 + $0x5ec] sm:$0xf0] }
 0x191   : > { %2857 = vmatpush.bf16.msra.mxu3 %v6747_v59  ;;  %v2932_v46 = vadd.f32 %v2571_v42, %v876_v33  ;;  %v6096_v59 = vld [vmem:[%s9503_s20 + $0x1e0] sm:$0xf0]  ;;  %v2962_v60 = vadd.f32 %v2545_v55, %v906_v48  ;;  %v6095_v8 = vor.u32 %v8082_v54, %v6094_v53  ;;  %v8261_v33 = vld [vmem:[%s9503_s20 + $0x77c] sm:$0xf]  ;;  %v6751_v48 = vor.u32 %v8244_v40, %v6750_v39  ;;  %v6624_v54 = vld [vmem:[%s9503_s20 + $0x5f0] sm:$0xf0] }
 0x192   : > { %2997 = vst [vmem:[#allocation2 + $0x48] sm:$0xff] %v2933_v4  ;;  %v6099_v12 = vor.u32 %v8066_v58, %v6096_v59  ;;  %v6622_v4 = vld [vmem:[%s9503_s20 + $0x570] sm:$0xf]  ;;  %v6630_v55 = vld [vmem:[%s9503_s20 + $0x578] sm:$0xf] }
 0x193   : > { %2816 = vmatpush.bf16.msra.mxu0 %v6607_v1  ;;  %2830 = vmatpush.bf16.msra.mxu1 %v6611_v3  ;;  %2996 = vst [vmem:[#allocation2 + $0x130] sm:$0xff] %v2932_v46  ;;  %v8067_v1 = vld [vmem:[%s9503_s20 + $0x16c] sm:$0xf]  ;;  %v8229_v46 = vld [vmem:[%s9503_s20 + $0x67c] sm:$0xf]  ;;  %v6623_v59 = vor.u32 %v8212_v51, %v6622_v4 }
 0x194   : > { %2844 = vmatpush.bf16.msra.mxu2 %v6615_v5  ;;  %v6104_v3 = vld [vmem:[%s9503_s20 + $0x1e8] sm:$0xf0]  ;;  %v5966_v5 = vld [vmem:[%s9503_s20 + $0x60] sm:$0xf]  ;;  %3026 = vst [vmem:[#allocation2 + $0x40] sm:$0xff] %v2962_v60  ;;  %v6763_v53 = vor.u32 %v8229_v46, %v6760_v47 }
 0x195   : > { %2858 = vmatpush.bf16.msra.mxu3 %v6619_v10  ;;  %v8034_v10 = vld [vmem:[%s9503_s20 + $0x64] sm:$0xf]  ;;  %3027 = vst [vmem:[#allocation2 + $0x1f8] sm:$0xff] %v2963_v2  ;;  %v6107_v18 = vor.u32 %v8067_v1, %v6104_v3  ;;  %v5967_v28 = vor.u32 %v8050_v9, %v5966_v5  ;;  %v6632_v58 = vld [vmem:[%s9503_s20 + $0x5f8] sm:$0xf0] }
 0x196   : > { %v5971_v31 = vor.u32 %v8034_v10, %v5968_v14  ;;  %v6494_v60 = vld [vmem:[%s9503_s20 + $0x470] sm:$0xf]  ;;  %v6496_v1 = vld [vmem:[%s9503_s20 + $0x4f0] sm:$0xf0]  ;;  %v6502_v3 = vld [vmem:[%s9503_s20 + $0x478] sm:$0xf] }
 0x197   : > { %2817 = vmatpush.bf16.msra.mxu0 %v6479_v17  ;;  %2831 = vmatpush.bf16.msra.mxu1 %v6483_v19  ;;  %v8035_v19 = vld [vmem:[%s9503_s20 + $0x6c] sm:$0xf]  ;;  %v2587_v23 = vpop.f32.mrf.mxu3  ;;  %v8181_v5 = vld [vmem:[%s9503_s20 + $0x4f4] sm:$0xf0]  ;;  %v6504_v9 = vld [vmem:[%s9503_s20 + $0x4f8] sm:$0xf0] }
 0x198   : > { %2845 = vmatpush.bf16.msra.mxu2 %v6487_v20  ;;  %v2573_v17 = vpop.f32.mrf.mxu2  ;;  %v5976_v20 = vld [vmem:[%s9503_s20 + $0xe8] sm:$0xf0]  ;;  %v2965_v27 = vadd.f32 %v2587_v23, %v909_v11  ;;  %v879_v10 = vld [vmem:[#allocation2 + $0x110] sm:$0xff]  ;;  %v6495_v11 = vor.u32 %v8180_v63, %v6494_v60  ;;  %v6503_v14 = vor.u32 %v8181_v5, %v6502_v3  ;;  %v6368_v21 = vld [vmem:[%s9503_s20 + $0x3f0] sm:$0xf0] }
 0x199   : > { %2859 = vmatpush.bf16.msra.mxu3 %v6491_v26  ;;  %v2964_v22 = vadd.f32 %v2573_v17, %v908_v7  ;;  %v6880_v26 = vld [vmem:[%s9503_s20 + $0x7f0] sm:$0xf0]  ;;  %v5979_v35 = vor.u32 %v8035_v19, %v5976_v20  ;;  %v8149_v23 = vld [vmem:[%s9503_s20 + $0x3f4] sm:$0xf0]  ;;  %v911_v46 = vld [vmem:[#allocation2 + $0x1f0] sm:$0xff] }
 0x19a   : > { %3029 = vst [vmem:[#allocation2 + $0x128] sm:$0xff] %v2965_v27  ;;  %v878_v7 = vld [vmem:[#allocation2 + $0x180] sm:$0xff]  ;;  %v880_v27 = vld [vmem:[#allocation2 + $0x118] sm:$0xff]  ;;  %v8117_v39 = vld [vmem:[%s9503_s20 + $0x2f4] sm:$0xf0] }
 0x19b   : > { %2818 = vmatpush.bf16.msra.mxu0 %v6351_v34  ;;  %2832 = vmatpush.bf16.msra.mxu1 %v6355_v37  ;;  %3028 = vst [vmem:[#allocation2 + $0x20] sm:$0xff] %v2964_v22  ;;  %v6888_v34 = vld [vmem:[%s9503_s20 + $0x7f8] sm:$0xf0]  ;;  %v6883_v37 = vor.u32 %v8260_v25, %v6880_v26  ;;  %v8132_v17 = vld [vmem:[%s9503_s20 + $0x374] sm:$0xf] }
 0x19c   : > { %2846 = vmatpush.bf16.msra.mxu2 %v6359_v38  ;;  %v6887_v38 = vor.u32 %v8277_v30, %v6886_v29  ;;  %v6891_v42 = vor.u32 %v8261_v33, %v6888_v34  ;;  %v6374_v22 = vld [vmem:[%s9503_s20 + $0x378] sm:$0xf]  ;;  %v8133_v25 = vld [vmem:[%s9503_s20 + $0x37c] sm:$0xf]  ;;  %v6238_v29 = vld [vmem:[%s9503_s20 + $0x270] sm:$0xf] }
 0x19d   : > { %2860 = vmatpush.bf16.msra.mxu3 %v6363_v43  ;;  %v6752_v43 = vld [vmem:[%s9503_s20 + $0x6f0] sm:$0xf0]  ;;  %v6376_v26 = vld [vmem:[%s9503_s20 + $0x3f8] sm:$0xf0]  ;;  %v881_v30 = vld [vmem:[#allocation2 + $0x98] sm:$0xff] }
 0x19e   : > { %v6755_v49 = vor.u32 %v8228_v41, %v6752_v43  ;;  %v8116_v33 = vld [vmem:[%s9503_s20 + $0x2ec] sm:$0xf0]  ;;  %v8100_v34 = vld [vmem:[%s9503_s20 + $0x274] sm:$0xf]  ;;  %v8101_v43 = vld [vmem:[%s9503_s20 + $0x27c] sm:$0xf] }
 0x19f   : > { %2819 = vmatpush.bf16.msra.mxu0 %v6223_v52  ;;  %2833 = vmatpush.bf16.msra.mxu1 %v6227_v56  ;;  %v8196_v52 = vld [vmem:[%s9503_s20 + $0x574] sm:$0xf]  ;;  %v8213_v56 = vld [vmem:[%s9503_s20 + $0x5f4] sm:$0xf0]  ;;  %v6239_v47 = vor.u32 %v8116_v33, %v6238_v29  ;;  %v8084_v51 = vld [vmem:[%s9503_s20 + $0x1ec] sm:$0xf0] }
 0x1a0   : > { %2847 = vmatpush.bf16.msra.mxu2 %v6231_v57  ;;  %v8197_v57 = vld [vmem:[%s9503_s20 + $0x57c] sm:$0xf]  ;;  %v6627_v61 = vor.u32 %v8196_v52, %v6624_v54  ;;  %v8068_v52 = vld [vmem:[%s9503_s20 + $0x174] sm:$0xf]  ;;  %v5982_v3 = vld [vmem:[%s9503_s20 + $0x70] sm:$0xf] }
 0x1a1   : > { %2861 = vmatpush.bf16.msra.mxu3 %v6235_v62  ;;  %v6631_v62 = vor.u32 %v8213_v56, %v6630_v55  ;;  %v6635_v2 = vor.u32 %v8197_v57, %v6632_v58  ;;  %v6251_v55 = vor.u32 %v8101_v43, %v6248_v44  ;;  %v6112_v56 = vld [vmem:[%s9503_s20 + $0x1f0] sm:$0xf0]  ;;  %v6118_v57 = vld [vmem:[%s9503_s20 + $0x178] sm:$0xf]  ;;  %v8069_v60 = vld [vmem:[%s9503_s20 + $0x17c] sm:$0xf] }
 0x1a2   : > { %v8085_v58 = vld [vmem:[%s9503_s20 + $0x1f4] sm:$0xf0]  ;;  %v8052_v5 = vld [vmem:[%s9503_s20 + $0xec] sm:$0xf0]  ;;  %v914_v33 = vld [vmem:[#allocation2 + $0x70] sm:$0xff] }
 0x1a3   : > { %2820 = vmatpush.bf16.msra.mxu0 %v6095_v8  ;;  %2834 = vmatpush.bf16.msra.mxu1 %v6099_v12  ;;  %v8165_v8 = vld [vmem:[%s9503_s20 + $0x47c] sm:$0xf]  ;;  %v885_v29 = vld [vmem:[#allocation2 + $0x60] sm:$0xff] }
 0x1a4   : > { %2848 = vmatpush.bf16.msra.mxu2 %v6103_v13  ;;  %v6499_v13 = vor.u32 %v8164_v0, %v6496_v1  ;;  %v6507_v20 = vor.u32 %v8165_v8, %v6504_v9  ;;  %v913_v0 = vld [vmem:[#allocation2 + $0x78] sm:$0xff]  ;;  %v6115_v1 = vor.u32 %v8068_v52, %v6112_v56 }
 0x1a5   : > { %2862 = vmatpush.bf16.msra.mxu3 %v6107_v18 }
 0x1a7   : > { %2821 = vmatpush.bf16.msra.mxu0 %v5967_v28  ;;  %2835 = vmatpush.bf16.msra.mxu1 %v5971_v31  ;;  %v2599_v12 = vpop.f32.mrf.mxu0  ;;  %v2613_v19 = vpop.f32.mrf.mxu1  ;;  %v6367_v28 = vor.u32 %v8148_v16, %v6366_v15  ;;  %v6371_v31 = vor.u32 %v8132_v17, %v6368_v21  ;;  %v8037_v15 = vld [vmem:[%s9503_s20 + $0x7c] sm:$0xf] }
 0x1a8   : > { %2849 = vmatpush.bf16.msra.mxu2 %v5975_v32  ;;  %v2934_v18 = vadd.f32 %v2599_v12, %v878_v7  ;;  %v2935_v24 = vadd.f32 %v2613_v19, %v879_v10  ;;  %v6375_v32 = vor.u32 %v8149_v23, %v6374_v22  ;;  %v8036_v7 = vld [vmem:[%s9503_s20 + $0x74] sm:$0xf]  ;;  %v8053_v12 = vld [vmem:[%s9503_s20 + $0xf4] sm:$0xf0]  ;;  %v5992_v16 = vld [vmem:[%s9503_s20 + $0xf8] sm:$0xf0] }
 0x1a9   : > { %2863 = vmatpush.bf16.msra.mxu3 %v5979_v35  ;;  %v6240_v35 = vld [vmem:[%s9503_s20 + $0x2f0] sm:$0xf0]  ;;  %v5995_v21 = vor.u32 %v8037_v15, %v5992_v16  ;;  %v883_v23 = vld [vmem:[#allocation2 + $0x150] sm:$0xff] }
 0x1aa   : > { %2822 = vmatmul.bf16.vlgmr.msra.gmra.mxu0 %v9965_v6  ;;  %2836 = vmatmul.bf16.vlgmr.msra.gmra.mxu1 %v9965_v6  ;;  %2998 = vst [vmem:[#allocation2 + $0x180] sm:$0xff] %v2934_v18  ;;  %v5984_v10 = vld [vmem:[%s9503_s20 + $0xf0] sm:$0xf0]  ;;  %v5983_v18 = vor.u32 %v8052_v5, %v5982_v3 }
 0x1ab   : > { %2870 = vmatpush.bf16.msrb.mxu0 %v6879_v36  ;;  %2884 = vmatpush.bf16.msrb.mxu1 %v6883_v37  ;;  %2999 = vst [vmem:[#allocation2 + $0x110] sm:$0xff] %v2935_v24  ;;  %v6379_v37 = vor.u32 %v8133_v25, %v6376_v26  ;;  %v5987_v19 = vor.u32 %v8036_v7, %v5984_v10  ;;  %v882_v22 = vld [vmem:[#allocation2 + $0x120] sm:$0xff]  ;;  %v891_v7 = vld [vmem:[#allocation2 + $0x1a8] sm:$0xff] }
 0x1ac   : > { %2898 = vmatpush.bf16.msrb.mxu2 %v6887_v38  ;;  %2864 = vmatmul.bf16.vlgmr.msra.gmra.mxu3 %v9965_v6  ;;  %v6246_v38 = vld [vmem:[%s9503_s20 + $0x278] sm:$0xf]  ;;  %v890_v5 = vld [vmem:[#allocation2 + $0x80] sm:$0xff] }
 0x1ad   : > { %2912 = vmatpush.bf16.msrb.mxu3 %v6891_v42  ;;  %2850 = vmatmul.bf16.vlgmr.msra.gmra.mxu2 %v9965_v6  ;;  %v910_v42 = vld [vmem:[#allocation2 + $0x1a0] sm:$0xff]  ;;  %v6247_v4 = vor.u32 %v8117_v39, %v6246_v38  ;;  %v916_v39 = vld [vmem:[#allocation2 + $0x1d8] sm:$0xff] }
 0x1af   : > { %2871 = vmatpush.bf16.msrb.mxu0 %v6751_v48  ;;  %2885 = vmatpush.bf16.msrb.mxu1 %v6755_v49  ;;  %v2641_v41 = vpop.f32.mrf.mxu3  ;;  %v6110_v48 = vld [vmem:[%s9503_s20 + $0x170] sm:$0xf]  ;;  %v2601_v49 = vpop.f32.mrf.mxu0 }
 0x1b0   : > { %2899 = vmatpush.bf16.msrb.mxu2 %v6759_v50  ;;  %v2627_v36 = vpop.f32.mrf.mxu2  ;;  %v2937_v45 = vadd.f32 %v2641_v41, %v881_v30  ;;  %v6243_v50 = vor.u32 %v8100_v34, %v6240_v35  ;;  %v2615_v54 = vpop.f32.mrf.mxu1  ;;  %v6111_v63 = vor.u32 %v8084_v51, %v6110_v48  ;;  %v915_v35 = vld [vmem:[#allocation2 + $0x90] sm:$0xff]  ;;  %v889_v51 = vld [vmem:[#allocation2 + $0x140] sm:$0xff] }
 0x1b1   : > { %2913 = vmatpush.bf16.msrb.mxu3 %v6763_v53  ;;  %v2936_v40 = vadd.f32 %v2627_v36, %v880_v27  ;;  %v2966_v53 = vadd.f32 %v2601_v49, %v910_v42 }
 0x1b2   : > { %3001 = vst [vmem:[#allocation2 + $0x98] sm:$0xff] %v2937_v45  ;;  %v886_v45 = vld [vmem:[#allocation2 + $0xe0] sm:$0xff] }
 0x1b3   : > { %2872 = vmatpush.bf16.msrb.mxu0 %v6623_v59  ;;  %2886 = vmatpush.bf16.msrb.mxu1 %v6627_v61  ;;  %3000 = vst [vmem:[#allocation2 + $0x118] sm:$0xff] %v2936_v40  ;;  %v2967_v59 = vadd.f32 %v2615_v54, %v911_v46  ;;  %v6120_v61 = vld [vmem:[%s9503_s20 + $0x1f8] sm:$0xf0]  ;;  %v917_v40 = vld [vmem:[#allocation2 + $0xd0] sm:$0xff] }
 0x1b4   : > { %2900 = vmatpush.bf16.msrb.mxu2 %v6631_v62  ;;  %3030 = vst [vmem:[#allocation2 + $0x1a0] sm:$0xff] %v2966_v53  ;;  %v912_v62 = vld [vmem:[#allocation2 + $0xe8] sm:$0xff]  ;;  %v6123_v9 = vor.u32 %v8069_v60, %v6120_v61 }
 0x1b5   : > { %2914 = vmatpush.bf16.msrb.mxu3 %v6635_v2  ;;  %3031 = vst [vmem:[#allocation2 + $0x1f0] sm:$0xff] %v2967_v59  ;;  %v6119_v2 = vor.u32 %v8085_v58, %v6118_v57  ;;  %v887_v46 = vld [vmem:[#allocation2 + $0x188] sm:$0xff] }
 0x1b6   : > { %v919_v57 = vld [vmem:[#allocation2 + $0x88] sm:$0xff] }
 0x1b7   : > { %2873 = vmatpush.bf16.msrb.mxu0 %v6495_v11  ;;  %2887 = vmatpush.bf16.msrb.mxu1 %v6499_v13  ;;  %v5990_v11 = vld [vmem:[%s9503_s20 + $0x78] sm:$0xf] }
 0x1b8   : > { %2901 = vmatpush.bf16.msrb.mxu2 %v6503_v14  ;;  %v2629_v8 = vpop.f32.mrf.mxu2  ;;  %v2643_v14 = vpop.f32.mrf.mxu3 }
 0x1b9   : > { %2915 = vmatpush.bf16.msrb.mxu3 %v6507_v20  ;;  %v2968_v13 = vadd.f32 %v2629_v8, %v912_v62  ;;  %v2969_v17 = vadd.f32 %v2643_v14, %v913_v0  ;;  %v5991_v20 = vor.u32 %v8053_v12, %v5990_v11  ;;  %v920_v62 = vld [vmem:[#allocation2 + $0xa8] sm:$0xff]  ;;  %v892_v12 = vld [vmem:[#allocation2 + $0x1b8] sm:$0xff] }
 0x1bb   : > { %2874 = vmatpush.bf16.msrb.mxu0 %v6367_v28  ;;  %2888 = vmatpush.bf16.msrb.mxu1 %v6371_v31  ;;  %3032 = vst [vmem:[#allocation2 + $0xe8] sm:$0xff] %v2968_v13  ;;  %v884_v28 = vld [vmem:[#allocation2 + $0x108] sm:$0xff] }
 0x1bc   : > { %2902 = vmatpush.bf16.msrb.mxu2 %v6375_v32  ;;  %3033 = vst [vmem:[#allocation2 + $0x78] sm:$0xff] %v2969_v17  ;;  %v893_v13 = vld [vmem:[#allocation2 + $0x28] sm:$0xff]  ;;  %v922_v17 = vld [vmem:[#allocation2 + $0x170] sm:$0xff] }
 0x1bd   : > { %2916 = vmatpush.bf16.msrb.mxu3 %v6379_v37 }
 0x1bf   : > { %2875 = vmatpush.bf16.msrb.mxu0 %v6239_v47  ;;  %2889 = vmatpush.bf16.msrb.mxu1 %v6243_v50 }
 0x1c0   : > { %2903 = vmatpush.bf16.msrb.mxu2 %v6247_v4  ;;  %v888_v4 = vld [vmem:[#allocation2 + $0x138] sm:$0xff] }
 0x1c1   : > { %2917 = vmatpush.bf16.msrb.mxu3 %v6251_v55  ;;  %v918_v55 = vld [vmem:[#allocation2 + $0xb8] sm:$0xff] }
 0x1c3   : > { %2876 = vmatpush.bf16.msrb.mxu0 %v6111_v63  ;;  %2890 = vmatpush.bf16.msrb.mxu1 %v6115_v1  ;;  %v921_v63 = vld [vmem:[#allocation2 + $0x1c8] sm:$0xff] }
 0x1c4   : > { %2904 = vmatpush.bf16.msrb.mxu2 %v6119_v2 }
 0x1c5   : > { %2918 = vmatpush.bf16.msrb.mxu3 %v6123_v9 }
 0x1c7   : > { %2877 = vmatpush.bf16.msrb.mxu0 %v5983_v18  ;;  %2891 = vmatpush.bf16.msrb.mxu1 %v5987_v19  ;;  %v2655_v24 = vpop.f32.mrf.mxu0  ;;  %v2669_v26 = vpop.f32.mrf.mxu1  ;;  %v923_v19 = vld [vmem:[#allocation2 + $0x178] sm:$0xff] }
 0x1c8   : > { %2905 = vmatpush.bf16.msrb.mxu2 %v5991_v20  ;;  %v2938_v25 = vadd.f32 %v2655_v24, %v882_v22  ;;  %v2939_v27 = vadd.f32 %v2669_v26, %v883_v23  ;;  %v924_v24 = vld [vmem:[#allocation2 + $0x68] sm:$0xff] }
 0x1c9   : > { %2919 = vmatpush.bf16.msrb.mxu3 %v5995_v21 }
 0x1ca   : > { %2878 = vmatmul.bf16.vlgmr.msrb.gmra.mxu0 %v9965_v6  ;;  %2892 = vmatmul.bf16.vlgmr.msrb.gmra.mxu1 %v9965_v6  ;;  %3002 = vst [vmem:[#allocation2 + $0x120] sm:$0xff] %v2938_v25  ;;  %v925_v25 = vld [vmem:[#allocation2 + $0x190] sm:$0xff] }
 0x1cb   : > { %2906 = vmatmul.bf16.vlgmr.msrb.gmra.mxu2 %v9965_v6  ;;  %3003 = vst [vmem:[#allocation2 + $0x150] sm:$0xff] %v2939_v27 }
 0x1cc   : > { %2920 = vmatmul.bf16.vlgmr.msrb.gmra.mxu3 %v9965_v6 }
 0x1cf   : > { %v2697_v32 = vpop.f32.mrf.mxu3  ;;  %v2657_v36 = vpop.f32.mrf.mxu0 }
 0x1d0   : > { %v2683_v30 = vpop.f32.mrf.mxu2  ;;  %v2941_v34 = vadd.f32 %v2697_v32, %v885_v29  ;;  %v2970_v6 = vadd.f32 %v2657_v36, %v914_v33  ;;  %v2671_v37 = vpop.f32.mrf.mxu1  ;;  %v896_v36 = vld [vmem:[#allocation2 + $0x160] sm:$0xff] }
 0x1d1   : > { %v2940_v31 = vadd.f32 %v2683_v30, %v884_v28  ;;  %v2971_v38 = vadd.f32 %v2671_v37, %v915_v35  ;;  %v894_v30 = vld [vmem:[#allocation2 + $0x1e8] sm:$0xff] }
 0x1d2   : > { %3005 = vst [vmem:[#allocation2 + $0x60] sm:$0xff] %v2941_v34 }
 0x1d3   : > { %3004 = vst [vmem:[#allocation2 + $0x108] sm:$0xff] %v2940_v31  ;;  %v895_v31 = vld [vmem:[#allocation2 + $0xf8] sm:$0xff] }
 0x1d4   : > { %3034 = vst [vmem:[#allocation2 + $0x70] sm:$0xff] %v2970_v6  ;;  %v897_v6 = vld [vmem:[#allocation2 + $0x30] sm:$0xff] }
 0x1d5   : > { %3035 = vst [vmem:[#allocation2 + $0x90] sm:$0xff] %v2971_v38 }
 0x1d7   : > { %v2699_v43 = vpop.f32.mrf.mxu3 }
 0x1d8   : > { %v2685_v41 = vpop.f32.mrf.mxu2  ;;  %v2973_v44 = vadd.f32 %v2699_v43, %v917_v40  ;;  %v926_v40 = vld [vmem:[#allocation2 + $0x198] sm:$0xff] }
 0x1d9   : > { %v2972_v42 = vadd.f32 %v2685_v41, %v916_v39 }
 0x1da   : > { %3037 = vst [vmem:[#allocation2 + $0xd0] sm:$0xff] %v2973_v44 }
 0x1db   : > { %3036 = vst [vmem:[#allocation2 + $0x1d8] sm:$0xff] %v2972_v42  ;;  %v927_v42 = vld [vmem:[#allocation2 + $0x38] sm:$0xff] }
 0x1e7   : > { %v2711_v47 = vpop.f32.mrf.mxu0  ;;  %v2725_v49 = vpop.f32.mrf.mxu1 }
 0x1e8   : > { %v2942_v48 = vadd.f32 %v2711_v47, %v886_v45  ;;  %v2943_v50 = vadd.f32 %v2725_v49, %v887_v46  ;;  %v928_v47 = vld [vmem:[#allocation2 + $0xc0] sm:$0xff] }
 0x1ea   : > { %3006 = vst [vmem:[#allocation2 + $0xe0] sm:$0xff] %v2942_v48  ;;  %v929_v48 = vld [vmem:[#allocation2 + $0x1c0] sm:$0xff] }
 0x1eb   : > { %3007 = vst [vmem:[#allocation2 + $0x188] sm:$0xff] %v2943_v50 }
 0x1ef   : > { %v2753_v54 = vpop.f32.mrf.mxu3  ;;  %v2713_v58 = vpop.f32.mrf.mxu0 }
 0x1f0   : > { %v2739_v52 = vpop.f32.mrf.mxu2  ;;  %v2945_v56 = vadd.f32 %v2753_v54, %v889_v51  ;;  %v2974_v59 = vadd.f32 %v2713_v58, %v918_v55  ;;  %v2727_v60 = vpop.f32.mrf.mxu1  ;;  %v900_v58 = vld [vmem:[#allocation2 + $0xf0] sm:$0xff] }
 0x1f1   : > { %v2944_v53 = vadd.f32 %v2739_v52, %v888_v4  ;;  %v2975_v61 = vadd.f32 %v2727_v60, %v919_v57  ;;  %v898_v52 = vld [vmem:[#allocation2 + $0x1e0] sm:$0xff]  ;;  %v930_v60 = vld [vmem:[#allocation2 + $0x158] sm:$0xff] }
 0x1f2   : > { %3009 = vst [vmem:[#allocation2 + $0x140] sm:$0xff] %v2945_v56 }
 0x1f3   : > { %3008 = vst [vmem:[#allocation2 + $0x138] sm:$0xff] %v2944_v53  ;;  %v899_v53 = vld [vmem:[#allocation2] sm:$0xff] }
 0x1f4   : > { %3038 = vst [vmem:[#allocation2 + $0xb8] sm:$0xff] %v2974_v59  ;;  %v901_v59 = vld [vmem:[#allocation2 + $0x8] sm:$0xff] }
 0x1f5   : > { %3039 = vst [vmem:[#allocation2 + $0x88] sm:$0xff] %v2975_v61 }
 0x1f7   : > { %v2755_v2 = vpop.f32.mrf.mxu3 }
 0x1f8   : > { %v2741_v0 = vpop.f32.mrf.mxu2  ;;  %v2977_v3 = vadd.f32 %v2755_v2, %v921_v63 }
 0x1f9   : > { %v2976_v1 = vadd.f32 %v2741_v0, %v920_v62  ;;  %v931_v62 = vld [vmem:[#allocation2 + $0x10] sm:$0xff] }
 0x1fa   : > { %3041 = vst [vmem:[#allocation2 + $0x1c8] sm:$0xff] %v2977_v3 }
 0x1fb   : > { %3040 = vst [vmem:[#allocation2 + $0xa8] sm:$0xff] %v2976_v1 }
 0x207   : > { %v2767_v8 = vpop.f32.mrf.mxu0  ;;  %v2781_v10 = vpop.f32.mrf.mxu1 }
 0x208   : > { %v2946_v9 = vadd.f32 %v2767_v8, %v890_v5  ;;  %v2947_v11 = vadd.f32 %v2781_v10, %v891_v7  ;;  %v932_v8 = vld [vmem:[#allocation2 + $0x58] sm:$0xff] }
 0x20a   : > { %3010 = vst [vmem:[#allocation2 + $0x80] sm:$0xff] %v2946_v9  ;;  %v933_v9 = vld [vmem:[#allocation2 + $0xa0] sm:$0xff] }
 0x20b   : > { %3011 = vst [vmem:[#allocation2 + $0x1a8] sm:$0xff] %v2947_v11 }
 0x20f   : > { %v2809_v16 = vpop.f32.mrf.mxu3  ;;  %v2769_v20 = vpop.f32.mrf.mxu0 }
 0x210   : > { %v2795_v14 = vpop.f32.mrf.mxu2  ;;  %v2949_v18 = vadd.f32 %v2809_v16, %v893_v13  ;;  %v2978_v21 = vadd.f32 %v2769_v20, %v922_v17  ;;  %v2783_v22 = vpop.f32.mrf.mxu1 }
 0x211   : > { %v2948_v15 = vadd.f32 %v2795_v14, %v892_v12  ;;  %v2979_v23 = vadd.f32 %v2783_v22, %v923_v19 }
 0x212   : > { %3013 = vst [vmem:[#allocation2 + $0x28] sm:$0xff] %v2949_v18 }
 0x213   : > { %3012 = vst [vmem:[#allocation2 + $0x1b8] sm:$0xff] %v2948_v15 }
 0x214   : > { %3042 = vst [vmem:[#allocation2 + $0x170] sm:$0xff] %v2978_v21 }
 0x215   : > { %3043 = vst [vmem:[#allocation2 + $0x178] sm:$0xff] %v2979_v23 }
 0x217   : > { %v2811_v28 = vpop.f32.mrf.mxu3 }
 0x218   : > { %v2797_v26 = vpop.f32.mrf.mxu2  ;;  %v2981_v29 = vadd.f32 %v2811_v28, %v925_v25 }
 0x219   : > { %v2980_v27 = vadd.f32 %v2797_v26, %v924_v24 }
 0x21a   : > { %3045 = vst [vmem:[#allocation2 + $0x190] sm:$0xff] %v2981_v29 }
 0x21b   : > { %3044 = vst [vmem:[#allocation2 + $0x68] sm:$0xff] %v2980_v27 }
 0x227   : > { %v2823_v32 = vpop.f32.mrf.mxu0  ;;  %v2837_v34 = vpop.f32.mrf.mxu1 }
 0x228   : > { %v2950_v33 = vadd.f32 %v2823_v32, %v894_v30  ;;  %v2951_v35 = vadd.f32 %v2837_v34, %v895_v31 }
 0x22a   : > { %3014 = vst [vmem:[#allocation2 + $0x1e8] sm:$0xff] %v2950_v33 }
 0x22b   : > { %3015 = vst [vmem:[#allocation2 + $0xf8] sm:$0xff] %v2951_v35 }
 0x22f   : > { %v2865_v39 = vpop.f32.mrf.mxu3  ;;  %v2825_v43 = vpop.f32.mrf.mxu0 }
 0x230   : > { %v2851_v37 = vpop.f32.mrf.mxu2  ;;  %v2953_v41 = vadd.f32 %v2865_v39, %v897_v6  ;;  %v2982_v44 = vadd.f32 %v2825_v43, %v926_v40  ;;  %v2839_v45 = vpop.f32.mrf.mxu1 }
 0x231   : > { %v2952_v38 = vadd.f32 %v2851_v37, %v896_v36  ;;  %v2983_v46 = vadd.f32 %v2839_v45, %v927_v42 }
 0x232   : > { %3017 = vst [vmem:[#allocation2 + $0x30] sm:$0xff] %v2953_v41 }
 0x233   : > { %3016 = vst [vmem:[#allocation2 + $0x160] sm:$0xff] %v2952_v38 }
 0x234   : > { %3046 = vst [vmem:[#allocation2 + $0x198] sm:$0xff] %v2982_v44 }
 0x235   : > { %3047 = vst [vmem:[#allocation2 + $0x38] sm:$0xff] %v2983_v46 }
 0x237   : > { %v2867_v4 = vpop.f32.mrf.mxu3 }
 0x238   : > { %v2853_v49 = vpop.f32.mrf.mxu2  ;;  %v2985_v51 = vadd.f32 %v2867_v4, %v929_v48 }
 0x239   : > { %v2984_v50 = vadd.f32 %v2853_v49, %v928_v47 }
 0x23a   : > { %3049 = vst [vmem:[#allocation2 + $0x1c0] sm:$0xff] %v2985_v51 }
 0x23b   : > { %3048 = vst [vmem:[#allocation2 + $0xc0] sm:$0xff] %v2984_v50 }
 0x247   : > { %v2879_v54 = vpop.f32.mrf.mxu0  ;;  %v2893_v56 = vpop.f32.mrf.mxu1 }
 0x248   : > { %v2954_v55 = vadd.f32 %v2879_v54, %v898_v52  ;;  %v2955_v57 = vadd.f32 %v2893_v56, %v899_v53 }
 0x24a   : > { %3018 = vst [vmem:[#allocation2 + $0x1e0] sm:$0xff] %v2954_v55 }
 0x24b   : > { %3019 = vst [vmem:[#allocation2] sm:$0xff] %v2955_v57 }
 0x24e   : > { %v2907_v61 = vpop.f32.mrf.mxu2 }
 0x24f   : > { %v2956_v63 = vadd.f32 %v2907_v61, %v900_v58  ;;  %v2921_v0 = vpop.f32.mrf.mxu3  ;;  %v2881_v1 = vpop.f32.mrf.mxu0 }
 0x250   : > { %v2957_v2 = vadd.f32 %v2921_v0, %v901_v59  ;;  %v2986_v3 = vadd.f32 %v2881_v1, %v930_v60  ;;  %v2895_v5 = vpop.f32.mrf.mxu1 }
 0x251   : > { %3020 = vst [vmem:[#allocation2 + $0xf0] sm:$0xff] %v2956_v63  ;;  %v2987_v7 = vadd.f32 %v2895_v5, %v931_v62 }
 0x252   : > { %3021 = vst [vmem:[#allocation2 + $0x8] sm:$0xff] %v2957_v2 }
 0x253   : > { %3050 = vst [vmem:[#allocation2 + $0x158] sm:$0xff] %v2986_v3 }
 0x254   : > { %3051 = vst [vmem:[#allocation2 + $0x10] sm:$0xff] %v2987_v7 }
 0x256   : > { %v2909_v10 = vpop.f32.mrf.mxu2  ;;  %3057 = sbr.rel (%p6892_p4) target bundleno = 1720 (0x6b8), region = 189 }
 0x257   : > { %v2988_v11 = vadd.f32 %v2909_v10, %v932_v8  ;;  %v2923_v12 = vpop.f32.mrf.mxu3 }
 0x258   : > { %v2989_v13 = vadd.f32 %v2923_v12, %v933_v9 }
 0x259   : > { %3052 = vst [vmem:[#allocation2 + $0x58] sm:$0xff] %v2988_v11 }
 0x25a   : > { %3053 = vst [vmem:[#allocation2 + $0xa0] sm:$0xff] %v2989_v13 }
 0x25b   : > { %v7007_v14 = vld [vmem:[#allocation8 + $0xe0] sm:$0xf]  ;;  %v8308_v15 = vld [vmem:[#allocation8 + $0xec] sm:$0xf0] }
 0x25c   : > { %v7135_v16 = vld [vmem:[#allocation8 + $0x1e0] sm:$0xf]  ;;  %v7008_v17 = vor.u32 %v8308_v15, %v7007_v14  ;;  %v8340_v18 = vld [vmem:[#allocation8 + $0x1ec] sm:$0xf0] }
 0x25d   : > { %v7263_v19 = vld [vmem:[#allocation8 + $0x2e0] sm:$0xf]  ;;  %v8372_v20 = vld [vmem:[#allocation8 + $0x2ec] sm:$0xf0]  ;;  %v7136_v21 = vor.u32 %v8340_v18, %v7135_v16 }
 0x25e   : > { %v7264_v22 = vor.u32 %v8372_v20, %v7263_v19  ;;  %v7391_v23 = vld [vmem:[#allocation8 + $0x3e0] sm:$0xf]  ;;  %v8404_v24 = vld [vmem:[#allocation8 + $0x3ec] sm:$0xf0]  ;;  %4012 = vmatpush.bf16.msra.mxu0 %v7008_v17 }
 0x25f   : > { %v6991_v25 = vld [vmem:[#allocation8 + $0xc0] sm:$0xf]  ;;  %v7392_v26 = vor.u32 %v8404_v24, %v7391_v23  ;;  %v8304_v27 = vld [vmem:[#allocation8 + $0xcc] sm:$0xf0]  ;;  %4026 = vmatpush.bf16.msra.mxu1 %v7136_v21 }
 0x260   : > { %v7119_v28 = vld [vmem:[#allocation8 + $0x1c0] sm:$0xf]  ;;  %v8336_v29 = vld [vmem:[#allocation8 + $0x1cc] sm:$0xf0]  ;;  %4040 = vmatpush.bf16.msra.mxu2 %v7264_v22  ;;  %v6992_v30 = vor.u32 %v8304_v27, %v6991_v25 }
 0x261   : > { %v7120_v31 = vor.u32 %v8336_v29, %v7119_v28  ;;  %v7247_v32 = vld [vmem:[#allocation8 + $0x2c0] sm:$0xf]  ;;  %v8368_v33 = vld [vmem:[#allocation8 + $0x2cc] sm:$0xf0]  ;;  %4054 = vmatpush.bf16.msra.mxu3 %v7392_v26 }
 0x262   : > { %v7375_v34 = vld [vmem:[#allocation8 + $0x3c0] sm:$0xf]  ;;  %v7248_v35 = vor.u32 %v8368_v33, %v7247_v32  ;;  %v8400_v36 = vld [vmem:[#allocation8 + $0x3cc] sm:$0xf0]  ;;  %4013 = vmatpush.bf16.msra.mxu0 %v6992_v30 }
 0x263   : > { %v6975_v6 = vld [vmem:[#allocation8 + $0xa0] sm:$0xf]  ;;  %v8300_v37 = vld [vmem:[#allocation8 + $0xac] sm:$0xf0]  ;;  %v7376_v38 = vor.u32 %v8400_v36, %v7375_v34  ;;  %4027 = vmatpush.bf16.msra.mxu1 %v7120_v31 }
 0x264   : > { %v7103_v39 = vld [vmem:[#allocation8 + $0x1a0] sm:$0xf]  ;;  %v8332_v40 = vld [vmem:[#allocation8 + $0x1ac] sm:$0xf0]  ;;  %v6976_v42 = vor.u32 %v8300_v37, %v6975_v6  ;;  %4041 = vmatpush.bf16.msra.mxu2 %v7248_v35 }
 0x265   : > { %v7231_v41 = vld [vmem:[#allocation8 + $0x2a0] sm:$0xf]  ;;  %v8364_v43 = vld [vmem:[#allocation8 + $0x2ac] sm:$0xf0]  ;;  %v7104_v46 = vor.u32 %v8332_v40, %v7103_v39  ;;  %4055 = vmatpush.bf16.msra.mxu3 %v7376_v38 }
 0x266   : > { %v7359_v44 = vld [vmem:[#allocation8 + $0x3a0] sm:$0xf]  ;;  %v8396_v45 = vld [vmem:[#allocation8 + $0x3ac] sm:$0xf0]  ;;  %v7232_v47 = vor.u32 %v8364_v43, %v7231_v41  ;;  %4014 = vmatpush.bf16.msra.mxu0 %v6976_v42  ;;  %v8306_v41 = vld [vmem:[#allocation8 + $0xe4] sm:$0xf] }
 0x267   : > { %v6959_v48 = vld [vmem:[#allocation8 + $0x80] sm:$0xf]  ;;  %v8296_v49 = vld [vmem:[#allocation8 + $0x8c] sm:$0xf0]  ;;  %v7360_v4 = vor.u32 %v8396_v45, %v7359_v44  ;;  %4028 = vmatpush.bf16.msra.mxu1 %v7104_v46  ;;  %v7009_v42 = vld [vmem:[#allocation8 + $0xf0] sm:$0xf0] }
 0x268   : > { %v7087_v50 = vld [vmem:[#allocation8 + $0x180] sm:$0xf]  ;;  %v8328_v51 = vld [vmem:[#allocation8 + $0x18c] sm:$0xf0]  ;;  %v6960_v56 = vor.u32 %v8296_v49, %v6959_v48  ;;  %4042 = vmatpush.bf16.msra.mxu2 %v7232_v47  ;;  %v8338_v43 = vld [vmem:[#allocation8 + $0x1e4] sm:$0xf] }
 0x269   : > { %v7215_v52 = vld [vmem:[#allocation8 + $0x280] sm:$0xf]  ;;  %v8360_v53 = vld [vmem:[#allocation8 + $0x28c] sm:$0xf0]  ;;  %v7088_v57 = vor.u32 %v8328_v51, %v7087_v50  ;;  %4056 = vmatpush.bf16.msra.mxu3 %v7360_v4  ;;  %v7137_v44 = vld [vmem:[#allocation8 + $0x1f0] sm:$0xf0] }
 0x26a   : > { %v7343_v54 = vld [vmem:[#allocation8 + $0x380] sm:$0xf]  ;;  %v8392_v55 = vld [vmem:[#allocation8 + $0x38c] sm:$0xf0]  ;;  %v7216_v58 = vor.u32 %v8360_v53, %v7215_v52  ;;  %4015 = vmatpush.bf16.msra.mxu0 %v6960_v56  ;;  %v8370_v46 = vld [vmem:[#allocation8 + $0x2e4] sm:$0xf] }
 0x26b   : > { %v6943_v59 = vld [vmem:[#allocation8 + $0x60] sm:$0xf]  ;;  %v8292_v60 = vld [vmem:[#allocation8 + $0x6c] sm:$0xf0]  ;;  %v7344_v62 = vor.u32 %v8392_v55, %v7343_v54  ;;  %4029 = vmatpush.bf16.msra.mxu1 %v7088_v57  ;;  %v7265_v47 = vld [vmem:[#allocation8 + $0x2f0] sm:$0xf0]  ;;  %v7012_v54 = vor.u32 %v8306_v41, %v7009_v42 }
 0x26c   : > { %v7071_v61 = vld [vmem:[#allocation8 + $0x160] sm:$0xf]  ;;  %v8324_v63 = vld [vmem:[#allocation8 + $0x16c] sm:$0xf0]  ;;  %v6944_v5 = vor.u32 %v8292_v60, %v6943_v59  ;;  %4043 = vmatpush.bf16.msra.mxu2 %v7216_v58  ;;  %v8402_v48 = vld [vmem:[#allocation8 + $0x3e4] sm:$0xf]  ;;  %v7140_v58 = vor.u32 %v8338_v43, %v7137_v44  ;;  %v7268_v59 = vor.u32 %v8370_v46, %v7265_v47 }
 0x26d   : > { %v7199_v0 = vld [vmem:[#allocation8 + $0x260] sm:$0xf]  ;;  %v8356_v1 = vld [vmem:[#allocation8 + $0x26c] sm:$0xf0]  ;;  %v7072_v7 = vor.u32 %v8324_v63, %v7071_v61  ;;  %4057 = vmatpush.bf16.msra.mxu3 %v7344_v62  ;;  %v7393_v4 = vld [vmem:[#allocation8 + $0x3f0] sm:$0xf0] }
 0x26e   : > { %v7327_v2 = vld [vmem:[#allocation8 + $0x360] sm:$0xf]  ;;  %v8388_v3 = vld [vmem:[#allocation8 + $0x36c] sm:$0xf0]  ;;  %v7200_v8 = vor.u32 %v8356_v1, %v7199_v0  ;;  %4016 = vmatpush.bf16.msra.mxu0 %v6944_v5  ;;  %v8302_v51 = vld [vmem:[#allocation8 + $0xc4] sm:$0xf]  ;;  %v7396_v63 = vor.u32 %v8402_v48, %v7393_v4 }
 0x26f   : > { %v6927_v9 = vld [vmem:[#allocation8 + $0x40] sm:$0xf]  ;;  %v8288_v10 = vld [vmem:[#allocation8 + $0x4c] sm:$0xf0]  ;;  %v7328_v12 = vor.u32 %v8388_v3, %v7327_v2  ;;  %4030 = vmatpush.bf16.msra.mxu1 %v7072_v7  ;;  %v6993_v52 = vld [vmem:[#allocation8 + $0xd0] sm:$0xf0] }
 0x270   : > { %v7055_v11 = vld [vmem:[#allocation8 + $0x140] sm:$0xf]  ;;  %v8320_v13 = vld [vmem:[#allocation8 + $0x14c] sm:$0xf0]  ;;  %v6928_v18 = vor.u32 %v8288_v10, %v6927_v9  ;;  %4044 = vmatpush.bf16.msra.mxu2 %v7200_v8  ;;  %v10154_v55 = vld [vmem:[#allocation8 + $0x1c4] sm:$0xf] }
 0x271   : > { %v7183_v14 = vld [vmem:[#allocation8 + $0x240] sm:$0xf]  ;;  %v8352_v15 = vld [vmem:[#allocation8 + $0x24c] sm:$0xf0]  ;;  %v7056_v19 = vor.u32 %v8320_v13, %v7055_v11  ;;  %4058 = vmatpush.bf16.msra.mxu3 %v7328_v12  ;;  %v10156_v56 = vld [vmem:[#allocation8 + $0x1d0] sm:$0xf0] }
 0x272   : > { %v7311_v16 = vld [vmem:[#allocation8 + $0x340] sm:$0xf]  ;;  %v8384_v17 = vld [vmem:[#allocation8 + $0x34c] sm:$0xf0]  ;;  %v7184_v20 = vor.u32 %v8352_v15, %v7183_v14  ;;  %4017 = vmatpush.bf16.msra.mxu0 %v6928_v18  ;;  %v10158_v57 = vld [vmem:[#allocation8 + $0x2c4] sm:$0xf] }
 0x273   : > { %v6911_v21 = vld [vmem:[#allocation8 + $0x20] sm:$0xf]  ;;  %v8284_v22 = vld [vmem:[#allocation8 + $0x2c] sm:$0xf0]  ;;  %v7312_v24 = vor.u32 %v8384_v17, %v7311_v16  ;;  %4031 = vmatpush.bf16.msra.mxu1 %v7056_v19  ;;  %v7249_v60 = vld [vmem:[#allocation8 + $0x2d0] sm:$0xf0]  ;;  %v6996_v17 = vor.u32 %v8302_v51, %v6993_v52 }
 0x274   : > { %v7039_v23 = vld [vmem:[#allocation8 + $0x120] sm:$0xf]  ;;  %v8316_v25 = vld [vmem:[#allocation8 + $0x12c] sm:$0xf0]  ;;  %v6912_v30 = vor.u32 %v8284_v22, %v6911_v21  ;;  %4045 = vmatpush.bf16.msra.mxu2 %v7184_v20  ;;  %v10160_v61 = vld [vmem:[#allocation8 + $0x3c4] sm:$0xf] }
 0x275   : > { %v7167_v26 = vld [vmem:[#allocation8 + $0x220] sm:$0xf]  ;;  %v8348_v27 = vld [vmem:[#allocation8 + $0x22c] sm:$0xf0]  ;;  %v7040_v34 = vor.u32 %v8316_v25, %v7039_v23  ;;  %4059 = vmatpush.bf16.msra.mxu3 %v7312_v24  ;;  %v10162_v62 = vld [vmem:[#allocation8 + $0x3d0] sm:$0xf0]  ;;  %v7124_v23 = vor.u32 %v10154_v55, %v10156_v56  ;;  %v7252_v24 = vor.u32 %v10158_v57, %v7249_v60 }
 0x276   : > { %v7295_v28 = vld [vmem:[#allocation8 + $0x320] sm:$0xf]  ;;  %v8380_v29 = vld [vmem:[#allocation8 + $0x32c] sm:$0xf0]  ;;  %v7168_v35 = vor.u32 %v8348_v27, %v7167_v26  ;;  %4018 = vmatpush.bf16.msra.mxu0 %v6912_v30  ;;  %v10164_v0 = vld [vmem:[#allocation8 + $0xa4] sm:$0xf]  ;;  %v7380_v30 = vor.u32 %v10160_v61, %v10162_v62 }
 0x277   : > { %v6895_v31 = vld [vmem:[#allocation8] sm:$0xf]  ;;  %v8280_v32 = vld [vmem:[#allocation8 + $0xc] sm:$0xf0]  ;;  %v7296_v38 = vor.u32 %v8380_v29, %v7295_v28  ;;  %4032 = vmatpush.bf16.msra.mxu1 %v7040_v34  ;;  %v10166_v1 = vld [vmem:[#allocation8 + $0xb0] sm:$0xf0] }
 0x278   : > { %v7023_v33 = vld [vmem:[#allocation8 + $0x100] sm:$0xf]  ;;  %v8312_v36 = vld [vmem:[#allocation8 + $0x10c] sm:$0xf0]  ;;  %v6896_v45 = vor.u32 %v8280_v32, %v6895_v31  ;;  %4046 = vmatpush.bf16.msra.mxu2 %v7168_v35  ;;  %v10168_v2 = vld [vmem:[#allocation8 + $0x1a4] sm:$0xf]  ;;  %v6980_v35 = vor.u32 %v10164_v0, %v10166_v1 }
 0x279   : > { %v7151_v6 = vld [vmem:[#allocation8 + $0x200] sm:$0xf]  ;;  %v8344_v37 = vld [vmem:[#allocation8 + $0x20c] sm:$0xf0]  ;;  %v7024_v49 = vor.u32 %v8312_v36, %v7023_v33  ;;  %4060 = vmatpush.bf16.msra.mxu3 %v7296_v38  ;;  %v10170_v3 = vld [vmem:[#allocation8 + $0x1b0] sm:$0xf0] }
 0x27a   : > { %v7279_v39 = vld [vmem:[#allocation8 + $0x300] sm:$0xf]  ;;  %v8376_v40 = vld [vmem:[#allocation8 + $0x30c] sm:$0xf0]  ;;  %v7152_v50 = vor.u32 %v8344_v37, %v7151_v6  ;;  %4019 = vmatpush.bf16.msra.mxu0 %v6896_v45  ;;  %v10172_v5 = vld [vmem:[#allocation8 + $0x2a4] sm:$0xf]  ;;  %v7108_v36 = vor.u32 %v10168_v2, %v10170_v3 }
 0x27b   : > { %v7280_v53 = vor.u32 %v8376_v40, %v7279_v39  ;;  %v10174_v7 = vld [vmem:[#allocation8 + $0x2b0] sm:$0xf0]  ;;  %4033 = vmatpush.bf16.msra.mxu1 %v7024_v49  ;;  %v10176_v8 = vld [vmem:[#allocation8 + $0x3a4] sm:$0xf]  ;;  %v3064_v15 = vld [vmem:[#allocation2 + $0x130] sm:$0xff] }
 0x27c   : > { %4047 = vmatpush.bf16.msra.mxu2 %v7152_v50  ;;  %v10178_v9 = vld [vmem:[#allocation8 + $0x3b0] sm:$0xf0]  ;;  %v10180_v10 = vld [vmem:[#allocation8 + $0x84] sm:$0xf]  ;;  %v3092_v20 = vld [vmem:[#allocation2 + $0x100] sm:$0xff]  ;;  %v7236_v6 = vor.u32 %v10172_v5, %v10174_v7 }
 0x27d   : > { %v10182_v11 = vld [vmem:[#allocation8 + $0x90] sm:$0xf0]  ;;  %v10184_v12 = vld [vmem:[#allocation8 + $0x184] sm:$0xf]  ;;  %4061 = vmatpush.bf16.msra.mxu3 %v7280_v53  ;;  %v3096_v21 = vld [vmem:[#allocation2 + $0x20] sm:$0xff]  ;;  %v7364_v41 = vor.u32 %v10176_v8, %v10178_v9 }
 0x27e   : > { %v10186_v13 = vld [vmem:[#allocation8 + $0x190] sm:$0xf0]  ;;  %v3060_v14 = vld [vmem:[#allocation2 + $0xd8] sm:$0xff]  ;;  %4068 = vmatpush.bf16.msrb.mxu0 %v7012_v54  ;;  %v3128_v29 = vmax.f32 %v3092_v20, %v3096_v21  ;;  %v6964_v42 = vor.u32 %v10180_v10, %v10182_v11  ;;  %v3073_v57 = vld [vmem:[#allocation2 + $0x60] sm:$0xff] }
 0x27f   : > { %v3068_v16 = vld [vmem:[#allocation2 + $0x118] sm:$0xff]  ;;  %v10190_v19 = vld [vmem:[#allocation8 + $0x290] sm:$0xf0]  ;;  %v3124_v22 = vmax.f32 %v3060_v14, %v3064_v15  ;;  %4082 = vmatpush.bf16.msrb.mxu1 %v7140_v58  ;;  %v7092_v43 = vor.u32 %v10184_v12, %v10186_v13  ;;  %v3062_v0 = vld [vmem:[#allocation2 + $0x50] sm:$0xff] }
 0x280   : > { %v10188_v18 = vld [vmem:[#allocation8 + $0x284] sm:$0xf]  ;;  %4096 = vmatpush.bf16.msrb.mxu2 %v7268_v59  ;;  %v10197_v26 = vld [vmem:[#allocation8 + $0x390] sm:$0xf0]  ;;  %v3066_v1 = vld [vmem:[#allocation2 + $0x180] sm:$0xff] }
 0x281   : > { %v10195_v25 = vld [vmem:[#allocation8 + $0x384] sm:$0xf]  ;;  %v3072_v27 = vld [vmem:[#allocation2 + $0x108] sm:$0xff]  ;;  %4110 = vmatpush.bf16.msrb.mxu3 %v7396_v63  ;;  %v3132_v32 = vmax.f32 %v3124_v22, %v3068_v16  ;;  %v7220_v48 = vor.u32 %v10188_v18, %v10190_v19  ;;  %v3058_v63 = vld [vmem:[#allocation2 + $0xb0] sm:$0xff] }
 0x282   : > { %v3100_v28 = vld [vmem:[#allocation2 + $0xe8] sm:$0xff]  ;;  %v3104_v31 = vld [vmem:[#allocation2 + $0x1d8] sm:$0xff]  ;;  %4069 = vmatpush.bf16.msrb.mxu0 %v6996_v17  ;;  %v7348_v54 = vor.u32 %v10195_v25, %v10197_v26  ;;  %v3105_v7 = vld [vmem:[#allocation2 + $0xd0] sm:$0xff]  ;;  %v3122_v10 = vmax.f32 %v3058_v63, %v3062_v0 }
 0x283   : > { %v10201_v33 = vld [vmem:[#allocation8 + $0x64] sm:$0xf]  ;;  %v10203_v34 = vld [vmem:[#allocation8 + $0x70] sm:$0xf0]  ;;  %v3136_v37 = vmax.f32 %v3128_v29, %v3100_v28  ;;  %v3140_v44 = vmax.f32 %v3132_v32, %v3072_v27  ;;  %4083 = vmatpush.bf16.msrb.mxu1 %v7124_v23  ;;  %v3094_v9 = vld [vmem:[#allocation2 + $0x40] sm:$0xff] }
 0x284   : > { %v10211_v38 = vld [vmem:[#allocation8 + $0x164] sm:$0xf]  ;;  %v10213_v39 = vld [vmem:[#allocation8 + $0x170] sm:$0xf0]  ;;  %4097 = vmatpush.bf16.msrb.mxu2 %v7252_v24  ;;  %v6948_v56 = vor.u32 %v10201_v33, %v10203_v34  ;;  %v3070_v16 = vld [vmem:[#allocation2 + $0x120] sm:$0xff]  ;;  %v3130_v23 = vmax.f32 %v3122_v10, %v3066_v1 }
 0x285   : > { %v10215_v40 = vld [vmem:[#allocation8 + $0x264] sm:$0xf]  ;;  %v10223_v45 = vld [vmem:[#allocation8 + $0x270] sm:$0xf0]  ;;  %v3144_v49 = vmax.f32 %v3136_v37, %v3104_v31  ;;  %4111 = vmatpush.bf16.msrb.mxu3 %v7380_v30  ;;  %vm3148_vm0 = vcmp.ge.f32.partialorder %v3140_v44, 0.0  ;;  %v7076_v3 = vor.u32 %v10211_v38, %v10213_v39  ;;  %v3098_v17 = vld [vmem:[#allocation2 + $0x1a0] sm:$0xff] }
 0x286   : > { %v3061_v46 = vld [vmem:[#allocation2 + $0x18] sm:$0xff]  ;;  %v3065_v47 = vld [vmem:[#allocation2 + $0x48] sm:$0xff]  ;;  %v3156_v55 = vmul.f32 0.01, %v3140_v44  ;;  %4070 = vmatpush.bf16.msrb.mxu0 %v6980_v35  ;;  %v7204_v5 = vor.u32 %v10215_v40, %v10223_v45  ;;  %v3059_v18 = vld [vmem:[#allocation2 + $0x1b0] sm:$0xff]  ;;  %v3138_v35 = vmax.f32 %v3130_v23, %v3070_v16 }
 0x287   : > { %v10227_v50 = vld [vmem:[#allocation8 + $0x364] sm:$0xf]  ;;  %v10229_v4 = vld [vmem:[#allocation8 + $0x370] sm:$0xf0]  ;;  %v3125_v53 = vmax.f32 %v3061_v46, %v3065_v47  ;;  %vm3152_vm1 = vcmp.ge.f32.partialorder %v3144_v49, 0.0  ;;  %4084 = vmatpush.bf16.msrb.mxu1 %v7108_v36  ;;  %v3102_v21 = vld [vmem:[#allocation2 + $0x70] sm:$0xff] }
 0x288   : > { %v3069_v51 = vld [vmem:[#allocation2 + $0x98] sm:$0xff]  ;;  %v3093_v52 = vld [vmem:[#allocation2 + $0xc8] sm:$0xff]  ;;  %v3160_v60 = vmul.f32 0.01, %v3144_v49  ;;  %v3164_v2 = vsel %vm3148_vm0, %v3140_v44, %v3156_v55  ;;  %4098 = vmatpush.bf16.msrb.mxu2 %v7236_v6  ;;  %v7332_v20 = vor.u32 %v10227_v50, %v10229_v4  ;;  %v3067_v25 = vld [vmem:[#allocation2 + $0x110] sm:$0xff]  ;;  %vm3146_vm4 = vcmp.ge.f32.partialorder %v3138_v35, 0.0 }
 0x289   : > { %v3097_v58 = vld [vmem:[#allocation2 + $0x128] sm:$0xff]  ;;  %v3101_v59 = vld [vmem:[#allocation2 + $0x78] sm:$0xff]  ;;  %v3133_v62 = vmax.f32 %v3125_v53, %v3069_v51  ;;  %4112 = vmatpush.bf16.msrb.mxu3 %v7364_v41  ;;  %v3091_v28 = vld [vmem:[#allocation2 + $0x1d0] sm:$0xff]  ;;  %v3154_v47 = vmul.f32 0.01, %v3138_v35 }
 0x28a   : > { %v3129_v61 = vmax.f32 %v3093_v52, %v3097_v58  ;;  %v3090_v8 = vld [vmem:[#allocation2 + $0x148] sm:$0xff]  ;;  %v3168_v11 = vsel %vm3152_vm1, %v3144_v49, %v3160_v60  ;;  %v3095_v29 = vld [vmem:[#allocation2 + $0x1f8] sm:$0xff]  ;;  %v3099_v30 = vld [vmem:[#allocation2 + $0x1f0] sm:$0xff]  ;;  %4071 = vmatpush.bf16.msrb.mxu0 %v6964_v42 }
 0x28b   : > { %v3141_v15 = vmax.f32 %v3133_v62, %v3073_v57  ;;  %v10240_v19 = vpack.c.bf16 %v3168_v11, %v3164_v2  ;;  %v3126_v22 = vmax.f32 %v3090_v8, %v3094_v9  ;;  %v3063_v24 = vld [vmem:[#allocation2 + $0x168] sm:$0xff]  ;;  %v3071_v36 = vld [vmem:[#allocation2 + $0x150] sm:$0xff]  ;;  %v3127_v6 = vmax.f32 %v3091_v28, %v3095_v29  ;;  %v8286_v37 = vld [vmem:[#allocation8 + $0x44] sm:$0xf]  ;;  %4085 = vmatpush.bf16.msrb.mxu1 %v7092_v43 }
 0x28c   : > { %v3137_v14 = vmax.f32 %v3129_v61, %v3101_v59  ;;  %v3123_v31 = vmax.f32 %v3059_v18, %v3063_v24  ;;  %v6929_v40 = vld [vmem:[#allocation8 + $0x50] sm:$0xf0]  ;;  %4099 = vmatpush.bf16.msrb.mxu2 %v7220_v48  ;;  %v8318_v46 = vld [vmem:[#allocation8 + $0x144] sm:$0xf]  ;;  %v3103_v49 = vld [vmem:[#allocation2 + $0x90] sm:$0xff] }
 0x28d   : > { %vm3149_vm2 = vcmp.ge.f32.partialorder %v3141_v15, 0.0  ;;  %v3157_v27 = vmul.f32 0.01, %v3141_v15  ;;  %4048 = vmatmul.bf16.vlgmr.msra.gmra.mxu2 %v10240_v19  ;;  %v3134_v32 = vmax.f32 %v3126_v22, %v3098_v17  ;;  %4113 = vmatpush.bf16.msrb.mxu3 %v7348_v54  ;;  %v3135_v50 = vmax.f32 %v3127_v6, %v3099_v30  ;;  %v7057_v4 = vld [vmem:[#allocation8 + $0x150] sm:$0xf0] }
 0x28e   : > { %v3145_v26 = vmax.f32 %v3137_v14, %v3105_v7  ;;  %v3131_v45 = vmax.f32 %v3123_v31, %v3067_v25  ;;  %v6932_v53 = vor.u32 %v8286_v37, %v6929_v40  ;;  %v8350_v55 = vld [vmem:[#allocation8 + $0x244] sm:$0xf]  ;;  %v7185_v12 = vld [vmem:[#allocation8 + $0x250] sm:$0xf0]  ;;  %4072 = vmatpush.bf16.msrb.mxu0 %v6948_v56  ;;  %v3162_v54 = vsel %vm3146_vm4, %v3138_v35, %v3154_v47  ;;  %v7015_v25 = vld [vmem:[#allocation8 + $0xe8] sm:$0xf] }
 0x28f   : > { %v3165_v44 = vsel %vm3149_vm2, %v3141_v15, %v3157_v27  ;;  %v3142_v42 = vmax.f32 %v3134_v32, %v3102_v21  ;;  %v8382_v13 = vld [vmem:[#allocation8 + $0x344] sm:$0xf]  ;;  %v7313_v57 = vld [vmem:[#allocation8 + $0x350] sm:$0xf0]  ;;  %4086 = vmatpush.bf16.msrb.mxu1 %v7076_v3  ;;  %v3143_v58 = vmax.f32 %v3135_v50, %v3103_v49  ;;  %v7060_v60 = vor.u32 %v8318_v46, %v7057_v4  ;;  %v8309_v27 = vld [vmem:[#allocation8 + $0xf4] sm:$0xf0] }
 0x290   : > { %vm3153_vm3 = vcmp.ge.f32.partialorder %v3145_v26, 0.0  ;;  %v3161_v41 = vmul.f32 0.01, %v3145_v26  ;;  %v3139_v52 = vmax.f32 %v3131_v45, %v3071_v36  ;;  %4100 = vmatpush.bf16.msrb.mxu2 %v7204_v5  ;;  %v8282_v61 = vld [vmem:[#allocation8 + $0x24] sm:$0xf]  ;;  %v7188_v33 = vor.u32 %v8350_v55, %v7185_v12 }
 0x291   : > { %vm3150_vm5 = vcmp.ge.f32.partialorder %v3142_v42, 0.0  ;;  %v3158_v48 = vmul.f32 0.01, %v3142_v42  ;;  %4114 = vmatpush.bf16.msrb.mxu3 %v7332_v20  ;;  %v7316_v34 = vor.u32 %v8382_v13, %v7313_v57  ;;  %v6913_v56 = vld [vmem:[#allocation8 + $0x30] sm:$0xf0]  ;;  %vm3151_vm7 = vcmp.ge.f32.partialorder %v3143_v58, 0.0 }
 0x292   : > { %v3169_v51 = vsel %vm3153_vm3, %v3145_v26, %v3161_v41  ;;  %vm3147_vm6 = vcmp.ge.f32.partialorder %v3139_v52, 0.0  ;;  %v3155_v59 = vmul.f32 0.01, %v3139_v52  ;;  %v8314_v63 = vld [vmem:[#allocation8 + $0x124] sm:$0xf]  ;;  %4073 = vmatpush.bf16.msrb.mxu0 %v6932_v53  ;;  %v6916_v3 = vor.u32 %v8282_v61, %v6913_v56 }
 0x293   : > { %v10252_v43 = vpack.c.bf16 %v3169_v51, %v3165_v44  ;;  %v3166_v62 = vsel %vm3150_vm5, %v3142_v42, %v3158_v48  ;;  %v7041_v0 = vld [vmem:[#allocation8 + $0x130] sm:$0xf0]  ;;  %v3159_v38 = vmul.f32 0.01, %v3143_v58  ;;  %v8346_v2 = vld [vmem:[#allocation8 + $0x224] sm:$0xf]  ;;  %4087 = vmatpush.bf16.msrb.mxu1 %v7060_v60  ;;  %v7016_v31 = vor.u32 %v8309_v27, %v7015_v25 }
 0x294   : > { %v10258_v1 = vpack.c.bf16 %v3166_v62, %v3162_v54  ;;  %v3163_v39 = vsel %vm3147_vm6, %v3139_v52, %v3155_v59  ;;  %v7169_v5 = vld [vmem:[#allocation8 + $0x230] sm:$0xf0]  ;;  %v8378_v7 = vld [vmem:[#allocation8 + $0x324] sm:$0xf]  ;;  %v7044_v10 = vor.u32 %v8314_v63, %v7041_v0  ;;  %4101 = vmatpush.bf16.msrb.mxu2 %v7188_v33  ;;  %v7143_v28 = vld [vmem:[#allocation8 + $0x1e8] sm:$0xf] }
 0x295   : > { %4062 = vmatmul.bf16.vlgmr.msra.gmra.mxu3 %v10252_v43  ;;  %v7297_v8 = vld [vmem:[#allocation8 + $0x330] sm:$0xf0]  ;;  %v3167_v9 = vsel %vm3151_vm7, %v3143_v58, %v3159_v38  ;;  %v8278_v11 = vld [vmem:[#allocation8 + $0x4] sm:$0xf]  ;;  %v7172_v17 = vor.u32 %v8346_v2, %v7169_v5  ;;  %v8341_v29 = vld [vmem:[#allocation8 + $0x1f4] sm:$0xf0] }
 0x296   : > { %4020 = vmatmul.bf16.vlgmr.msra.gmra.mxu0 %v10258_v1  ;;  %v6897_v14 = vld [vmem:[#allocation8 + $0x10] sm:$0xf0]  ;;  %v8310_v15 = vld [vmem:[#allocation8 + $0x104] sm:$0xf]  ;;  %v10261_v16 = vpack.c.bf16 %v3167_v9, %v3163_v39  ;;  %4115 = vmatpush.bf16.msrb.mxu3 %v7316_v34  ;;  %v7300_v18 = vor.u32 %v8378_v7, %v7297_v8  ;;  %v7271_v32 = vld [vmem:[#allocation8 + $0x2e8] sm:$0xf]  ;;  %v7144_v45 = vor.u32 %v8341_v29, %v7143_v28 }
 0x297   : > { %v7025_v20 = vld [vmem:[#allocation8 + $0x110] sm:$0xf0]  ;;  %v8342_v21 = vld [vmem:[#allocation8 + $0x204] sm:$0xf]  ;;  %4074 = vmatpush.bf16.msrb.mxu0 %v6916_v3  ;;  %v6900_v26 = vor.u32 %v8278_v11, %v6897_v14  ;;  %4088 = vmatpush.bf16.msrb.mxu1 %v7044_v10  ;;  %v8373_v35 = vld [vmem:[#allocation8 + $0x2f4] sm:$0xf0] }
 0x298   : > { %v7153_v22 = vld [vmem:[#allocation8 + $0x210] sm:$0xf0]  ;;  %v8374_v23 = vld [vmem:[#allocation8 + $0x304] sm:$0xf]  ;;  %4034 = vmatmul.bf16.vlgmr.msra.gmra.mxu1 %v10261_v16  ;;  %v7028_v30 = vor.u32 %v8310_v15, %v7025_v20  ;;  %v7399_v36 = vld [vmem:[#allocation8 + $0x3e8] sm:$0xf]  ;;  %4102 = vmatpush.bf16.msrb.mxu2 %v7172_v17  ;;  %v7272_v46 = vor.u32 %v8373_v35, %v7271_v32 }
 0x299   : > { %v7281_v24 = vld [vmem:[#allocation8 + $0x310] sm:$0xf0]  ;;  %v7156_v6 = vor.u32 %v8342_v21, %v7153_v22  ;;  %v8405_v40 = vld [vmem:[#allocation8 + $0x3f4] sm:$0xf0]  ;;  %v6999_v41 = vld [vmem:[#allocation8 + $0xc8] sm:$0xf] }
 0x29a   : > { %4116 = vmatpush.bf16.msrb.mxu3 %v7300_v18  ;;  %v7284_v37 = vor.u32 %v8374_v23, %v7281_v24  ;;  %v8305_v44 = vld [vmem:[#allocation8 + $0xd4] sm:$0xf0]  ;;  %v7400_v42 = vor.u32 %v8405_v40, %v7399_v36  ;;  %v7127_v47 = vld [vmem:[#allocation8 + $0x1c8] sm:$0xf]  ;;  %vm5508_vm6 = vcmask 261120  }
 0x29b   : > { %4075 = vmatpush.bf16.msrb.mxu0 %v6900_v26  ;;  %v8337_v49 = vld [vmem:[#allocation8 + $0x1d4] sm:$0xf0]  ;;  %v7255_v50 = vld [vmem:[#allocation8 + $0x2c8] sm:$0xf]  ;;  %4089 = vmatpush.bf16.msrb.mxu1 %v7028_v30  ;;  %v7000_v4 = vor.u32 %v8305_v44, %v6999_v41 }
 0x29c   : > { %v8369_v51 = vld [vmem:[#allocation8 + $0x2d4] sm:$0xf0]  ;;  %v7383_v52 = vld [vmem:[#allocation8 + $0x3c8] sm:$0xf]  ;;  %4103 = vmatpush.bf16.msrb.mxu2 %v7156_v6  ;;  %v7128_v55 = vor.u32 %v8337_v49, %v7127_v47 }
 0x29d   : > { %v8401_v53 = vld [vmem:[#allocation8 + $0x3d4] sm:$0xf0]  ;;  %v6983_v12 = vld [vmem:[#allocation8 + $0xa8] sm:$0xf]  ;;  %v7256_v48 = vor.u32 %v8369_v51, %v7255_v50 }
 0x29e   : > { %4117 = vmatpush.bf16.msrb.mxu3 %v7284_v37  ;;  %v8301_v13 = vld [vmem:[#allocation8 + $0xb4] sm:$0xf0]  ;;  %v7384_v54 = vor.u32 %v8401_v53, %v7383_v52  ;;  %v7111_v57 = vld [vmem:[#allocation8 + $0x1a8] sm:$0xf] }
 0x29f   : > { %4124 = vmatpush.bf16.msra.mxu0 %v7016_v31  ;;  %4138 = vmatpush.bf16.msra.mxu1 %v7144_v45  ;;  %v8333_v58 = vld [vmem:[#allocation8 + $0x1b4] sm:$0xf0]  ;;  %v7239_v59 = vld [vmem:[#allocation8 + $0x2a8] sm:$0xf]  ;;  %v6984_v61 = vor.u32 %v8301_v13, %v6983_v12 }
 0x2a0   : > { %4152 = vmatpush.bf16.msra.mxu2 %v7272_v46  ;;  %v8365_v60 = vld [vmem:[#allocation8 + $0x2b4] sm:$0xf0]  ;;  %v7367_v62 = vld [vmem:[#allocation8 + $0x3a8] sm:$0xf]  ;;  %v7112_v34 = vor.u32 %v8333_v58, %v7111_v57 }
 0x2a1   : > { %4104 = vmatmul.bf16.vlgmr.msrb.gmra.mxu2 %v10240_v19  ;;  %v8397_v33 = vld [vmem:[#allocation8 + $0x3b4] sm:$0xf0]  ;;  %v6967_v56 = vld [vmem:[#allocation8 + $0x88] sm:$0xf]  ;;  %v7240_v0 = vor.u32 %v8365_v60, %v7239_v59  ;;  %v8307_v60 = vld [vmem:[#allocation8 + $0xec] sm:$0xf] }
 0x2a2   : > { %4166 = vmatpush.bf16.msra.mxu3 %v7400_v42  ;;  %v8297_v63 = vld [vmem:[#allocation8 + $0x94] sm:$0xf0]  ;;  %v7095_v38 = vld [vmem:[#allocation8 + $0x188] sm:$0xf]  ;;  %v7368_v2 = vor.u32 %v8397_v33, %v7367_v62 }
 0x2a3   : > { %4125 = vmatpush.bf16.msra.mxu0 %v7000_v4  ;;  %4139 = vmatpush.bf16.msra.mxu1 %v7128_v55  ;;  %v8329_v39 = vld [vmem:[#allocation8 + $0x194] sm:$0xf0]  ;;  %v7223_v3 = vld [vmem:[#allocation8 + $0x288] sm:$0xf]  ;;  %v6968_v7 = vor.u32 %v8297_v63, %v6967_v56  ;;  %v7145_v56 = vld [vmem:[#allocation8 + $0x1f8] sm:$0xf0] }
 0x2a4   : > { %4153 = vmatpush.bf16.msra.mxu2 %v7256_v48  ;;  %v8361_v5 = vld [vmem:[#allocation8 + $0x294] sm:$0xf0]  ;;  %v7351_v8 = vld [vmem:[#allocation8 + $0x388] sm:$0xf]  ;;  %v7096_v10 = vor.u32 %v8329_v39, %v7095_v38  ;;  %v8371_v38 = vld [vmem:[#allocation8 + $0x2ec] sm:$0xf] }
 0x2a5   : > { %4118 = vmatmul.bf16.vlgmr.msrb.gmra.mxu3 %v10252_v43  ;;  %v8393_v9 = vld [vmem:[#allocation8 + $0x394] sm:$0xf0]  ;;  %v6951_v11 = vld [vmem:[#allocation8 + $0x68] sm:$0xf]  ;;  %v7224_v15 = vor.u32 %v8361_v5, %v7223_v3  ;;  %v7273_v39 = vld [vmem:[#allocation8 + $0x2f8] sm:$0xf0] }
 0x2a6   : > { %4167 = vmatpush.bf16.msra.mxu3 %v7384_v54  ;;  %4076 = vmatmul.bf16.vlgmr.msrb.gmra.mxu0 %v10258_v1  ;;  %v8293_v14 = vld [vmem:[#allocation8 + $0x74] sm:$0xf0]  ;;  %v7079_v17 = vld [vmem:[#allocation8 + $0x168] sm:$0xf]  ;;  %v7352_v20 = vor.u32 %v8393_v9, %v7351_v8  ;;  %v8403_v5 = vld [vmem:[#allocation8 + $0x3ec] sm:$0xf] }
 0x2a7   : > { %4126 = vmatpush.bf16.msra.mxu0 %v6984_v61  ;;  %4140 = vmatpush.bf16.msra.mxu1 %v7112_v34  ;;  %v8325_v18 = vld [vmem:[#allocation8 + $0x174] sm:$0xf0]  ;;  %v7207_v21 = vld [vmem:[#allocation8 + $0x268] sm:$0xf]  ;;  %v6952_v23 = vor.u32 %v8293_v14, %v6951_v11  ;;  %v7017_v61 = vld [vmem:[#allocation8 + $0xf8] sm:$0xf0] }
 0x2a8   : > { %4090 = vmatmul.bf16.vlgmr.msrb.gmra.mxu1 %v10261_v16  ;;  %4154 = vmatpush.bf16.msra.mxu2 %v7240_v0  ;;  %v8357_v22 = vld [vmem:[#allocation8 + $0x274] sm:$0xf0]  ;;  %v7335_v24 = vld [vmem:[#allocation8 + $0x368] sm:$0xf]  ;;  %v7080_v26 = vor.u32 %v8325_v18, %v7079_v17  ;;  %v8339_v34 = vld [vmem:[#allocation8 + $0x1ec] sm:$0xf]  ;;  %v7020_v3 = vor.u32 %v8307_v60, %v7017_v61 }
 0x2a9   : > { %v8389_v25 = vld [vmem:[#allocation8 + $0x374] sm:$0xf0]  ;;  %v6935_v27 = vld [vmem:[#allocation8 + $0x48] sm:$0xf]  ;;  %v7208_v29 = vor.u32 %v8357_v22, %v7207_v21  ;;  %v7148_v9 = vor.u32 %v8339_v34, %v7145_v56  ;;  %v7001_v11 = vld [vmem:[#allocation8 + $0xd8] sm:$0xf0] }
 0x2aa   : > { %4168 = vmatpush.bf16.msra.mxu3 %v7368_v2  ;;  %v8289_v28 = vld [vmem:[#allocation8 + $0x54] sm:$0xf0]  ;;  %v7063_v30 = vld [vmem:[#allocation8 + $0x148] sm:$0xf]  ;;  %v7336_v32 = vor.u32 %v8389_v25, %v7335_v24  ;;  %v8335_v17 = vld [vmem:[#allocation8 + $0x1cc] sm:$0xf] }
 0x2ab   : > { %4127 = vmatpush.bf16.msra.mxu0 %v6968_v7  ;;  %4141 = vmatpush.bf16.msra.mxu1 %v7096_v10  ;;  %v8321_v31 = vld [vmem:[#allocation8 + $0x154] sm:$0xf0]  ;;  %v7191_v35 = vld [vmem:[#allocation8 + $0x248] sm:$0xf]  ;;  %v6936_v6 = vor.u32 %v8289_v28, %v6935_v27  ;;  %v7401_v7 = vld [vmem:[#allocation8 + $0x3f8] sm:$0xf0] }
 0x2ac   : > { %4155 = vmatpush.bf16.msra.mxu2 %v7224_v15  ;;  %v8353_v36 = vld [vmem:[#allocation8 + $0x254] sm:$0xf0]  ;;  %v7319_v37 = vld [vmem:[#allocation8 + $0x348] sm:$0xf]  ;;  %v7064_v41 = vor.u32 %v8321_v31, %v7063_v30  ;;  %v8303_v10 = vld [vmem:[#allocation8 + $0xcc] sm:$0xf]  ;;  %v7276_v15 = vor.u32 %v8371_v38, %v7273_v39 }
 0x2ad   : > { %v8385_v40 = vld [vmem:[#allocation8 + $0x354] sm:$0xf0]  ;;  %v6919_v44 = vld [vmem:[#allocation8 + $0x28] sm:$0xf]  ;;  %v7192_v46 = vor.u32 %v8353_v36, %v7191_v35  ;;  %v7129_v18 = vld [vmem:[#allocation8 + $0x1d8] sm:$0xf0] }
 0x2ae   : > { %4169 = vmatpush.bf16.msra.mxu3 %v7352_v20  ;;  %v8285_v45 = vld [vmem:[#allocation8 + $0x34] sm:$0xf0]  ;;  %v7047_v42 = vld [vmem:[#allocation8 + $0x128] sm:$0xf]  ;;  %v7320_v49 = vor.u32 %v8385_v40, %v7319_v37  ;;  %v7404_v20 = vor.u32 %v8403_v5, %v7401_v7  ;;  %v8367_v21 = vld [vmem:[#allocation8 + $0x2cc] sm:$0xf] }
 0x2af   : > { %4128 = vmatpush.bf16.msra.mxu0 %v6952_v23  ;;  %4142 = vmatpush.bf16.msra.mxu1 %v7080_v26  ;;  %v8317_v47 = vld [vmem:[#allocation8 + $0x134] sm:$0xf0]  ;;  %v7175_v50 = vld [vmem:[#allocation8 + $0x228] sm:$0xf]  ;;  %v6920_v52 = vor.u32 %v8285_v45, %v6919_v44  ;;  %v7257_v22 = vld [vmem:[#allocation8 + $0x2d8] sm:$0xf0]  ;;  %v7004_v23 = vor.u32 %v8303_v10, %v7001_v11  ;;  %v7132_v26 = vor.u32 %v8335_v17, %v7129_v18 }
 0x2b0   : > { %4156 = vmatpush.bf16.msra.mxu2 %v7208_v29  ;;  %v8349_v4 = vld [vmem:[#allocation8 + $0x234] sm:$0xf0]  ;;  %v7303_v51 = vld [vmem:[#allocation8 + $0x328] sm:$0xf]  ;;  %v7048_v13 = vor.u32 %v8317_v47, %v7047_v42  ;;  %v8399_v24 = vld [vmem:[#allocation8 + $0x3cc] sm:$0xf]  ;;  %v7260_v29 = vor.u32 %v8367_v21, %v7257_v22 }
 0x2b1   : > { %v8381_v53 = vld [vmem:[#allocation8 + $0x334] sm:$0xf0]  ;;  %v6903_v55 = vld [vmem:[#allocation8 + $0x8] sm:$0xf]  ;;  %v7176_v58 = vor.u32 %v8349_v4, %v7175_v50  ;;  %v7385_v25 = vld [vmem:[#allocation8 + $0x3d8] sm:$0xf0] }
 0x2b2   : > { %4170 = vmatpush.bf16.msra.mxu3 %v7336_v32  ;;  %v8281_v12 = vld [vmem:[#allocation8 + $0x14] sm:$0xf0]  ;;  %v7031_v48 = vld [vmem:[#allocation8 + $0x108] sm:$0xf]  ;;  %v7304_v62 = vor.u32 %v8381_v53, %v7303_v51  ;;  %v8299_v27 = vld [vmem:[#allocation8 + $0xac] sm:$0xf]  ;;  %v7388_v32 = vor.u32 %v8399_v24, %v7385_v25 }
 0x2b3   : > { %4129 = vmatpush.bf16.msra.mxu0 %v6936_v6  ;;  %4143 = vmatpush.bf16.msra.mxu1 %v7064_v41  ;;  %v8313_v54 = vld [vmem:[#allocation8 + $0x114] sm:$0xf0]  ;;  %v7159_v57 = vld [vmem:[#allocation8 + $0x208] sm:$0xf]  ;;  %v6904_v63 = vor.u32 %v8281_v12, %v6903_v55  ;;  %v6985_v28 = vld [vmem:[#allocation8 + $0xb8] sm:$0xf0] }
 0x2b4   : > { %4157 = vmatpush.bf16.msra.mxu2 %v7192_v46  ;;  %v8345_v59 = vld [vmem:[#allocation8 + $0x214] sm:$0xf0]  ;;  %v7287_v33 = vld [vmem:[#allocation8 + $0x308] sm:$0xf]  ;;  %v7032_v2 = vor.u32 %v8313_v54, %v7031_v48  ;;  %v8331_v30 = vld [vmem:[#allocation8 + $0x1ac] sm:$0xf]  ;;  %v6988_v6 = vor.u32 %v8299_v27, %v6985_v28 }
 0x2b5   : > { %v8377_v0 = vld [vmem:[#allocation8 + $0x314] sm:$0xf0]  ;;  %v7160_v8 = vor.u32 %v8345_v59, %v7159_v57  ;;  %v7113_v31 = vld [vmem:[#allocation8 + $0x1b8] sm:$0xf0]  ;;  %v8363_v35 = vld [vmem:[#allocation8 + $0x2ac] sm:$0xf] }
 0x2b6   : > { %4171 = vmatpush.bf16.msra.mxu3 %v7320_v49  ;;  %v7288_v14 = vor.u32 %v8377_v0, %v7287_v33  ;;  %v7241_v36 = vld [vmem:[#allocation8 + $0x2b8] sm:$0xf0]  ;;  %v8395_v37 = vld [vmem:[#allocation8 + $0x3ac] sm:$0xf]  ;;  %v7116_v41 = vor.u32 %v8331_v30, %v7113_v31 }
 0x2b7   : > { %4130 = vmatpush.bf16.msra.mxu0 %v6920_v52  ;;  %4144 = vmatpush.bf16.msra.mxu1 %v7048_v13  ;;  %v7369_v40 = vld [vmem:[#allocation8 + $0x3b8] sm:$0xf0]  ;;  %v8295_v44 = vld [vmem:[#allocation8 + $0x8c] sm:$0xf]  ;;  %v7244_v46 = vor.u32 %v8363_v35, %v7241_v36  ;;  %v7519_v36 = vld [vmem:[#allocation9 + $0xe0] sm:$0xf] }
 0x2b8   : > { %4158 = vmatpush.bf16.msra.mxu2 %v7176_v58  ;;  %v6969_v45 = vld [vmem:[#allocation8 + $0x98] sm:$0xf0]  ;;  %v8327_v42 = vld [vmem:[#allocation8 + $0x18c] sm:$0xf]  ;;  %v7372_v49 = vor.u32 %v8395_v37, %v7369_v40 }
 0x2b9   : > { %v7097_v47 = vld [vmem:[#allocation8 + $0x198] sm:$0xf0]  ;;  %v8359_v50 = vld [vmem:[#allocation8 + $0x28c] sm:$0xf]  ;;  %v6972_v51 = vor.u32 %v8295_v44, %v6969_v45  ;;  %v8468_v44 = vld [vmem:[#allocation9 + $0x1ec] sm:$0xf0] }
 0x2ba   : > { %4172 = vmatpush.bf16.msra.mxu3 %v7304_v62  ;;  %v7225_v4 = vld [vmem:[#allocation8 + $0x298] sm:$0xf0]  ;;  %v8391_v52 = vld [vmem:[#allocation8 + $0x38c] sm:$0xf]  ;;  %v7100_v55 = vor.u32 %v8327_v42, %v7097_v47  ;;  %v7775_v42 = vld [vmem:[#allocation9 + $0x2e0] sm:$0xf] }
 0x2bb   : > { %4131 = vmatpush.bf16.msra.mxu0 %v6904_v63  ;;  %4145 = vmatpush.bf16.msra.mxu1 %v7032_v2  ;;  %v7353_v53 = vld [vmem:[#allocation8 + $0x398] sm:$0xf0]  ;;  %v8291_v12 = vld [vmem:[#allocation8 + $0x6c] sm:$0xf]  ;;  %v7228_v48 = vor.u32 %v8359_v50, %v7225_v4  ;;  %v8500_v47 = vld [vmem:[#allocation9 + $0x2ec] sm:$0xf0] }
 0x2bc   : > { %4159 = vmatpush.bf16.msra.mxu2 %v7160_v8  ;;  %v6953_v13 = vld [vmem:[#allocation8 + $0x78] sm:$0xf0]  ;;  %v8323_v54 = vld [vmem:[#allocation8 + $0x16c] sm:$0xf]  ;;  %v7356_v58 = vor.u32 %v8391_v52, %v7353_v53  ;;  %v7903_v4 = vld [vmem:[#allocation9 + $0x3e0] sm:$0xf] }
 0x2bd   : > { %v7081_v57 = vld [vmem:[#allocation8 + $0x178] sm:$0xf0]  ;;  %v8355_v59 = vld [vmem:[#allocation8 + $0x26c] sm:$0xf]  ;;  %v6956_v61 = vor.u32 %v8291_v12, %v6953_v13  ;;  %v8432_v12 = vld [vmem:[#allocation9 + $0xcc] sm:$0xf0] }
 0x2be   : > { %4173 = vmatpush.bf16.msra.mxu3 %v7288_v14  ;;  %4132 = vmatmul.bf16.vlgmr.msra.gmra.mxu0 %v10258_v1  ;;  %v7209_v60 = vld [vmem:[#allocation8 + $0x278] sm:$0xf0]  ;;  %v8387_v62 = vld [vmem:[#allocation8 + $0x36c] sm:$0xf]  ;;  %v7084_v34 = vor.u32 %v8323_v54, %v7081_v57  ;;  %v7631_v54 = vld [vmem:[#allocation9 + $0x1c0] sm:$0xf] }
 0x2bf   : > { %4180 = vmatpush.bf16.msrb.mxu0 %v7020_v3  ;;  %4194 = vmatpush.bf16.msrb.mxu1 %v7148_v9  ;;  %v7337_v33 = vld [vmem:[#allocation8 + $0x378] sm:$0xf0]  ;;  %v8287_v56 = vld [vmem:[#allocation8 + $0x4c] sm:$0xf]  ;;  %v7212_v0 = vor.u32 %v8355_v59, %v7209_v60  ;;  %v8464_v57 = vld [vmem:[#allocation9 + $0x1cc] sm:$0xf0] }
 0x2c0   : > { %4208 = vmatpush.bf16.msrb.mxu2 %v7276_v15  ;;  %4146 = vmatmul.bf16.vlgmr.msra.gmra.mxu1 %v10261_v16  ;;  %v6937_v63 = vld [vmem:[#allocation8 + $0x58] sm:$0xf0]  ;;  %v8319_v38 = vld [vmem:[#allocation8 + $0x14c] sm:$0xf]  ;;  %v7340_v2 = vor.u32 %v8387_v62, %v7337_v33  ;;  %v7759_v59 = vld [vmem:[#allocation9 + $0x2c0] sm:$0xf] }
 0x2c1   : > { %4160 = vmatmul.bf16.vlgmr.msra.gmra.mxu2 %v10240_v19  ;;  %4174 = vmatmul.bf16.vlgmr.msra.gmra.mxu3 %v10252_v43  ;;  %v7065_v39 = vld [vmem:[#allocation8 + $0x158] sm:$0xf0]  ;;  %v8351_v3 = vld [vmem:[#allocation8 + $0x24c] sm:$0xf]  ;;  %v6940_v7 = vor.u32 %v8287_v56, %v6937_v63  ;;  %v8496_v60 = vld [vmem:[#allocation9 + $0x2cc] sm:$0xf0] }
 0x2c2   : > { %4222 = vmatpush.bf16.msrb.mxu3 %v7404_v20  ;;  %v7193_v5 = vld [vmem:[#allocation8 + $0x258] sm:$0xf0]  ;;  %v8383_v8 = vld [vmem:[#allocation8 + $0x34c] sm:$0xf]  ;;  %v7068_v10 = vor.u32 %v8319_v38, %v7065_v39  ;;  %v7887_v62 = vld [vmem:[#allocation9 + $0x3c0] sm:$0xf] }
 0x2c3   : > { %4181 = vmatpush.bf16.msrb.mxu0 %v7004_v23  ;;  %4195 = vmatpush.bf16.msrb.mxu1 %v7132_v26  ;;  %v7321_v9 = vld [vmem:[#allocation8 + $0x358] sm:$0xf0]  ;;  %v8283_v11 = vld [vmem:[#allocation8 + $0x2c] sm:$0xf]  ;;  %v7196_v15 = vor.u32 %v8351_v3, %v7193_v5  ;;  %v8528_v33 = vld [vmem:[#allocation9 + $0x3cc] sm:$0xf0] }
 0x2c4   : > { %4209 = vmatpush.bf16.msrb.mxu2 %v7260_v29  ;;  %v6921_v14 = vld [vmem:[#allocation8 + $0x38] sm:$0xf0]  ;;  %v8315_v17 = vld [vmem:[#allocation8 + $0x12c] sm:$0xf]  ;;  %v7324_v20 = vor.u32 %v8383_v8, %v7321_v9  ;;  %v7487_v56 = vld [vmem:[#allocation9 + $0xa0] sm:$0xf] }
 0x2c5   : > { %v7049_v18 = vld [vmem:[#allocation8 + $0x138] sm:$0xf0]  ;;  %v8347_v21 = vld [vmem:[#allocation8 + $0x22c] sm:$0xf]  ;;  %v6924_v24 = vor.u32 %v8283_v11, %v6921_v14  ;;  %v8428_v63 = vld [vmem:[#allocation9 + $0xac] sm:$0xf0] }
 0x2c6   : > { %4223 = vmatpush.bf16.msrb.mxu3 %v7388_v32  ;;  %v7177_v22 = vld [vmem:[#allocation8 + $0x238] sm:$0xf0]  ;;  %v8379_v23 = vld [vmem:[#allocation8 + $0x32c] sm:$0xf]  ;;  %v7052_v28 = vor.u32 %v8315_v17, %v7049_v18  ;;  %v7615_v38 = vld [vmem:[#allocation9 + $0x1a0] sm:$0xf]  ;;  %v7488_v8 = vor.u32 %v8428_v63, %v7487_v56 }
 0x2c7   : > { %4182 = vmatpush.bf16.msrb.mxu0 %v6988_v6  ;;  %4196 = vmatpush.bf16.msrb.mxu1 %v7116_v41  ;;  %v7305_v25 = vld [vmem:[#allocation8 + $0x338] sm:$0xf0]  ;;  %v8279_v26 = vld [vmem:[#allocation8 + $0xc] sm:$0xf]  ;;  %v7180_v32 = vor.u32 %v8347_v21, %v7177_v22  ;;  %v8436_v6 = vld [vmem:[#allocation9 + $0xec] sm:$0xf0] }
 0x2c8   : > { %4210 = vmatpush.bf16.msrb.mxu2 %v7244_v46  ;;  %v6905_v27 = vld [vmem:[#allocation8 + $0x18] sm:$0xf0]  ;;  %v8311_v29 = vld [vmem:[#allocation8 + $0x10c] sm:$0xf]  ;;  %v7308_v37 = vor.u32 %v8379_v23, %v7305_v25  ;;  %v7647_v41 = vld [vmem:[#allocation9 + $0x1e0] sm:$0xf]  ;;  %v7520_v50 = vor.u32 %v8436_v6, %v7519_v36 }
 0x2c9   : > { %v7033_v30 = vld [vmem:[#allocation8 + $0x118] sm:$0xf0]  ;;  %v8343_v31 = vld [vmem:[#allocation8 + $0x20c] sm:$0xf]  ;;  %v6908_v45 = vor.u32 %v8279_v26, %v6905_v27  ;;  %v7648_v53 = vor.u32 %v8468_v44, %v7647_v41  ;;  %v8460_v39 = vld [vmem:[#allocation9 + $0x1ac] sm:$0xf0] }
 0x2ca   : > { %4224 = vmatpush.bf16.msrb.mxu3 %v7372_v49  ;;  %v7161_v35 = vld [vmem:[#allocation8 + $0x218] sm:$0xf0]  ;;  %v8375_v40 = vld [vmem:[#allocation8 + $0x30c] sm:$0xf]  ;;  %v7036_v49 = vor.u32 %v8311_v29, %v7033_v30  ;;  %v7743_v3 = vld [vmem:[#allocation9 + $0x2a0] sm:$0xf]  ;;  %v7616_v14 = vor.u32 %v8460_v39, %v7615_v38 }
 0x2cb   : > { %4183 = vmatpush.bf16.msrb.mxu0 %v6972_v51  ;;  %4197 = vmatpush.bf16.msrb.mxu1 %v7100_v55  ;;  %v7289_v46 = vld [vmem:[#allocation8 + $0x318] sm:$0xf0]  ;;  %v8532_v51 = vld [vmem:[#allocation9 + $0x3ec] sm:$0xf0]  ;;  %v7164_v52 = vor.u32 %v8343_v31, %v7161_v35  ;;  %v7503_v55 = vld [vmem:[#allocation9 + $0xc0] sm:$0xf] }
 0x2cc   : > { %4211 = vmatpush.bf16.msrb.mxu2 %v7228_v48  ;;  %v7292_v13 = vor.u32 %v8375_v40, %v7289_v46  ;;  %v7776_v48 = vor.u32 %v8500_v47, %v7775_v42  ;;  %v8492_v5 = vld [vmem:[#allocation9 + $0x2ac] sm:$0xf0]  ;;  %v10279_v18 = vld [vmem:[#allocation9 + $0x280] sm:$0xf]  ;;  %v3076_v29 = vld [vmem:[#allocation2 + $0x138] sm:$0xff] }
 0x2cd   : > { %v8524_v9 = vld [vmem:[#allocation9 + $0x3ac] sm:$0xf0]  ;;  %v10288_v22 = vld [vmem:[#allocation9 + $0x60] sm:$0xf]  ;;  %v3080_v6 = vld [vmem:[#allocation2 + $0x1b8] sm:$0xff] }
 0x2ce   : > { %4225 = vmatpush.bf16.msrb.mxu3 %v7356_v58  ;;  %v7904_v58 = vor.u32 %v8532_v51, %v7903_v4  ;;  %v8424_v11 = vld [vmem:[#allocation9 + $0x8c] sm:$0xf0]  ;;  %v10296_v26 = vld [vmem:[#allocation9 + $0x260] sm:$0xf] }
 0x2cf   : > { %4184 = vmatpush.bf16.msrb.mxu0 %v6956_v61  ;;  %4198 = vmatpush.bf16.msrb.mxu1 %v7084_v34  ;;  %v7504_v61 = vor.u32 %v8432_v12, %v7503_v55  ;;  %v7632_v34 = vor.u32 %v8464_v57, %v7631_v54  ;;  %v10277_v17 = vld [vmem:[#allocation9 + $0x18c] sm:$0xf0]  ;;  %v10300_v27 = vld [vmem:[#allocation9 + $0x360] sm:$0xf] }
 0x2d0   : > { %4212 = vmatpush.bf16.msrb.mxu2 %v7212_v0  ;;  %v7760_v0 = vor.u32 %v8496_v60, %v7759_v59  ;;  %v10286_v21 = vld [vmem:[#allocation9 + $0x38c] sm:$0xf0]  ;;  %v10304_v31 = vld [vmem:[#allocation9 + $0x40] sm:$0xf] }
 0x2d1   : > { %v10290_v23 = vld [vmem:[#allocation9 + $0x6c] sm:$0xf0]  ;;  %v10308_v35 = vld [vmem:[#allocation9 + $0x140] sm:$0xf] }
 0x2d2   : > { %4226 = vmatpush.bf16.msrb.mxu3 %v7340_v2  ;;  %v7888_v2 = vor.u32 %v8528_v33, %v7887_v62  ;;  %v10294_v25 = vld [vmem:[#allocation9 + $0x16c] sm:$0xf0]  ;;  %v10314_v40 = vld [vmem:[#allocation9 + $0x240] sm:$0xf]  ;;  %v3108_v62 = vld [vmem:[#allocation2 + $0xa8] sm:$0xff] }
 0x2d3   : > { %4185 = vmatpush.bf16.msrb.mxu0 %v6940_v7  ;;  %4199 = vmatpush.bf16.msrb.mxu1 %v7068_v10  ;;  %v7871_v7 = vld [vmem:[#allocation9 + $0x3a0] sm:$0xf]  ;;  %v10310_v36 = vld [vmem:[#allocation9 + $0x14c] sm:$0xf0] }
 0x2d4   : > { %4213 = vmatpush.bf16.msrb.mxu2 %v7196_v15  ;;  %v7471_v10 = vld [vmem:[#allocation9 + $0x80] sm:$0xf]  ;;  %v10316_v41 = vld [vmem:[#allocation9 + $0x24c] sm:$0xf0] }
 0x2d5   : > { %v10275_v15 = vld [vmem:[#allocation9 + $0x180] sm:$0xf]  ;;  %v7472_v30 = vor.u32 %v8424_v11, %v7471_v10  ;;  %v10324_v42 = vld [vmem:[#allocation9 + $0x2c] sm:$0xf0]  ;;  %v10374_v10 = vld [vmem:[#allocation9 + $0x1e4] sm:$0xf] }
 0x2d6   : > { %4227 = vmatpush.bf16.msrb.mxu3 %v7324_v20  ;;  %v10284_v20 = vld [vmem:[#allocation9 + $0x380] sm:$0xf]  ;;  %v3084_v47 = vld [vmem:[#allocation2 + $0x160] sm:$0xff]  ;;  %v10376_v11 = vld [vmem:[#allocation9 + $0x1f0] sm:$0xf0] }
 0x2d7   : > { %4186 = vmatpush.bf16.msrb.mxu0 %v6924_v24  ;;  %4200 = vmatpush.bf16.msrb.mxu1 %v7052_v28  ;;  %v10292_v24 = vld [vmem:[#allocation9 + $0x160] sm:$0xf]  ;;  %v10302_v28 = vld [vmem:[#allocation9 + $0x36c] sm:$0xf0] }
 0x2d8   : > { %4214 = vmatpush.bf16.msrb.mxu2 %v7180_v32  ;;  %v10306_v32 = vld [vmem:[#allocation9 + $0x4c] sm:$0xf0]  ;;  %v10318_v44 = vld [vmem:[#allocation9 + $0x340] sm:$0xf]  ;;  %v7584_v56 = vor.u32 %v10294_v25, %v10292_v24 }
 0x2d9   : > { %v10322_v46 = vld [vmem:[#allocation9 + $0x20] sm:$0xf]  ;;  %v10330_v51 = vld [vmem:[#allocation9 + $0x12c] sm:$0xf0] }
 0x2da   : > { %4228 = vmatpush.bf16.msrb.mxu3 %v7308_v37  ;;  %v7600_v37 = vor.u32 %v10277_v17, %v10275_v15  ;;  %v10328_v4 = vld [vmem:[#allocation9 + $0x120] sm:$0xf]  ;;  %v10338_v12 = vld [vmem:[#allocation9 + $0x32c] sm:$0xf0]  ;;  %v10378_v17 = vld [vmem:[#allocation6] sm:$0xf] }
 0x2db   : > { %4187 = vmatpush.bf16.msrb.mxu0 %v6908_v45  ;;  %4201 = vmatpush.bf16.msrb.mxu1 %v7036_v49  ;;  %v10320_v45 = vld [vmem:[#allocation9 + $0x34c] sm:$0xf0]  ;;  %v3176_v49 = vmax.f32 %v3076_v29, %v3080_v6  ;;  %v10336_v55 = vld [vmem:[#allocation9 + $0x320] sm:$0xf]  ;;  %v3083_v29 = vld [vmem:[#allocation2 + $0xf8] sm:$0xff] }
 0x2dc   : > { %4215 = vmatpush.bf16.msrb.mxu2 %v7164_v52  ;;  %v10332_v52 = vld [vmem:[#allocation9 + $0x220] sm:$0xf]  ;;  %v10344_v54 = vld [vmem:[#allocation9 + $0xc] sm:$0xf0]  ;;  %v7808_v25 = vor.u32 %v10338_v12, %v10336_v55 }
 0x2dd   : > { %v10346_v57 = vld [vmem:[#allocation9 + $0x100] sm:$0xf]  ;;  %v10352_v60 = vld [vmem:[#allocation9 + $0x20c] sm:$0xf0]  ;;  %v3184_v33 = vmax.f32 %v3176_v49, %v3084_v47  ;;  %v3109_v49 = vld [vmem:[#allocation2 + $0x1c8] sm:$0xff] }
 0x2de   : > { %4229 = vmatpush.bf16.msrb.mxu3 %v7292_v13  ;;  %4188 = vmatmul.bf16.vlgmr.msrb.gmra.mxu0 %v10258_v1  ;;  %v7744_v1 = vor.u32 %v8492_v5, %v7743_v3  ;;  %v7856_v13 = vor.u32 %v10286_v21, %v10284_v20  ;;  %v10350_v59 = vld [vmem:[#allocation9 + $0x200] sm:$0xf]  ;;  %v10364_v39 = vld [vmem:[#allocation9 + $0x30c] sm:$0xf0]  ;;  %v10368_v3 = vld [vmem:[#allocation9 + $0xf0] sm:$0xf0] }
 0x2df   : > { %5004 = vmatpush.bf16.msra.mxu0 %v7520_v50  ;;  %5018 = vmatpush.bf16.msra.mxu1 %v7648_v53  ;;  %v10334_v53 = vld [vmem:[#allocation9 + $0x22c] sm:$0xf0]  ;;  %v10362_v38 = vld [vmem:[#allocation9 + $0x300] sm:$0xf]  ;;  %v3112_v5 = vld [vmem:[#allocation2 + $0x68] sm:$0xff] }
 0x2e0   : > { %5032 = vmatpush.bf16.msra.mxu2 %v7776_v48  ;;  %4202 = vmatmul.bf16.vlgmr.msrb.gmra.mxu1 %v10261_v16  ;;  %v10298_v16 = vld [vmem:[#allocation9 + $0x26c] sm:$0xf0]  ;;  %v10342_v48 = vld [vmem:[#allocation9] sm:$0xf]  ;;  %v10386_v20 = vld [vmem:[#allocation9 + $0x2e4] sm:$0xf]  ;;  %v7680_v24 = vor.u32 %v10334_v53, %v10332_v52 }
 0x2e1   : > { %4216 = vmatmul.bf16.vlgmr.msrb.gmra.mxu2 %v10240_v19  ;;  %4230 = vmatmul.bf16.vlgmr.msrb.gmra.mxu3 %v10252_v43  ;;  %v10282_v19 = vld [vmem:[#allocation9 + $0x28c] sm:$0xf0]  ;;  %v7872_v43 = vor.u32 %v8524_v9, %v7871_v7  ;;  %v7712_v63 = vor.u32 %v10298_v16, %v10296_v26  ;;  %v7568_v9 = vor.u32 %v10310_v36, %v10308_v35  ;;  %v3120_v21 = vld [vmem:[#allocation2 + $0x58] sm:$0xff]  ;;  %v10395_v26 = vld [vmem:[#allocation9 + $0x2f0] sm:$0xf0] }
 0x2e2   : > { %5046 = vmatpush.bf16.msra.mxu3 %v7904_v58  ;;  %v7728_v50 = vor.u32 %v10282_v19, %v10279_v18  ;;  %v10348_v58 = vld [vmem:[#allocation9 + $0x10c] sm:$0xf0]  ;;  %v7696_v18 = vor.u32 %v10316_v41, %v10314_v40  ;;  %v7424_v19 = vor.u32 %v10324_v42, %v10322_v46  ;;  %v10397_v16 = vld [vmem:[#allocation9 + $0x3e4] sm:$0xf]  ;;  %v3081_v36 = vld [vmem:[#allocation2 + $0x28] sm:$0xff]  ;;  %v10633_v52 = vor.u32 %v10344_v54, %v10342_v48 }
 0x2e3   : > { %5005 = vmatpush.bf16.msra.mxu0 %v7504_v61  ;;  %5019 = vmatpush.bf16.msra.mxu1 %v7632_v34  ;;  %v3088_v61 = vld [vmem:[#allocation2 + $0xf0] sm:$0xff]  ;;  %v7456_v34 = vor.u32 %v10290_v23, %v10288_v22  ;;  %v3116_v7 = vld [vmem:[#allocation2 + $0xc0] sm:$0xff]  ;;  %v7552_v23 = vor.u32 %v10330_v51, %v10328_v4  ;;  %v10413_v41 = vld [vmem:[#allocation9 + $0xd0] sm:$0xf0]  ;;  %v10634_v55 = vor.u32 %v10348_v58, %v10346_v57 }
 0x2e4   : > { %5033 = vmatpush.bf16.msra.mxu2 %v7760_v0  ;;  %v7840_v0 = vor.u32 %v10302_v28, %v10300_v27  ;;  %v3192_v15 = vmax.f32 %v3184_v33, %v3088_v61  ;;  %v3077_v22 = vld [vmem:[#allocation2 + $0x140] sm:$0xff]  ;;  %v10399_v27 = vld [vmem:[#allocation9 + $0x3f0] sm:$0xf0]  ;;  %v3085_v6 = vld [vmem:[#allocation2 + $0x30] sm:$0xff]  ;;  %v10636_v54 = vor.u32 %v10352_v60, %v10350_v59  ;;  %v10639_v59 = vor.u32 %v10386_v20, %v10395_v26 }
 0x2e5   : > { %v3106_v33 = vld [vmem:[#allocation2 + $0xb8] sm:$0xff]  ;;  %v3110_v61 = vld [vmem:[#allocation2 + $0x170] sm:$0xff]  ;;  %v7889_v53 = vld [vmem:[#allocation9 + $0x3d0] sm:$0xf0] }
 0x2e6   : > { %5047 = vmatpush.bf16.msra.mxu3 %v7888_v2  ;;  %v10366_v2 = vld [vmem:[#allocation9 + $0xe4] sm:$0xf]  ;;  %v7489_v57 = vld [vmem:[#allocation9 + $0xb0] sm:$0xf0] }
 0x2e7   : > { %5006 = vmatpush.bf16.msra.mxu0 %v7488_v8  ;;  %5020 = vmatpush.bf16.msra.mxu1 %v7616_v14  ;;  %v7440_v8 = vor.u32 %v10306_v32, %v10304_v31  ;;  %v3180_v14 = vmax.f32 %v3108_v62, %v3112_v5  ;;  %v10407_v32 = vld [vmem:[#allocation9 + $0xc4] sm:$0xf]  ;;  %v3200_v62 = vperm.slane %v10378_v17, 0  ;;  %v10635_v12 = vor.u32 %v10366_v2, %v10368_v3 }
 0x2e8   : > { %5034 = vmatpush.bf16.msra.mxu2 %v7744_v1  ;;  %v7824_v1 = vor.u32 %v10320_v45, %v10318_v44  ;;  %v3114_v31 = vld [vmem:[#allocation2 + $0x198] sm:$0xff] }
 0x2e9   : > { %v3188_v28 = vmax.f32 %v3180_v14, %v3116_v7  ;;  %v3074_v7 = vld [vmem:[#allocation2 + $0xe0] sm:$0xff]  ;;  %v8494_v51 = vld [vmem:[#allocation9 + $0x2c4] sm:$0xf] }
 0x2ea   : > { %5048 = vmatpush.bf16.msra.mxu3 %v7872_v43  ;;  %v3202_v43 = vperm.slane %v10378_v17, 2  ;;  %v8458_v58 = vld [vmem:[#allocation9 + $0x1a4] sm:$0xf] }
 0x2eb   : > { %5007 = vmatpush.bf16.msra.mxu0 %v7472_v30  ;;  %5021 = vmatpush.bf16.msra.mxu1 %v7600_v37  ;;  %v3196_v47 = vmax.f32 %v3188_v28, %v3120_v21  ;;  %v3121_v21 = vld [vmem:[#allocation2 + $0xa0] sm:$0xff]  ;;  %v8522_v26 = vld [vmem:[#allocation9 + $0x3a4] sm:$0xf] }
 0x2ec   : > { %5035 = vmatpush.bf16.msra.mxu2 %v7728_v50  ;;  %v3210_v35 = vadd.f32 %v3202_v43, %v3192_v15  ;;  %v3113_v50 = vld [vmem:[#allocation2 + $0x190] sm:$0xff] }
 0x2ed   : > { %v3181_v5 = vmax.f32 %v3109_v49, %v3113_v50  ;;  %v3214_v14 = vadd.f32 %v3202_v43, %v3196_v47  ;;  %v3086_v47 = vld [vmem:[#allocation2 + $0x1e0] sm:$0xff]  ;;  %v3075_v50 = vld [vmem:[#allocation2 + $0x188] sm:$0xff] }
 0x2ee   : > { %5049 = vmatpush.bf16.msra.mxu3 %v7856_v13  ;;  %v3177_v13 = vmax.f32 %v3077_v22, %v3081_v36  ;;  %v3226_v15 = vmul.f32 0.01, %v3210_v35  ;;  %v3078_v22 = vld [vmem:[#allocation2 + $0x80] sm:$0xff]  ;;  %v3082_v36 = vld [vmem:[#allocation2 + $0x1e8] sm:$0xff]  ;;  %vm3218_vm8 = vcmp.ge.f32.partialorder %v3210_v35, 0.0 }
 0x2ef   : > { %5008 = vmatpush.bf16.msra.mxu0 %v7456_v34  ;;  %5022 = vmatpush.bf16.msra.mxu1 %v7584_v56  ;;  %v3089_v34 = vld [vmem:[#allocation2 + $0x8] sm:$0xff]  ;;  %v3117_v56 = vld [vmem:[#allocation2 + $0x1c0] sm:$0xff]  ;;  %v3174_v49 = vmax.f32 %v3074_v7, %v3078_v22  ;;  %vm3222_vm9 = vcmp.ge.f32.partialorder %v3214_v14, 0.0 }
 0x2f0   : > { %5036 = vmatpush.bf16.msra.mxu2 %v7712_v63  ;;  %v3185_v28 = vmax.f32 %v3177_v13, %v3085_v6  ;;  %v3203_v63 = vperm.slane %v10378_v17, 3  ;;  %v3189_v37 = vmax.f32 %v3181_v5, %v3117_v56  ;;  %v3178_v6 = vmax.f32 %v3106_v33, %v3110_v61  ;;  %v3079_v13 = vld [vmem:[#allocation2 + $0x1a8] sm:$0xff]  ;;  %v3111_v61 = vld [vmem:[#allocation2 + $0x178] sm:$0xff] }
 0x2f1   : > { %v3182_v30 = vmax.f32 %v3174_v49, %v3082_v36  ;;  %v3107_v56 = vld [vmem:[#allocation2 + $0x88] sm:$0xff]  ;;  %v3175_v5 = vmax.f32 %v3075_v50, %v3079_v13  ;;  %v3115_v33 = vld [vmem:[#allocation2 + $0x38] sm:$0xff]  ;;  %v10640_v13 = vor.u32 %v10397_v16, %v10399_v27 }
 0x2f2   : > { %5050 = vmatpush.bf16.msra.mxu3 %v7840_v0  ;;  %v3230_v0 = vmul.f32 0.01, %v3214_v14  ;;  %v3193_v43 = vmax.f32 %v3185_v28, %v3089_v34  ;;  %v3197_v40 = vmax.f32 %v3189_v37, %v3121_v21  ;;  %v3186_v7 = vmax.f32 %v3178_v6, %v3114_v31  ;;  %v10433_v37 = vld [vmem:[#allocation9 + $0x1c4] sm:$0xf]  ;;  %v10435_v21 = vld [vmem:[#allocation9 + $0x1d0] sm:$0xf0] }
 0x2f3   : > { %5009 = vmatpush.bf16.msra.mxu0 %v7440_v8  ;;  %5023 = vmatpush.bf16.msra.mxu1 %v7568_v9  ;;  %v3118_v8 = vld [vmem:[#allocation2 + $0x158] sm:$0xff]  ;;  %v3234_v9 = vsel %vm3218_vm8, %v3210_v35, %v3226_v15  ;;  %v3190_v45 = vmax.f32 %v3182_v30, %v3086_v47  ;;  %v3179_v35 = vmax.f32 %v3107_v56, %v3111_v61  ;;  %v3119_v15 = vld [vmem:[#allocation2 + $0x10] sm:$0xff]  ;;  %v7745_v56 = vld [vmem:[#allocation9 + $0x2b0] sm:$0xf0] }
 0x2f4   : > { %5037 = vmatpush.bf16.msra.mxu2 %v7696_v18  ;;  %v3211_v34 = vadd.f32 %v3203_v63, %v3193_v43  ;;  %v3201_v18 = vperm.slane %v10378_v17, 1  ;;  %v3238_v28 = vsel %vm3222_vm9, %v3214_v14, %v3230_v0  ;;  %v3215_v44 = vadd.f32 %v3203_v63, %v3197_v40  ;;  %v8526_v30 = vld [vmem:[#allocation9 + $0x3c4] sm:$0xf]  ;;  %v7617_v43 = vld [vmem:[#allocation9 + $0x1b0] sm:$0xf0] }
 0x2f5   : > { %v3194_v31 = vmax.f32 %v3186_v7, %v3118_v8  ;;  %v3183_v46 = vmax.f32 %v3175_v5, %v3083_v29  ;;  %v3187_v40 = vmax.f32 %v3179_v35, %v3115_v33  ;;  %v7636_v4 = vor.u32 %v10433_v37, %v10435_v21  ;;  %v8490_v50 = vld [vmem:[#allocation9 + $0x2a4] sm:$0xf]  ;;  %v7473_v27 = vld [vmem:[#allocation9 + $0x90] sm:$0xf0] }
 0x2f6   : > { %5051 = vmatpush.bf16.msra.mxu3 %v7824_v1  ;;  %v3087_v1 = vld [vmem:[#allocation2] sm:$0xff]  ;;  %vm3219_vm10 = vcmp.ge.f32.partialorder %v3211_v34, 0.0  ;;  %v3227_v17 = vmul.f32 0.01, %v3211_v34  ;;  %vm3223_vm11 = vcmp.ge.f32.partialorder %v3215_v44, 0.0  ;;  %v10637_v0 = vor.u32 %v10374_v10, %v10376_v11 }
 0x2f7   : > { %5010 = vmatpush.bf16.msra.mxu0 %v7424_v19  ;;  %5024 = vmatpush.bf16.msra.mxu1 %v7552_v23  ;;  %v3231_v42 = vmul.f32 0.01, %v3215_v44  ;;  %v3208_v19 = vadd.f32 %v3200_v62, %v3190_v45  ;;  %v7761_v23 = vld [vmem:[#allocation9 + $0x2d0] sm:$0xf0]  ;;  %v3212_v29 = vadd.f32 %v3200_v62, %v3194_v31  ;;  %v3191_v63 = vmax.f32 %v3183_v46, %v3087_v1  ;;  %v8422_v16 = vld [vmem:[#allocation9 + $0x84] sm:$0xf] }
 0x2f8   : > { %5038 = vmatpush.bf16.msra.mxu2 %v7680_v24  ;;  %v3235_v14 = vsel %vm3219_vm10, %v3211_v34, %v3227_v17  ;;  %v3195_v36 = vmax.f32 %v3187_v40, %v3119_v15  ;;  %v10458_v62 = vpack.c.bf16 %v3238_v28, %v3234_v9  ;;  %v10638_v6 = vor.u32 %v10364_v39, %v10362_v38  ;;  %v7873_v9 = vld [vmem:[#allocation9 + $0x3b0] sm:$0xf0]  ;;  %v8486_v21 = vld [vmem:[#allocation9 + $0x284] sm:$0xf] }
 0x2f9   : > { %v3239_v24 = vsel %vm3223_vm11, %v3215_v44, %v3231_v42  ;;  %vm3216_vm12 = vcmp.ge.f32.partialorder %v3208_v19, 0.0  ;;  %v3224_v22 = vmul.f32 0.01, %v3208_v19  ;;  %vm3220_vm13 = vcmp.ge.f32.partialorder %v3212_v29, 0.0  ;;  %v7601_v37 = vld [vmem:[#allocation9 + $0x190] sm:$0xf0] }
 0x2fa   : > { %5052 = vmatpush.bf16.msra.mxu3 %v7808_v25  ;;  %v8426_v25 = vld [vmem:[#allocation9 + $0xa4] sm:$0xf]  ;;  %v3228_v49 = vmul.f32 0.01, %v3212_v29  ;;  %v3209_v48 = vadd.f32 %v3201_v18, %v3191_v63  ;;  %v10466_v47 = vpack.c.bf16 %v3239_v24, %v3235_v14  ;;  %v3213_v3 = vadd.f32 %v3201_v18, %v3195_v36  ;;  %v7729_v28 = vld [vmem:[#allocation9 + $0x290] sm:$0xf0] }
 0x2fb   : > { %5011 = vmatpush.bf16.msra.mxu0 %v10633_v52  ;;  %5025 = vmatpush.bf16.msra.mxu1 %v10634_v55  ;;  %v3232_v2 = vsel %vm3216_vm12, %v3208_v19, %v3224_v22  ;;  %v7764_v60 = vor.u32 %v8494_v51, %v7761_v23  ;;  %v7892_v8 = vor.u32 %v8526_v30, %v7889_v53  ;;  %v8454_v18 = vld [vmem:[#allocation9 + $0x184] sm:$0xf]  ;;  %v7857_v1 = vld [vmem:[#allocation9 + $0x390] sm:$0xf0]  ;;  %vm5641_vm9 = vcmask 64512  }
 0x2fc   : > { %5039 = vmatpush.bf16.msra.mxu2 %v10636_v54  ;;  %v3236_v10 = vsel %vm3220_vm13, %v3212_v29, %v3228_v49  ;;  %vm3217_vm14 = vcmp.ge.f32.partialorder %v3209_v48, 0.0  ;;  %v3225_v11 = vmul.f32 0.01, %v3209_v48  ;;  %vm3221_vm15 = vcmp.ge.f32.partialorder %v3213_v3, 0.0  ;;  %v8518_v45 = vld [vmem:[#allocation9 + $0x384] sm:$0xf] }
 0x2fd   : > { %v10478_v5 = vpack.c.bf16 %v3236_v10, %v3232_v2  ;;  %v3229_v38 = vmul.f32 0.01, %v3213_v3  ;;  %v10641_v39 = vor.u32 %v10407_v32, %v10413_v41  ;;  %v7492_v20 = vor.u32 %v8426_v25, %v7489_v57  ;;  %v8418_v17 = vld [vmem:[#allocation9 + $0x64] sm:$0xf]  ;;  %v7457_v31 = vld [vmem:[#allocation9 + $0x70] sm:$0xf0] }
 0x2fe   : > { %5053 = vmatpush.bf16.msra.mxu3 %v10638_v6  ;;  %v3233_v34 = vsel %vm3217_vm14, %v3209_v48, %v3225_v11  ;;  %v7620_v7 = vor.u32 %v8458_v58, %v7617_v43  ;;  %v7748_v33 = vor.u32 %v8490_v50, %v7745_v56  ;;  %v7876_v41 = vor.u32 %v8522_v26, %v7873_v9  ;;  %v8450_v46 = vld [vmem:[#allocation9 + $0x164] sm:$0xf]  ;;  %v7585_v42 = vld [vmem:[#allocation9 + $0x170] sm:$0xf0]  ;;  %v7527_v26 = vld [vmem:[#allocation9 + $0xe8] sm:$0xf] }
 0x2ff   : > { %5060 = vmatpush.bf16.msrb.mxu0 %v10635_v12  ;;  %5074 = vmatpush.bf16.msrb.mxu1 %v10637_v0  ;;  %v3237_v61 = vsel %vm3221_vm15, %v3213_v3, %v3229_v38  ;;  %v7476_v44 = vor.u32 %v8422_v16, %v7473_v27  ;;  %v7604_v35 = vor.u32 %v8454_v18, %v7601_v37  ;;  %v8482_v40 = vld [vmem:[#allocation9 + $0x264] sm:$0xf]  ;;  %v7841_v30 = vld [vmem:[#allocation9 + $0x370] sm:$0xf0]  ;;  %v8437_v9 = vld [vmem:[#allocation9 + $0xf4] sm:$0xf0] }
 0x300   : > { %5088 = vmatpush.bf16.msrb.mxu2 %v10639_v59  ;;  %5012 = vmatmul.bf16.vlgmr.msra.gmra.mxu0 %v10478_v5  ;;  %v10486_v32 = vpack.c.bf16 %v3237_v61, %v3233_v34  ;;  %v7732_v15 = vor.u32 %v8486_v21, %v7729_v28  ;;  %v7860_v19 = vor.u32 %v8518_v45, %v7857_v1  ;;  %v8514_v23 = vld [vmem:[#allocation9 + $0x364] sm:$0xf]  ;;  %v7441_v63 = vld [vmem:[#allocation9 + $0x50] sm:$0xf0]  ;;  %v7655_v16 = vld [vmem:[#allocation9 + $0x1e8] sm:$0xf] }
 0x301   : > { %5040 = vmatmul.bf16.vlgmr.msra.gmra.mxu2 %v10458_v62  ;;  %5054 = vmatmul.bf16.vlgmr.msra.gmra.mxu3 %v10466_v47  ;;  %v7460_v51 = vor.u32 %v8418_v17, %v7457_v31  ;;  %v7588_v14 = vor.u32 %v8450_v46, %v7585_v42  ;;  %v8414_v29 = vld [vmem:[#allocation9 + $0x44] sm:$0xf]  ;;  %v7569_v24 = vld [vmem:[#allocation9 + $0x150] sm:$0xf0]  ;;  %v7844_v22 = vor.u32 %v8514_v23, %v7841_v30  ;;  %v8469_v27 = vld [vmem:[#allocation9 + $0x1f4] sm:$0xf0] }
 0x302   : > { %5102 = vmatpush.bf16.msrb.mxu3 %v10640_v13  ;;  %5026 = vmatmul.bf16.vlgmr.msra.gmra.mxu1 %v10486_v32  ;;  %v8446_v53 = vld [vmem:[#allocation9 + $0x144] sm:$0xf]  ;;  %v7697_v55 = vld [vmem:[#allocation9 + $0x250] sm:$0xf0]  ;;  %v7444_v12 = vor.u32 %v8414_v29, %v7441_v63  ;;  %v7783_v18 = vld [vmem:[#allocation9 + $0x2e8] sm:$0xf]  ;;  %v7528_v21 = vor.u32 %v8437_v9, %v7527_v26  ;;  %v7656_v1 = vor.u32 %v8469_v27, %v7655_v16 }
 0x303   : > { %5061 = vmatpush.bf16.msrb.mxu0 %v10641_v39  ;;  %5075 = vmatpush.bf16.msrb.mxu1 %v7636_v4  ;;  %v7713_v4 = vld [vmem:[#allocation9 + $0x270] sm:$0xf0]  ;;  %v8478_v36 = vld [vmem:[#allocation9 + $0x244] sm:$0xf]  ;;  %v7572_v48 = vor.u32 %v8446_v53, %v7569_v24  ;;  %v8501_v37 = vld [vmem:[#allocation9 + $0x2f4] sm:$0xf0] }
 0x304   : > { %5089 = vmatpush.bf16.msrb.mxu2 %v7764_v60  ;;  %v7716_v52 = vor.u32 %v8482_v40, %v7713_v4  ;;  %v8510_v25 = vld [vmem:[#allocation9 + $0x344] sm:$0xf]  ;;  %v7825_v49 = vld [vmem:[#allocation9 + $0x350] sm:$0xf0]  ;;  %v7700_v57 = vor.u32 %v8478_v36, %v7697_v55  ;;  %v7911_v28 = vld [vmem:[#allocation9 + $0x3e8] sm:$0xf] }
 0x305   : > { %v8410_v54 = vld [vmem:[#allocation9 + $0x24] sm:$0xf]  ;;  %v7425_v0 = vld [vmem:[#allocation9 + $0x30] sm:$0xf0]  ;;  %v7828_v2 = vor.u32 %v8510_v25, %v7825_v49  ;;  %v8433_v17 = vld [vmem:[#allocation9 + $0xd4] sm:$0xf0] }
 0x306   : > { %5103 = vmatpush.bf16.msrb.mxu3 %v7892_v8  ;;  %v8442_v58 = vld [vmem:[#allocation9 + $0x124] sm:$0xf]  ;;  %v7553_v43 = vld [vmem:[#allocation9 + $0x130] sm:$0xf0]  ;;  %v7428_v60 = vor.u32 %v8410_v54, %v7425_v0  ;;  %v7639_v46 = vld [vmem:[#allocation9 + $0x1c8] sm:$0xf] }
 0x307   : > { %5062 = vmatpush.bf16.msrb.mxu0 %v7492_v20  ;;  %5076 = vmatpush.bf16.msrb.mxu1 %v7620_v7  ;;  %v8474_v3 = vld [vmem:[#allocation9 + $0x224] sm:$0xf]  ;;  %v7681_v6 = vld [vmem:[#allocation9 + $0x230] sm:$0xf0]  ;;  %v7556_v13 = vor.u32 %v8442_v58, %v7553_v43  ;;  %v8465_v42 = vld [vmem:[#allocation9 + $0x1d4] sm:$0xf0] }
 0x308   : > { %5090 = vmatpush.bf16.msrb.mxu2 %v7748_v33  ;;  %v8506_v59 = vld [vmem:[#allocation9 + $0x324] sm:$0xf]  ;;  %v7809_v50 = vld [vmem:[#allocation9 + $0x330] sm:$0xf0]  ;;  %v7684_v39 = vor.u32 %v8474_v3, %v7681_v6  ;;  %v7767_v40 = vld [vmem:[#allocation9 + $0x2c8] sm:$0xf] }
 0x309   : > { %v8406_v10 = vld [vmem:[#allocation9 + $0x4] sm:$0xf]  ;;  %v7409_v11 = vld [vmem:[#allocation9 + $0x10] sm:$0xf0]  ;;  %v7812_v34 = vor.u32 %v8506_v59, %v7809_v50  ;;  %v8497_v4 = vld [vmem:[#allocation9 + $0x2d4] sm:$0xf0] }
 0x30a   : > { %5104 = vmatpush.bf16.msrb.mxu3 %v7876_v41  ;;  %v8438_v8 = vld [vmem:[#allocation9 + $0x104] sm:$0xf]  ;;  %v7537_v56 = vld [vmem:[#allocation9 + $0x110] sm:$0xf0]  ;;  %v7412_v61 = vor.u32 %v8406_v10, %v7409_v11  ;;  %v7895_v23 = vld [vmem:[#allocation9 + $0x3c8] sm:$0xf] }
 0x30b   : > { %5063 = vmatpush.bf16.msrb.mxu0 %v7476_v44  ;;  %5077 = vmatpush.bf16.msrb.mxu1 %v7604_v35  ;;  %v8470_v38 = vld [vmem:[#allocation9 + $0x204] sm:$0xf]  ;;  %v7665_v20 = vld [vmem:[#allocation9 + $0x210] sm:$0xf0]  ;;  %v7540_v41 = vor.u32 %v8438_v8, %v7537_v56  ;;  %v8533_v44 = vld [vmem:[#allocation9 + $0x3f4] sm:$0xf0] }
 0x30c   : > { %5091 = vmatpush.bf16.msrb.mxu2 %v7732_v15  ;;  %v8502_v7 = vld [vmem:[#allocation9 + $0x304] sm:$0xf]  ;;  %v7793_v33 = vld [vmem:[#allocation9 + $0x310] sm:$0xf0]  ;;  %v7668_v45 = vor.u32 %v8470_v38, %v7665_v20  ;;  %v7511_v35 = vld [vmem:[#allocation9 + $0xc8] sm:$0xf]  ;;  %v7784_v15 = vor.u32 %v8501_v37, %v7783_v18 }
 0x30d   : > { %v7796_v31 = vor.u32 %v8502_v7, %v7793_v33  ;;  %v8529_v30 = vld [vmem:[#allocation9 + $0x3d4] sm:$0xf0]  ;;  %v7495_v29 = vld [vmem:[#allocation9 + $0xa8] sm:$0xf] }
 0x30e   : > { %5105 = vmatpush.bf16.msrb.mxu3 %v7860_v19  ;;  %v7912_v19 = vor.u32 %v8533_v44, %v7911_v28  ;;  %v8429_v63 = vld [vmem:[#allocation9 + $0xb4] sm:$0xf0]  ;;  %v7623_v53 = vld [vmem:[#allocation9 + $0x1a8] sm:$0xf] }
 0x30f   : > { %5064 = vmatpush.bf16.msrb.mxu0 %v7460_v51  ;;  %5078 = vmatpush.bf16.msrb.mxu1 %v7588_v14  ;;  %v7512_v51 = vor.u32 %v8433_v17, %v7511_v35  ;;  %v7640_v14 = vor.u32 %v8465_v42, %v7639_v46  ;;  %v8461_v24 = vld [vmem:[#allocation9 + $0x1b4] sm:$0xf0]  ;;  %v7751_v36 = vld [vmem:[#allocation9 + $0x2a8] sm:$0xf] }
 0x310   : > { %5092 = vmatpush.bf16.msrb.mxu2 %v7716_v52  ;;  %v7768_v52 = vor.u32 %v8497_v4, %v7767_v40  ;;  %v8493_v55 = vld [vmem:[#allocation9 + $0x2b4] sm:$0xf0]  ;;  %v7879_v25 = vld [vmem:[#allocation9 + $0x3a8] sm:$0xf] }
 0x311   : > { %v8525_v49 = vld [vmem:[#allocation9 + $0x3b4] sm:$0xf0]  ;;  %v7479_v54 = vld [vmem:[#allocation9 + $0x88] sm:$0xf] }
 0x312   : > { %5106 = vmatpush.bf16.msrb.mxu3 %v7844_v22  ;;  %v7896_v22 = vor.u32 %v8529_v30, %v7895_v23  ;;  %v8425_v0 = vld [vmem:[#allocation9 + $0x94] sm:$0xf0]  ;;  %v7607_v58 = vld [vmem:[#allocation9 + $0x188] sm:$0xf] }
 0x313   : > { %5065 = vmatpush.bf16.msrb.mxu0 %v7444_v12  ;;  %5079 = vmatpush.bf16.msrb.mxu1 %v7572_v48  ;;  %v7496_v12 = vor.u32 %v8429_v63, %v7495_v29  ;;  %v7624_v48 = vor.u32 %v8461_v24, %v7623_v53  ;;  %v8457_v43 = vld [vmem:[#allocation9 + $0x194] sm:$0xf0]  ;;  %v7735_v3 = vld [vmem:[#allocation9 + $0x288] sm:$0xf]  ;;  %v7480_v59 = vor.u32 %v8425_v0, %v7479_v54  ;;  %v10493_v33 = vpop.f32.mrf.mxu0  ;;  %v10497_v53 = vpop.f32.mrf.mxu2  ;;  %v7529_v54 = vld [vmem:[#allocation9 + $0xf8] sm:$0xf0] }
 0x314   : > { %5093 = vmatpush.bf16.msrb.mxu2 %v7700_v57  ;;  %v7752_v57 = vor.u32 %v8493_v55, %v7751_v36  ;;  %v8489_v6 = vld [vmem:[#allocation9 + $0x294] sm:$0xf0]  ;;  %v7608_v10 = vor.u32 %v8457_v43, %v7607_v58  ;;  %v7463_v11 = vld [vmem:[#allocation9 + $0x68] sm:$0xf]  ;;  %v8467_v58 = vld [vmem:[#allocation9 + $0x1ec] sm:$0xf] }
 0x315   : > { %v8521_v50 = vld [vmem:[#allocation9 + $0x394] sm:$0xf0]  ;;  %v7736_v8 = vor.u32 %v8489_v6, %v7735_v3  ;;  %v7591_v56 = vld [vmem:[#allocation9 + $0x168] sm:$0xf]  ;;  %v10495_v17 = vpop.f32.mrf.mxu1  ;;  %v7657_v43 = vld [vmem:[#allocation9 + $0x1f8] sm:$0xf0] }
 0x316   : > { %5107 = vmatpush.bf16.msrb.mxu3 %v7828_v2  ;;  %v7880_v2 = vor.u32 %v8525_v49, %v7879_v25  ;;  %v8453_v38 = vld [vmem:[#allocation9 + $0x174] sm:$0xf0]  ;;  %v7719_v20 = vld [vmem:[#allocation9 + $0x268] sm:$0xf] }
 0x317   : > { %5066 = vmatpush.bf16.msrb.mxu0 %v7428_v60  ;;  %5080 = vmatpush.bf16.msrb.mxu1 %v7556_v13  ;;  %v7863_v60 = vld [vmem:[#allocation9 + $0x388] sm:$0xf]  ;;  %v8421_v13 = vld [vmem:[#allocation9 + $0x74] sm:$0xf0]  ;;  %v7592_v16 = vor.u32 %v8453_v38, %v7591_v56  ;;  %v7660_v56 = vor.u32 %v8467_v58, %v7657_v43  ;;  %v8431_v38 = vld [vmem:[#allocation9 + $0xcc] sm:$0xf] }
 0x318   : > { %5094 = vmatpush.bf16.msrb.mxu2 %v7684_v39  ;;  %v7864_v39 = vor.u32 %v8521_v50, %v7863_v60  ;;  %v8485_v26 = vld [vmem:[#allocation9 + $0x274] sm:$0xf0]  ;;  %v7464_v9 = vor.u32 %v8421_v13, %v7463_v11  ;;  %v7447_v27 = vld [vmem:[#allocation9 + $0x48] sm:$0xf]  ;;  %v7785_v60 = vld [vmem:[#allocation9 + $0x2f8] sm:$0xf0] }
 0x319   : > { %v8517_v7 = vld [vmem:[#allocation9 + $0x374] sm:$0xf0]  ;;  %v7720_v18 = vor.u32 %v8485_v26, %v7719_v20  ;;  %v7575_v37 = vld [vmem:[#allocation9 + $0x148] sm:$0xf]  ;;  %v8531_v11 = vld [vmem:[#allocation9 + $0x3ec] sm:$0xf] }
 0x31a   : > { %5108 = vmatpush.bf16.msrb.mxu3 %v7812_v34  ;;  %v7847_v34 = vld [vmem:[#allocation9 + $0x368] sm:$0xf]  ;;  %v8481_v44 = vld [vmem:[#allocation9 + $0x254] sm:$0xf0]  ;;  %v7913_v13 = vld [vmem:[#allocation9 + $0x3f8] sm:$0xf0] }
 0x31b   : > { %5067 = vmatpush.bf16.msrb.mxu0 %v7412_v61  ;;  %5081 = vmatpush.bf16.msrb.mxu1 %v7540_v41  ;;  %v8417_v61 = vld [vmem:[#allocation9 + $0x54] sm:$0xf0]  ;;  %v7703_v28 = vld [vmem:[#allocation9 + $0x248] sm:$0xf]  ;;  %v7465_v58 = vld [vmem:[#allocation9 + $0x78] sm:$0xf0] }
 0x31c   : > { %5095 = vmatpush.bf16.msrb.mxu2 %v7668_v45  ;;  %v8449_v41 = vld [vmem:[#allocation9 + $0x154] sm:$0xf0]  ;;  %v7448_v45 = vor.u32 %v8417_v61, %v7447_v27  ;;  %v7704_v42 = vor.u32 %v8481_v44, %v7703_v28  ;;  %v7815_v30 = vld [vmem:[#allocation9 + $0x328] sm:$0xf]  ;;  %v8495_v27 = vld [vmem:[#allocation9 + $0x2cc] sm:$0xf] }
 0x31d   : > { %v8513_v35 = vld [vmem:[#allocation9 + $0x354] sm:$0xf0]  ;;  %v7415_v63 = vld [vmem:[#allocation9 + $0x8] sm:$0xf]  ;;  %v10503_v20 = vpop.f32.mrf.mxu1  ;;  %v7769_v61 = vld [vmem:[#allocation9 + $0x2d8] sm:$0xf0] }
 0x31e   : > { %5109 = vmatpush.bf16.msrb.mxu3 %v7796_v31  ;;  %5068 = vmatmul.bf16.vlgmr.msrb.gmra.mxu0 %v10478_v5  ;;  %v7576_v31 = vor.u32 %v8449_v41, %v7575_v37  ;;  %v8413_v46 = vld [vmem:[#allocation9 + $0x34] sm:$0xf0]  ;;  %v7671_v55 = vld [vmem:[#allocation9 + $0x208] sm:$0xf]  ;;  %v8527_v37 = vld [vmem:[#allocation9 + $0x3cc] sm:$0xf] }
 0x31f   : > { %5116 = vmatpush.bf16.msra.mxu0 %v7528_v21  ;;  %5130 = vmatpush.bf16.msra.mxu1 %v7656_v1  ;;  %v7848_v21 = vor.u32 %v8517_v7, %v7847_v34  ;;  %v7831_v1 = vld [vmem:[#allocation9 + $0x348] sm:$0xf]  ;;  %v8445_v40 = vld [vmem:[#allocation9 + $0x134] sm:$0xf0]  ;;  %v8463_v34 = vld [vmem:[#allocation9 + $0x1cc] sm:$0xf] }
 0x320   : > { %5144 = vmatpush.bf16.msra.mxu2 %v7784_v15  ;;  %5082 = vmatmul.bf16.vlgmr.msrb.gmra.mxu1 %v10486_v32  ;;  %v7431_v15 = vld [vmem:[#allocation9 + $0x28] sm:$0xf]  ;;  %v7832_v4 = vor.u32 %v8513_v35, %v7831_v1  ;;  %v8477_v23 = vld [vmem:[#allocation9 + $0x234] sm:$0xf0]  ;;  %v7641_v7 = vld [vmem:[#allocation9 + $0x1d8] sm:$0xf0]  ;;  %v7772_v1 = vor.u32 %v8495_v27, %v7769_v61 }
 0x321   : > { %5096 = vmatmul.bf16.vlgmr.msrb.gmra.mxu2 %v10458_v62  ;;  %5110 = vmatmul.bf16.vlgmr.msrb.gmra.mxu3 %v10466_v47  ;;  %v8509_v29 = vld [vmem:[#allocation9 + $0x334] sm:$0xf0]  ;;  %v7897_v41 = vld [vmem:[#allocation9 + $0x3d8] sm:$0xf0]  ;;  %v8427_v28 = vld [vmem:[#allocation9 + $0xac] sm:$0xf] }
 0x322   : > { %5158 = vmatpush.bf16.msra.mxu3 %v7912_v19  ;;  %v7559_v19 = vld [vmem:[#allocation9 + $0x128] sm:$0xf]  ;;  %v8441_v36 = vld [vmem:[#allocation9 + $0x114] sm:$0xf0]  ;;  %v7816_v0 = vor.u32 %v8509_v29, %v7815_v30  ;;  %v7497_v44 = vld [vmem:[#allocation9 + $0xb8] sm:$0xf0] }
 0x323   : > { %5117 = vmatpush.bf16.msra.mxu0 %v7512_v51  ;;  %5131 = vmatpush.bf16.msra.mxu1 %v7640_v14  ;;  %v7687_v51 = vld [vmem:[#allocation9 + $0x228] sm:$0xf]  ;;  %v7432_v14 = vor.u32 %v8413_v46, %v7431_v15  ;;  %v7560_v24 = vor.u32 %v8445_v40, %v7559_v19  ;;  %v8473_v49 = vld [vmem:[#allocation9 + $0x214] sm:$0xf0]  ;;  %v8459_v35 = vld [vmem:[#allocation9 + $0x1ac] sm:$0xf]  ;;  %v7900_v46 = vor.u32 %v8527_v37, %v7897_v41 }
 0x324   : > { %5145 = vmatpush.bf16.msra.mxu2 %v7768_v52  ;;  %v8409_v52 = vld [vmem:[#allocation9 + $0x14] sm:$0xf0]  ;;  %v7688_v25 = vor.u32 %v8477_v23, %v7687_v51  ;;  %v7753_v19 = vld [vmem:[#allocation9 + $0x2b8] sm:$0xf0]  ;;  %v7500_v40 = vor.u32 %v8427_v28, %v7497_v44  ;;  %v8479_v61 = vld [vmem:[#allocation9 + $0x24c] sm:$0xf] }
 0x325   : > { %v7416_v3 = vor.u32 %v8409_v52, %v7415_v63  ;;  %v8505_v6 = vld [vmem:[#allocation9 + $0x314] sm:$0xf0]  ;;  %v7881_v51 = vld [vmem:[#allocation9 + $0x3b8] sm:$0xf0]  ;;  %v8455_v52 = vld [vmem:[#allocation9 + $0x18c] sm:$0xf] }
 0x326   : > { %5159 = vmatpush.bf16.msra.mxu3 %v7896_v22  ;;  %v7543_v22 = vld [vmem:[#allocation9 + $0x108] sm:$0xf]  ;;  %v7481_v29 = vld [vmem:[#allocation9 + $0x98] sm:$0xf0]  ;;  %v8511_v41 = vld [vmem:[#allocation9 + $0x34c] sm:$0xf] }
 0x327   : > { %5118 = vmatpush.bf16.msra.mxu0 %v7496_v12  ;;  %5132 = vmatpush.bf16.msra.mxu1 %v7624_v48  ;;  %v10499_v12 = vpop.f32.mrf.mxu3  ;;  %v8435_v48 = vld [vmem:[#allocation9 + $0xec] sm:$0xf]  ;;  %v7544_v50 = vor.u32 %v8441_v36, %v7543_v22 }
 0x328   : > { %5146 = vmatpush.bf16.msra.mxu2 %v7752_v57  ;;  %v7799_v57 = vld [vmem:[#allocation9 + $0x308] sm:$0xf]  ;;  %v8487_v36 = vld [vmem:[#allocation9 + $0x28c] sm:$0xf] }
 0x329   : > { %v7800_v26 = vor.u32 %v8505_v6, %v7799_v57  ;;  %v8419_v57 = vld [vmem:[#allocation9 + $0x6c] sm:$0xf]  ;;  %v7593_v6 = vld [vmem:[#allocation9 + $0x178] sm:$0xf0] }
 0x32a   : > { %5160 = vmatpush.bf16.msra.mxu3 %v7880_v2  ;;  %v10501_v2 = vpop.f32.mrf.mxu0  ;;  %v8411_v44 = vld [vmem:[#allocation9 + $0x2c] sm:$0xf] }
 0x32b   : > { %5119 = vmatpush.bf16.msra.mxu0 %v7480_v59  ;;  %5133 = vmatpush.bf16.msra.mxu1 %v7608_v10  ;;  %v8499_v59 = vld [vmem:[#allocation9 + $0x2ec] sm:$0xf]  ;;  %v7532_v10 = vor.u32 %v8435_v48, %v7529_v54  ;;  %v7865_v54 = vld [vmem:[#allocation9 + $0x398] sm:$0xf0] }
 0x32c   : > { %5147 = vmatpush.bf16.msra.mxu2 %v7736_v8  ;;  %v7672_v8 = vor.u32 %v8473_v49, %v7671_v55  ;;  %v7737_v55 = vld [vmem:[#allocation9 + $0x298] sm:$0xf0]  ;;  %v8519_v48 = vld [vmem:[#allocation9 + $0x38c] sm:$0xf] }
 0x32d   : > { %v7740_v43 = vor.u32 %v8487_v36, %v7737_v55  ;;  %v8439_v36 = vld [vmem:[#allocation9 + $0x10c] sm:$0xf]  ;;  %v7545_v55 = vld [vmem:[#allocation9 + $0x118] sm:$0xf0] }
 0x32e   : > { %5161 = vmatpush.bf16.msra.mxu3 %v7864_v39  ;;  %v7513_v39 = vld [vmem:[#allocation9 + $0xd8] sm:$0xf0] }
 0x32f   : > { %5120 = vmatpush.bf16.msra.mxu0 %v7464_v9  ;;  %5134 = vmatpush.bf16.msra.mxu1 %v7592_v16  ;;  %v7788_v9 = vor.u32 %v8499_v59, %v7785_v60  ;;  %v7916_v16 = vor.u32 %v8531_v11, %v7913_v13  ;;  %v10507_v15 = vpop.f32.mrf.mxu3  ;;  %v7868_v59 = vor.u32 %v8519_v48, %v7865_v54  ;;  %v8483_v60 = vld [vmem:[#allocation9 + $0x26c] sm:$0xf] }
 0x330   : > { %5148 = vmatpush.bf16.msra.mxu2 %v7720_v18  ;;  %v7516_v18 = vor.u32 %v8431_v38, %v7513_v39  ;;  %v7468_v11 = vor.u32 %v8419_v57, %v7465_v58  ;;  %v8515_v13 = vld [vmem:[#allocation9 + $0x36c] sm:$0xf]  ;;  %v7673_v57 = vld [vmem:[#allocation9 + $0x218] sm:$0xf0] }
 0x331   : > { %v8415_v39 = vld [vmem:[#allocation9 + $0x4c] sm:$0xf] }
 0x332   : > { %5162 = vmatpush.bf16.msra.mxu3 %v7848_v21  ;;  %v7644_v21 = vor.u32 %v8463_v34, %v7641_v7  ;;  %v10511_v23 = vpop.f32.mrf.mxu0  ;;  %v8447_v34 = vld [vmem:[#allocation9 + $0x14c] sm:$0xf]  ;;  %v7577_v7 = vld [vmem:[#allocation9 + $0x158] sm:$0xf0] }
 0x333   : > { %5121 = vmatpush.bf16.msra.mxu0 %v7448_v45  ;;  %5135 = vmatpush.bf16.msra.mxu1 %v7576_v31  ;;  %v10505_v45 = vpop.f32.mrf.mxu2  ;;  %v7625_v31 = vld [vmem:[#allocation9 + $0x1b8] sm:$0xf0]  ;;  %v7580_v28 = vor.u32 %v8447_v34, %v7577_v7  ;;  %v8538_v34 = vld [vmem:[#allocation12 + $0x20] sm:$0xff] }
 0x334   : > { %5149 = vmatpush.bf16.msra.mxu2 %v7704_v42  ;;  %v8491_v42 = vld [vmem:[#allocation9 + $0x2ac] sm:$0xf]  ;;  %v7628_v30 = vor.u32 %v8459_v35, %v7625_v31 }
 0x335   : > { %v7756_v63 = vor.u32 %v8491_v42, %v7753_v19  ;;  %v7561_v42 = vld [vmem:[#allocation9 + $0x138] sm:$0xf0] }
 0x336   : > { %5163 = vmatpush.bf16.msra.mxu3 %v7832_v4  ;;  %v8523_v4 = vld [vmem:[#allocation9 + $0x3ac] sm:$0xf] }
 0x337   : > { %5122 = vmatpush.bf16.msra.mxu0 %v7432_v14  ;;  %5136 = vmatpush.bf16.msra.mxu1 %v7560_v24  ;;  %v8423_v14 = vld [vmem:[#allocation9 + $0x8c] sm:$0xf]  ;;  %v7609_v24 = vld [vmem:[#allocation9 + $0x198] sm:$0xf0]  ;;  %v7884_v22 = vor.u32 %v8523_v4, %v7881_v51 }
 0x338   : > { %5150 = vmatpush.bf16.msra.mxu2 %v7688_v25  ;;  %v10515_v25 = vpop.f32.mrf.mxu1  ;;  %v7484_v49 = vor.u32 %v8423_v14, %v7481_v29  ;;  %v7689_v4 = vld [vmem:[#allocation9 + $0x238] sm:$0xf0] }
 0x339   : > { %v7817_v14 = vld [vmem:[#allocation9 + $0x338] sm:$0xf0] }
 0x33a   : > { %5164 = vmatpush.bf16.msra.mxu3 %v7816_v0  ;;  %v7612_v0 = vor.u32 %v8455_v52, %v7609_v24  ;;  %v7417_v52 = vld [vmem:[#allocation9 + $0x18] sm:$0xf0] }
 0x33b   : > { %5123 = vmatpush.bf16.msra.mxu0 %v7416_v3  ;;  %5137 = vmatpush.bf16.msra.mxu1 %v7544_v50  ;;  %v8451_v3 = vld [vmem:[#allocation9 + $0x16c] sm:$0xf]  ;;  %v7721_v50 = vld [vmem:[#allocation9 + $0x278] sm:$0xf0] }
 0x33c   : > { %5151 = vmatpush.bf16.msra.mxu2 %v7672_v8  ;;  %v7849_v8 = vld [vmem:[#allocation9 + $0x378] sm:$0xf0]  ;;  %v7596_v38 = vor.u32 %v8451_v3, %v7593_v6  ;;  %v7548_v6 = vor.u32 %v8439_v36, %v7545_v55 }
 0x33d   : > { %v7852_v27 = vor.u32 %v8515_v13, %v7849_v8  ;;  %v7801_v3 = vld [vmem:[#allocation9 + $0x318] sm:$0xf0]  ;;  %v8540_v13 = vld [vmem:[#allocation12 + $0x30] sm:$0xff] }
 0x33e   : > { %5165 = vmatpush.bf16.msra.mxu3 %v7800_v26  ;;  %5124 = vmatmul.bf16.vlgmr.msra.gmra.mxu0 %v10478_v5  ;;  %v7449_v26 = vld [vmem:[#allocation9 + $0x58] sm:$0xf0] }
 0x33f   : > { %5172 = vmatpush.bf16.msrb.mxu0 %v7532_v10  ;;  %5186 = vmatpush.bf16.msrb.mxu1 %v7660_v56  ;;  %v10517_v10 = vpop.f32.mrf.mxu2  ;;  %v10519_v56 = vpop.f32.mrf.mxu3  ;;  %v7452_v37 = vor.u32 %v8415_v39, %v7449_v26  ;;  %v8539_v26 = vld [vmem:[#allocation12 + $0x28] sm:$0xff] }
 0x340   : > { %5200 = vmatpush.bf16.msrb.mxu2 %v7788_v9  ;;  %5138 = vmatmul.bf16.vlgmr.msra.gmra.mxu1 %v10486_v32  ;;  %v7724_v9 = vor.u32 %v8483_v60, %v7721_v50  ;;  %v10523_v35 = vpop.f32.mrf.mxu1 }
 0x341   : > { %5152 = vmatmul.bf16.vlgmr.msra.gmra.mxu2 %v10458_v62  ;;  %5166 = vmatmul.bf16.vlgmr.msra.gmra.mxu3 %v10466_v47 }
 0x342   : > { %5214 = vmatpush.bf16.msrb.mxu3 %v7916_v16  ;;  %v10521_v16 = vpop.f32.mrf.mxu0 }
 0x343   : > { %5173 = vmatpush.bf16.msrb.mxu0 %v7516_v18  ;;  %5187 = vmatpush.bf16.msrb.mxu1 %v7644_v21  ;;  %v7705_v18 = vld [vmem:[#allocation9 + $0x258] sm:$0xf0] }
 0x344   : > { %5201 = vmatpush.bf16.msrb.mxu2 %v7772_v1  ;;  %v7833_v21 = vld [vmem:[#allocation9 + $0x358] sm:$0xf0]  ;;  %v7708_v31 = vor.u32 %v8479_v61, %v7705_v18 }
 0x345   : > { %v7433_v1 = vld [vmem:[#allocation9 + $0x38] sm:$0xf0]  ;;  %v7836_v19 = vor.u32 %v8511_v41, %v7833_v21 }
 0x346   : > { %5215 = vmatpush.bf16.msrb.mxu3 %v7900_v46  ;;  %v8443_v46 = vld [vmem:[#allocation9 + $0x12c] sm:$0xf]  ;;  %v7436_v51 = vor.u32 %v8411_v44, %v7433_v1 }
 0x347   : > { %5174 = vmatpush.bf16.msrb.mxu0 %v7500_v40  ;;  %5188 = vmatpush.bf16.msrb.mxu1 %v7628_v30  ;;  %v8475_v40 = vld [vmem:[#allocation9 + $0x22c] sm:$0xf]  ;;  %v7564_v29 = vor.u32 %v8443_v46, %v7561_v42  ;;  %v4107_v24 = vpop.f32.mrf.mxu2 }
 0x348   : > { %5202 = vmatpush.bf16.msrb.mxu2 %v7756_v63  ;;  %v8507_v30 = vld [vmem:[#allocation9 + $0x32c] sm:$0xf]  ;;  %v4147_v60 = vpop.f32.mrf.mxu1 }
 0x349   : > { %v8407_v63 = vld [vmem:[#allocation9 + $0xc] sm:$0xf]  ;;  %v7820_v54 = vor.u32 %v8507_v30, %v7817_v14 }
 0x34a   : > { %5216 = vmatpush.bf16.msrb.mxu3 %v7884_v22  ;;  %v7692_v22 = vor.u32 %v8475_v40, %v7689_v4  ;;  %v4133_v48 = vpop.f32.mrf.mxu0  ;;  %v7420_v58 = vor.u32 %v8407_v63, %v7417_v52 }
 0x34b   : > { %5175 = vmatpush.bf16.msrb.mxu0 %v7484_v49  ;;  %5189 = vmatpush.bf16.msrb.mxu1 %v7612_v0  ;;  %v10525_v49 = vpop.f32.mrf.mxu3  ;;  %v8471_v0 = vld [vmem:[#allocation9 + $0x20c] sm:$0xf] }
 0x34c   : > { %5203 = vmatpush.bf16.msrb.mxu2 %v7740_v43  ;;  %v8503_v43 = vld [vmem:[#allocation9 + $0x30c] sm:$0xf]  ;;  %v7676_v50 = vor.u32 %v8471_v0, %v7673_v57 }
 0x34e   : > { %5217 = vmatpush.bf16.msrb.mxu3 %v7868_v59  ;;  %v8541_v59 = vld [vmem:[#allocation12 + $0x38] sm:$0xff] }
 0x34f   : > { %5176 = vmatpush.bf16.msrb.mxu0 %v7468_v11  ;;  %5190 = vmatpush.bf16.msrb.mxu1 %v7596_v38  ;;  %v7804_v11 = vor.u32 %v8503_v43, %v7801_v3  ;;  %v4161_v8 = vpop.f32.mrf.mxu2 }
 0x350   : > { %5204 = vmatpush.bf16.msrb.mxu2 %v7724_v9  ;;  %v4149_v9 = vpop.f32.mrf.mxu1 }
 0x352   : > { %5218 = vmatpush.bf16.msrb.mxu3 %v7852_v27  ;;  %v4135_v39 = vpop.f32.mrf.mxu0  ;;  %v4092_v27 = vadd.f32 %v10515_v25, %v10511_v23  ;;  %v4038_v23 = vadd.f32 %v10503_v20, %v10501_v2 }
 0x353   : > { %5177 = vmatpush.bf16.msrb.mxu0 %v7452_v37  ;;  %5191 = vmatpush.bf16.msrb.mxu1 %v7580_v28  ;;  %v4175_v38 = vpop.f32.mrf.mxu3  ;;  %v4148_v37 = vadd.f32 %v4147_v60, %v4133_v48  ;;  %v8536_v28 = vld [vmem:[#allocation12 + $0x10] sm:$0xff]  ;;  %v4150_v1 = vadd.f32 %v4149_v9, %v4135_v39  ;;  %v8547_v9 = vld [vmem:[#allocation14 + $0x28] sm:$0xff] }
 0x354   : > { %5205 = vmatpush.bf16.msrb.mxu2 %v7708_v31  ;;  %v4106_v41 = vadd.f32 %v10517_v10, %v4092_v27  ;;  %v8535_v10 = vld [vmem:[#allocation12 + $0x8] sm:$0xff]  ;;  %v8548_v39 = vld [vmem:[#allocation14 + $0x30] sm:$0xff] }
 0x355   : > { %v4162_v25 = vadd.f32 %v4161_v8, %v4148_v37 }
 0x356   : > { %5219 = vmatpush.bf16.msrb.mxu3 %v7836_v19 }
 0x357   : > { %5178 = vmatpush.bf16.msrb.mxu0 %v7436_v51  ;;  %5192 = vmatpush.bf16.msrb.mxu1 %v7564_v29  ;;  %v4163_v7 = vpop.f32.mrf.mxu2  ;;  %v4176_v40 = vadd.f32 %v4175_v38, %v4162_v25 }
 0x358   : > { %5206 = vmatpush.bf16.msrb.mxu2 %v7692_v22 }
 0x35a   : > { %5220 = vmatpush.bf16.msrb.mxu3 %v7820_v54 }
 0x35b   : > { %5179 = vmatpush.bf16.msrb.mxu0 %v7420_v58  ;;  %5193 = vmatpush.bf16.msrb.mxu1 %v7548_v6  ;;  %v4177_v61 = vpop.f32.mrf.mxu3  ;;  %v4189_v18 = vpop.f32.mrf.mxu0 }
 0x35c   : > { %5207 = vmatpush.bf16.msrb.mxu2 %v7676_v50  ;;  %v8549_v50 = vld [vmem:[#allocation14 + $0x38] sm:$0xff] }
 0x35e   : > { %5221 = vmatpush.bf16.msrb.mxu3 %v7804_v11  ;;  %5180 = vmatmul.bf16.vlgmr.msrb.gmra.mxu0 %v10478_v5  ;;  %v8537_v5 = vld [vmem:[#allocation12 + $0x18] sm:$0xff] }
 0x35f   : > { %5324 = vmatpush.bf16.msra.mxu0 %v8541_v59  ;;  %5194 = vmatmul.bf16.vlgmr.msrb.gmra.mxu1 %v10486_v32  ;;  %v4036_v32 = vadd.f32 %v10495_v17, %v10493_v33  ;;  %v4120_v33 = vadd.f32 %v10519_v56, %v4106_v41  ;;  %v8534_v56 = vld [vmem:[#allocation12] sm:$0xff]  ;;  %v8544_v41 = vld [vmem:[#allocation14 + $0x10] sm:$0xff] }
 0x360   : > { %5208 = vmatmul.bf16.vlgmr.msrb.gmra.mxu2 %v10458_v62  ;;  %v4203_v62 = vpop.f32.mrf.mxu1  ;;  %5402 = vmatpush.bf16.msra.mxu1 %v8549_v50 }
 0x361   : > { %5222 = vmatmul.bf16.vlgmr.msrb.gmra.mxu3 %v10466_v47  ;;  %v4094_v47 = vadd.f32 %v10523_v35, %v10521_v16  ;;  %v4204_v21 = vadd.f32 %v4203_v62, %v4189_v18  ;;  %v4050_v44 = vadd.f32 %v10497_v53, %v4036_v32  ;;  %v4052_v35 = vadd.f32 %v10505_v45, %v4038_v23  ;;  %v8545_v32 = vld [vmem:[#allocation14 + $0x18] sm:$0xff] }
 0x362   : > { %v4164_v53 = vadd.f32 %v4163_v7, %v4150_v1 }
 0x363   : > { %5325 = vmatpush.bf16.msra.mxu0 %v8540_v13  ;;  %v4108_v17 = vadd.f32 %v4107_v24, %v4094_v47  ;;  %v4191_v19 = vpop.f32.mrf.mxu0  ;;  %v4064_v16 = vadd.f32 %v10499_v12, %v4050_v44  ;;  %v4066_v14 = vadd.f32 %v10507_v15, %v4052_v35  ;;  %v8542_v44 = vld [vmem:[#allocation14] sm:$0xff] }
 0x364   : > { %v4217_v31 = vpop.f32.mrf.mxu2  ;;  %v4231_v42 = vpop.f32.mrf.mxu3  ;;  %v4178_v63 = vadd.f32 %v4177_v61, %v4164_v53  ;;  %5403 = vmatpush.bf16.msra.mxu1 %v8548_v39  ;;  %v8546_v61 = vld [vmem:[#allocation14 + $0x20] sm:$0xff] }
 0x365   : > { %v4218_v46 = vadd.f32 %v4217_v31, %v4204_v21  ;;  %v5228_v51 = vmax.f32 %v4064_v16, %v4120_v33  ;;  %v4122_v2 = vadd.f32 %v10525_v49, %v4108_v17 }
 0x367   : > { %5326 = vmatpush.bf16.msra.mxu0 %v8539_v26  ;;  %v4232_v20 = vadd.f32 %v4231_v42, %v4218_v46  ;;  %v5230_v29 = vmax.f32 %v5228_v51, %v4176_v40  ;;  %v5229_v24 = vmax.f32 %v4066_v14, %v4122_v2 }
 0x368   : > { %v4205_v4 = vpop.f32.mrf.mxu1  ;;  %5404 = vmatpush.bf16.msra.mxu1 %v8547_v9 }
 0x369   : > { %v4206_v30 = vadd.f32 %v4205_v4, %v4191_v19  ;;  %v5232_v22 = vmax.f32 %v5230_v29, %v4232_v20  ;;  %v5231_v45 = vmax.f32 %v5229_v24, %v4178_v63 }
 0x36b   : > { %5327 = vmatpush.bf16.msra.mxu0 %v8538_v34  ;;  %v5236_v48 = vmul.f32 0.01, %v5232_v22  ;;  %vm5234_vm0 = vcmp.ge.f32.partialorder %v5232_v22, 0.0 }
 0x36c   : > { %v4219_v52 = vpop.f32.mrf.mxu2  ;;  %v4233_v36 = vpop.f32.mrf.mxu3  ;;  %5405 = vmatpush.bf16.msra.mxu1 %v8546_v61 }
 0x36d   : > { %v4220_v12 = vadd.f32 %v4219_v52, %v4206_v30  ;;  %v5238_v0 = vsel %vm5234_vm0, %v5232_v22, %v5236_v48 }
 0x36f   : > { %5328 = vmatpush.bf16.msra.mxu0 %v8537_v5  ;;  %v4234_v55 = vadd.f32 %v4233_v36, %v4220_v12 }
 0x370   : > { %5406 = vmatpush.bf16.msra.mxu1 %v8545_v32  ;;  %v8550_v32 = vld [vmem:[#allocation17] sm:$0xff] }
 0x371   : > { %v5233_v54 = vmax.f32 %v5231_v45, %v4234_v55 }
 0x373   : > { %5329 = vmatpush.bf16.msra.mxu0 %v8536_v28  ;;  %vm5235_vm1 = vcmp.ge.f32.partialorder %v5233_v54, 0.0  ;;  %v5237_v49 = vmul.f32 0.01, %v5233_v54  ;;  %v8543_v28 = vld [vmem:[#allocation14 + $0x8] sm:$0xff] }
 0x374   : > { %5407 = vmatpush.bf16.msra.mxu1 %v8544_v41  ;;  %v8553_v41 = vld [vmem:[#allocation18 + $0x8] sm:$0xff] }
 0x375   : > { %v5239_v57 = vsel %vm5235_vm1, %v5233_v54, %v5237_v49  ;;  %5518 = vmatpush.bf16.msra.mxu2 %v8553_v41 }
 0x376   : > { %v5240_v58 = vpack.c.bf16 %v5239_v57, %v5238_v0  ;;  %v8734_v57 = vld [vmem:[#allocation11] ss:$0 sm:$0xff] }
 0x377   : > { %5330 = vmatpush.bf16.msra.mxu0 %v8535_v10 }
 0x378   : > { %5408 = vmatpush.bf16.msra.mxu1 %v8543_v28 }
 0x37b   : > { %5331 = vmatpush.bf16.msra.mxu0 %v8534_v56 }
 0x37c   : > { %5409 = vmatpush.bf16.msra.mxu1 %v8542_v44  ;;  %v8552_v44 = vld [vmem:[#allocation18] sm:$0xff] }
 0x37d   : > { %v5013_v15 = vpop.f32.mrf.mxu0  ;;  %5519 = vmatpush.bf16.msra.mxu2 %v8552_v44 }
 0x37e   : > { %5332 = vmatmul.bf16.vlgmr.msra.gmra.mxu0 %v5240_v58 }
 0x37f   : > { %v5027_v43 = vpop.f32.mrf.mxu1 }
 0x380   : > { %v5028_v33 = vadd.f32 %v5027_v43, %v5013_v15 }
 0x384   : > { %v5041_v3 = vpop.f32.mrf.mxu2  ;;  %v5055_v6 = vpop.f32.mrf.mxu3 }
 0x385   : > { %v5015_v59 = vpop.f32.mrf.mxu0  ;;  %v5042_v16 = vadd.f32 %v5041_v3, %v5028_v33 }
 0x387   : > { %v5029_v60 = vpop.f32.mrf.mxu1  ;;  %v5056_v30 = vadd.f32 %v5055_v6, %v5042_v16 }
 0x388   : > { %v5030_v4 = vadd.f32 %v5029_v60, %v5015_v59 }
 0x38c   : > { %v5043_v11 = vpop.f32.mrf.mxu2  ;;  %v5057_v13 = vpop.f32.mrf.mxu3 }
 0x38d   : > { %v5044_v52 = vadd.f32 %v5043_v11, %v5030_v4 }
 0x38f   : > { %v5058_v54 = vadd.f32 %v5057_v13, %v5044_v52 }
 0x39b   : > { %v5069_v8 = vpop.f32.mrf.mxu0 }
 0x39d   : > { %v5083_v38 = vpop.f32.mrf.mxu1 }
 0x39e   : > { %v5084_v1 = vadd.f32 %v5083_v38, %v5069_v8 }
 0x3a3   : > { %v5071_v7 = vpop.f32.mrf.mxu0 }
 0x3a4   : > { %v5097_v26 = vpop.f32.mrf.mxu2  ;;  %v5111_v34 = vpop.f32.mrf.mxu3 }
 0x3a5   : > { %v5085_v27 = vpop.f32.mrf.mxu1  ;;  %v5098_v19 = vadd.f32 %v5097_v26, %v5084_v1 }
 0x3a6   : > { %v5086_v35 = vadd.f32 %v5085_v27, %v5071_v7 }
 0x3a7   : > { %v5112_v51 = vadd.f32 %v5111_v34, %v5098_v19 }
 0x3a9   : > { %v5241_v24 = vmax.f32 %v5056_v30, %v5112_v51 }
 0x3ac   : > { %v5099_v18 = vpop.f32.mrf.mxu2  ;;  %v5113_v5 = vpop.f32.mrf.mxu3 }
 0x3ad   : > { %v5100_v56 = vadd.f32 %v5099_v18, %v5086_v35 }
 0x3af   : > { %v5114_v55 = vadd.f32 %v5113_v5, %v5100_v56  ;;  %v8551_v5 = vld [vmem:[#allocation17 + $0x8] sm:$0xff] }
 0x3b0   : > { %5547 = vmatpush.bf16.msra.mxu3 %v8551_v5  ;;  %v8738_v5 = vld [vmem:[#allocation24] ss:$0 sm:$0xff] }
 0x3b1   : > { %v5242_v43 = vmax.f32 %v5058_v54, %v5114_v55  ;;  %v8555_v54 = vld [vmem:[#allocation21 + $0x8] sm:$0xff] }
 0x3b2   : > { %5593 = vmatpush.bf16.msrb.mxu2 %v8555_v54 }
 0x3b4   : > { %5548 = vmatpush.bf16.msra.mxu3 %v8550_v32 }
 0x3bb   : > { %v5125_v37 = vpop.f32.mrf.mxu0 }
 0x3bd   : > { %v5139_v62 = vpop.f32.mrf.mxu1 }
 0x3be   : > { %v5140_v17 = vadd.f32 %v5139_v62, %v5125_v37 }
 0x3c3   : > { %v5127_v23 = vpop.f32.mrf.mxu0 }
 0x3c4   : > { %v5153_v47 = vpop.f32.mrf.mxu2  ;;  %v5167_v21 = vpop.f32.mrf.mxu3 }
 0x3c5   : > { %v5141_v25 = vpop.f32.mrf.mxu1  ;;  %v5154_v40 = vadd.f32 %v5153_v47, %v5140_v17 }
 0x3c6   : > { %v5142_v2 = vadd.f32 %v5141_v25, %v5127_v23 }
 0x3c7   : > { %v5168_v14 = vadd.f32 %v5167_v21, %v5154_v40 }
 0x3c9   : > { %v5243_v48 = vmax.f32 %v5241_v24, %v5168_v14  ;;  %v8735_v14 = vld [vmem:[#allocation15] ss:$0 sm:$0xff] }
 0x3cc   : > { %v5155_v31 = vpop.f32.mrf.mxu2  ;;  %v5169_v46 = vpop.f32.mrf.mxu3 }
 0x3cd   : > { %v5156_v22 = vadd.f32 %v5155_v31, %v5142_v2 }
 0x3cf   : > { %v5170_v49 = vadd.f32 %v5169_v46, %v5156_v22 }
 0x3d1   : > { %v5244_v59 = vmax.f32 %v5242_v43, %v5170_v49  ;;  %v8554_v49 = vld [vmem:[#allocation21] sm:$0xff]  ;;  %v8736_v43 = vld [vmem:[#allocation20] ss:$0 sm:$0xff] }
 0x3d2   : > { %5594 = vmatpush.bf16.msrb.mxu2 %v8554_v49 }
 0x3db   : > { %v5181_v42 = vpop.f32.mrf.mxu0 }
 0x3dc   : > { %v5195_v10 = vpop.f32.mrf.mxu1 }
 0x3dd   : > { %v5196_v53 = vadd.f32 %v5195_v10, %v5181_v42 }
 0x3e3   : > { %v5209_v20 = vpop.f32.mrf.mxu2  ;;  %v5183_v36 = vpop.f32.mrf.mxu0 }
 0x3e4   : > { %v5210_v29 = vadd.f32 %v5209_v20, %v5196_v53  ;;  %v5223_v63 = vpop.f32.mrf.mxu3  ;;  %v5197_v45 = vpop.f32.mrf.mxu1 }
 0x3e5   : > { %v5198_v58 = vadd.f32 %v5197_v45, %v5183_v36 }
 0x3e6   : > { %v5224_v12 = vadd.f32 %v5223_v63, %v5210_v29 }
 0x3e8   : > { %v5245_v0 = vmax.f32 %v5243_v48, %v5224_v12 }
 0x3ea   : > { %v5251_v60 = vadd.f32 %v8734_v57, %v5245_v0  ;;  %v8557_v0 = vld [vmem:[%s10642_s4 + $0x8] sm:$0xff] }
 0x3eb   : > { %v5211_v15 = vpop.f32.mrf.mxu2  ;;  %5633 = vmatpush.bf16.msrb.mxu3 %v8557_v0 }
 0x3ec   : > { %v5212_v3 = vadd.f32 %v5211_v15, %v5198_v58  ;;  %v5225_v6 = vpop.f32.mrf.mxu3  ;;  %v5255_v8 = vmul.f32 0.01, %v5251_v60  ;;  %vm5253_vm2 = vcmp.ge.f32.partialorder %v5251_v60, 0.0 }
 0x3ee   : > { %v5226_v50 = vadd.f32 %v5225_v6, %v5212_v3  ;;  %v5257_v26 = vsel %vm5253_vm2, %v5251_v60, %v5255_v8 }
 0x3f0   : > { %v5246_v11 = vmax.f32 %v5244_v59, %v5226_v50 }
 0x3f2   : > { %v5252_v38 = vadd.f32 %v8734_v57, %v5246_v11 }
 0x3f4   : > { %vm5254_vm3 = vcmp.ge.f32.partialorder %v5252_v38, 0.0  ;;  %v5256_v39 = vmul.f32 0.01, %v5252_v38 }
 0x3f6   : > { %v5258_v9 = vsel %vm5254_vm3, %v5252_v38, %v5256_v39  ;;  %v8556_v39 = vld [vmem:[%s10642_s4] sm:$0xff] }
 0x3f7   : > { %v5259_v13 = vpack.c.bf16 %v5258_v9, %v5257_v26  ;;  %5634 = vmatpush.bf16.msrb.mxu3 %v8556_v39  ;;  %v8737_v9 = vld [vmem:[#allocation23] ss:$0 sm:$0xff] }
 0x3f9   : > { %5410 = vmatmul.bf16.vlgmr.msra.gmra.mxu1 %v5259_v13 }
 0x3fb   : > { %v5333_v34 = vpop.f32.mrf.mxu0 }
 0x3fc   : > { %5426 = vrot.lane.b32.xlu0 %v5333_v34, %s9241_s19  ;;  %5418 = vrot.lane.b32.xlu1 %v5333_v34, %s9242_s18 }
 0x403   : > { %v5335_v7 = vpop.f32.mrf.mxu0 }
 0x404   : > { %5420 = vrot.lane.b32.xlu1 %v5335_v7, %s9242_s18 }
 0x40c   : > { %5428 = vrot.lane.b32.xlu1 %v5335_v7, %s9241_s19 }
 0x414   : > { %5434 = vrot.lane.b32.xlu1 %v5333_v34, %s9243_s6 }
 0x46e   : > { %v5419_v18 = vpop.permute.xlu1 %5418  ;;  %v5427_v23 = vpop.permute.xlu0 %5426 }
 0x46f   : > { %v5424_v28 = vmax.f32 %v5333_v34, %v5419_v18 }
 0x471   : > { %v5432_v31 = vmax.f32 %v5424_v28, %v5427_v23 }
 0x476   : > { %v5411_v27 = vpop.f32.mrf.mxu1  ;;  %v5421_v37 = vpop.permute.xlu1 %5420 }
 0x477   : > { %5459 = vrot.lane.b32.xlu2 %v5411_v27, %s9241_s19  ;;  %5451 = vrot.lane.b32.xlu0 %v5411_v27, %s9242_s18  ;;  %v5425_v33 = vmax.f32 %v5335_v7, %v5421_v37 }
 0x47e   : > { %v5413_v61 = vpop.f32.mrf.mxu1  ;;  %v5429_v47 = vpop.permute.xlu1 %5428 }
 0x47f   : > { %5467 = vrot.lane.b32.xlu2 %v5411_v27, %s9243_s6  ;;  %5453 = vrot.lane.b32.xlu0 %v5413_v61, %s9242_s18  ;;  %v5433_v46 = vmax.f32 %v5425_v33, %v5429_v47 }
 0x486   : > { %v5435_v1 = vpop.permute.xlu1 %5434 }
 0x487   : > { %5461 = vrot.lane.b32.xlu2 %v5413_v61, %s9241_s19  ;;  %5469 = vrot.lane.b32.xlu0 %v5413_v61, %s9243_s6  ;;  %v5440_v17 = vmax.f32 %v5432_v31, %v5435_v1 }
 0x489   : > { %v5444_v19 = vmul.f32 0.01, %v5440_v17  ;;  %vm5442_vm4 = vcmp.ge.f32.partialorder %v5440_v17, 0.0 }
 0x48b   : > { %v5446_v53 = vsel %vm5442_vm4, %v5440_v17, %v5444_v19 }
 0x48f   : > { %5436 = vrot.lane.b32.xlu2 %v5335_v7, %s9243_s6 }
 0x4d1   : > { %v5460_v62 = vpop.permute.xlu2 %5459 }
 0x4d9   : > { %v5468_v21 = vpop.permute.xlu2 %5467 }
 0x4e1   : > { %v5462_v25 = vpop.permute.xlu2 %5461 }
 0x4e9   : > { %v5452_v42 = vpop.permute.xlu0 %5451  ;;  %v5437_v10 = vpop.permute.xlu2 %5436 }
 0x4ea   : > { %v5441_v16 = vmax.f32 %v5433_v46, %v5437_v10  ;;  %v5457_v35 = vmax.f32 %v5411_v27, %v5452_v42 }
 0x4ec   : > { %vm5443_vm5 = vcmp.ge.f32.partialorder %v5441_v16, 0.0  ;;  %v5445_v40 = vmul.f32 0.01, %v5441_v16  ;;  %v5465_v2 = vmax.f32 %v5457_v35, %v5460_v62 }
 0x4ee   : > { %v5447_v4 = vsel %vm5443_vm5, %v5441_v16, %v5445_v40  ;;  %v5473_v30 = vmax.f32 %v5465_v2, %v5468_v21 }
 0x4ef   : > { %v5448_v51 = vpack.c.bf16 %v5447_v4, %v5446_v53 }
 0x4f0   : > { %v5479_v63 = vadd.f32 %v8735_v14, %v5473_v30 }
 0x4f1   : > { %v5454_v20 = vpop.permute.xlu0 %5453  ;;  %7998 = vmatmul.msk.bf16.vlgmr.msra.gmra.mxu3 %vm5508_vm6, %v5448_v51 }
 0x4f2   : > { %v5458_v56 = vmax.f32 %v5413_v61, %v5454_v20  ;;  %v5483_v22 = vmul.f32 0.01, %v5479_v63  ;;  %vm5481_vm7 = vcmp.ge.f32.partialorder %v5479_v63, 0.0 }
 0x4f4   : > { %v5466_v29 = vmax.f32 %v5458_v56, %v5462_v25  ;;  %v5485_v45 = vsel %vm5481_vm7, %v5479_v63, %v5483_v22 }
 0x4f9   : > { %v5470_v52 = vpop.permute.xlu0 %5469 }
 0x4fa   : > { %v5474_v24 = vmax.f32 %v5466_v29, %v5470_v52 }
 0x4fc   : > { %v5480_v12 = vadd.f32 %v8735_v14, %v5474_v24 }
 0x4fe   : > { %vm5482_vm8 = vcmp.ge.f32.partialorder %v5480_v12, 0.0  ;;  %v5484_v36 = vmul.f32 0.01, %v5480_v12 }
 0x500   : > { %v5486_v55 = vsel %vm5482_vm8, %v5480_v12, %v5484_v36 }
 0x501   : > { %v5487_v48 = vpack.c.bf16 %v5486_v55, %v5485_v45 }
 0x503   : > { %7989 = vmatmul.msk.bf16.vlgmr.msra.gmra.mxu2 %vm5508_vm6, %v5487_v48 }
 0x574   : > { %v5550_v57 = vpop.f32.mrf.mxu3 }
 0x57c   : > { %v5552_v3 = vpop.f32.mrf.mxu3 }
 0x586   : > { %v5521_v58 = vpop.f32.mrf.mxu2 }
 0x587   : > { %v5551_v15 = vadd.f32 %v5550_v57, %v5521_v58 }
 0x589   : > { %v5559_v59 = vadd.f32 %v8736_v43, %v5551_v15 }
 0x58b   : > { %v5561_v11 = vmax.f32 %v5559_v59, 0.0 }
 0x58e   : > { %v5523_v6 = vpop.f32.mrf.mxu2 }
 0x58f   : > { %v5553_v60 = vadd.f32 %v5552_v3, %v5523_v6 }
 0x591   : > { %v5560_v50 = vadd.f32 %v8736_v43, %v5553_v60 }
 0x593   : > { %v5562_v8 = vmax.f32 %v5560_v50, 0.0 }
 0x595   : > { %v5563_v38 = vpack.c.bf16 %v5562_v8, %v5561_v11 }
 0x597   : > { %8007 = vmatmul.msk.bf16.vlgmr.msrb.gmra.mxu2 %vm5508_vm6, %v5563_v38 }
 0x61a   : > { %v5596_v26 = vpop.f32.mrf.mxu2 }
 0x61b   : > { %v5597_v13 = vadd.f32 %v8737_v9, %v5596_v26 }
 0x61d   : > { %v5601_v27 = vmax.f32 %v5597_v13, 0.0 }
 0x622   : > { %v5598_v34 = vpop.f32.mrf.mxu2 }
 0x623   : > { %v5599_v7 = vadd.f32 %v8737_v9, %v5598_v34 }
 0x625   : > { %v5602_v61 = vmax.f32 %v5599_v7, 0.0 }
 0x627   : > { %v5603_v18 = vpack.c.bf16 %v5602_v61, %v5601_v27 }
 0x629   : > { %8016 = vmatmul.msk.bf16.vlgmr.msrb.gmra.mxu3 %vm5508_vm6, %v5603_v18 }
 0x6ac   : > { %v5636_v32 = vpop.f32.mrf.mxu3 }
 0x6ad   : > { %v5637_v37 = vadd.f32 %v8738_v5, %v5636_v32 }
 0x6af   : > { %5642 = vst.msk [vmem:[%s10643_s27] sm:$0xff] %vm5641_vm9, %v5637_v37 }
 0x6b4   : > { %v5638_v62 = vpop.f32.mrf.mxu3 }
 0x6b5   : > { %v5639_v41 = vadd.f32 %v8738_v5, %v5638_v62 }
 0x6b7   : > { %5643 = vst.msk [vmem:[%s10643_s27 + $0x8] sm:$0xff] %vm5641_vm9, %v5639_v41 }
 0x6b8 PF: > { %s10644_s24 = sld [smem:[#allocation36_spill]]  ;;  %s10647_s22 = smov %s9215_s23 }
 0x6b9   : > { %s10645_s21 = sld [smem:[#allocation34_spill]] }
 0x6ba   : > { %s10646_s26 = sld [smem:[#allocation37_spill]] }
 0x6be   : > { %p33_p5 = scmp.ge.s32.totalorder %s10644_s24, 10  }
 0x6c0   : > { %s10648_s23 = smov %s10646_s26  ;;  %35 = sbr.rel (!%p33_p5) target bundleno = 18 (0x12), region = 229 }
 0x6c5   :  { %5655 = vsyncpa [#allocation5], 1 }
 0x6c6   :  { %5657 = vsyncpa [#allocation5 + $0x1], 1 }
 0x6c7   :  { %5658 = vsyncpa [#allocation7], 1 }
 0x6c8   :  { %5659 = vsyncpa [#allocation10], 1 }
 0x6c9   :  { %5660 = vsyncpa [#allocation13], 1 }
 0x6ca   :  { %5661 = vsyncpa [#allocation16], 1 }
 0x6cb   :  { %5662 = vsyncpa [#allocation19], 1 }
 0x6cc   :  { %5663 = vsyncpa [#allocation22], 1 }
 0x6cd   :  { %5664 = vsyncpa [#allocation25], 1 }

</bundles_post_ra>
